<compile_context>
chip_gen: v7x
topology: tpu7x:2x2x1
jax: 0.10.0
libtpu: 0.0.40
codegen_flags: <defaults>
</compile_context>

<pallas_src>
import functools

import jax
import jax.numpy as jnp
from jax.experimental import pallas as pl
from jax.experimental.pallas import tpu as pltpu


# -----------------------------------------------------------------------------
# In-kernel helpers (traced inside the single fused kernel body).
# -----------------------------------------------------------------------------
def _lstm_stack(x_tm, layer_refs, *, T, B):
    """Multi-layer LSTM on a time-major (T*B, D) activation slab.

    Returns the LAST layer's hidden states as a list [h_0, ..., h_{T-1}],
    each (B, H) float32.  All loops are static -> fully unrolled
    straight-line code (single basic block).
    """
    num_layers = len(layer_refs)
    hs = None
    for li, (w_ih_ref, w_hh_ref, b_ref) in enumerate(layer_refs):
        H = w_hh_ref.shape[0]
        w_ih = w_ih_ref[...]                         # (D, 4H)  bf16
        w_hh = w_hh_ref[...]                         # (H, 4H)  bf16
        bias = b_ref[...]                            # (1, 4H)  f32 (b_ih+b_hh)

        # Hoisted bulk input projection: one (T*B, D) x (D, 4H) matmul per
        # layer; the per-step operand is then a contiguous sublane window.
        x_proj = jnp.dot(x_tm.astype(jnp.bfloat16), w_ih,
                         preferred_element_type=jnp.float32) + bias  # (T*B, 4H)

        h = jnp.zeros((B, H), jnp.float32)
        c = jnp.zeros((B, H), jnp.float32)
        hs = []
        for t in range(T):                           # static & unrolled
            gates = (x_proj[t * B:(t + 1) * B, :] +
                     jnp.dot(h.astype(jnp.bfloat16), w_hh,
                             preferred_element_type=jnp.float32))    # (B, 4H)
            # Full-width activations: 2 EUP passes per step instead of 4.
            sig = jax.nn.sigmoid(gates)
            tnh = jnp.tanh(gates)
            i_g = sig[:, 0 * H:1 * H]
            f_g = sig[:, 1 * H:2 * H]
            g_g = tnh[:, 2 * H:3 * H]
            o_g = sig[:, 3 * H:4 * H]
            c = f_g * c + i_g * g_g
            h = o_g * jnp.tanh(c)
            hs.append(h)
        if li + 1 < num_layers:
            # Feed the next layer time-major directly (no (B,T,H) round-trip).
            # Inter-layer dropout is identity at inference time.
            x_tm = jnp.concatenate(hs, axis=0)       # (T*B, H)
    return hs


def _batch_major(hs, B):
    """[h_t (B, H)] * T  ->  (B*T, H) batch-major slab (contiguous per batch)."""
    rows = []
    for b in range(B):
        rows.extend(h_t[b:b + 1, :] for h_t in hs)
    return jnp.concatenate(rows, axis=0)


def _mha_batch(dec_bm, enc_bm, wq, wkv, wo_heads, bq, bkv, bo,
               *, B, Tq, Tk, num_heads):
    """Multi-head cross attention; returns a list of per-batch (Tq, E) outputs."""
    E = wq.shape[0]
    hd = E // num_heads
    scale = 1.0 / float(hd) ** 0.5

    # Batched projections over all B*T rows at once (fused K/V: N = 2E).
    q_proj = jnp.dot(dec_bm.astype(jnp.bfloat16), wq,
                     preferred_element_type=jnp.float32) + bq        # (B*Tq, E)
    kv_proj = jnp.dot(enc_bm.astype(jnp.bfloat16), wkv,
                      preferred_element_type=jnp.float32) + bkv      # (B*Tk, 2E)
    k_proj = kv_proj[:, :E]
    v_proj = kv_proj[:, E:]

    outs = []
    for b in range(B):                               # static unrolled
        qb = q_proj[b * Tq:(b + 1) * Tq, :]
        kb = k_proj[b * Tk:(b + 1) * Tk, :]
        vb = v_proj[b * Tk:(b + 1) * Tk, :]
        acc = jnp.zeros((Tq, E), jnp.float32)
        for h in range(num_heads):                   # static unrolled
            sl = slice(h * hd, (h + 1) * hd)
            q_h = (qb[:, sl] * scale).astype(jnp.bfloat16)           # (Tq, hd)
            k_h = kb[:, sl].astype(jnp.bfloat16)                     # (Tk, hd)
            v_h = vb[:, sl].astype(jnp.bfloat16)                     # (Tk, hd)
            scores = jax.lax.dot_general(                             # (Tq, Tk)
                q_h, k_h, (((1,), (1,)), ((), ())),
                preferred_element_type=jnp.float32)
            m = scores.max(axis=-1, keepdims=True)
            p = jnp.exp(scores - m)
            attn = p / p.sum(axis=-1, keepdims=True)  # exact softmax (f32)
            ctx_h = jnp.dot(attn.astype(jnp.bfloat16), v_h,
                            preferred_element_type=jnp.float32)      # (Tq, hd)
            # Head concat folded into the output projection: accumulate
            # ctx_h @ Wo_head instead of a 4-way lane concat + one big dot.
            acc = acc + jnp.dot(ctx_h.astype(jnp.bfloat16), wo_heads[h],
                                preferred_element_type=jnp.float32)
        outs.append(acc + bo)
    return outs


# -----------------------------------------------------------------------------
# The single fused kernel.
# -----------------------------------------------------------------------------
def _seq2seq_fused_kernel(*refs, num_layers, num_heads, B, T_in, T_out):
    i = 0
    x_enc_ref = refs[i]; i += 1           # (T_in*B, D_in)  f32, time-major
    x_dec_ref = refs[i]; i += 1           # (T_out*B, H)    f32, time-major
    enc_layers = [refs[i + 3 * l: i + 3 * l + 3] for l in range(num_layers)]
    i += 3 * num_layers
    dec_layers = [refs[i + 3 * l: i + 3 * l + 3] for l in range(num_layers)]
    i += 3 * num_layers
    wq_ref, wkv_ref, bq_ref, bkv_ref, bo_ref = refs[i:i + 5]; i += 5
    wo_head_refs = refs[i:i + num_heads]; i += num_heads
    out_ref = refs[i]                     # (B*T_out, E) f32, batch-major

    # Encoder / decoder stacks are independent (zero initial state); both are
    # unrolled into one basic block so the scheduler interleaves the chains.
    # TODO(synk): no clean equivalent for LSTM hx=encoder_output (invalid in
    # torch too); the decoder uses the default zero initial state.
    enc_hs = _lstm_stack(x_enc_ref[...], enc_layers, T=T_in, B=B)
    dec_hs = _lstm_stack(x_dec_ref[...], dec_layers, T=T_out, B=B)

    enc_bm = _batch_major(enc_hs, B)      # (B*T_in,  E)
    dec_bm = _batch_major(dec_hs, B)      # (B*T_out, E)

    wo_heads = [r[...] for r in wo_head_refs]
    outs = _mha_batch(dec_bm, enc_bm,
                      wq_ref[...], wkv_ref[...], wo_heads,
                      bq_ref[...], bkv_ref[...], bo_ref[...],
                      B=B, Tq=T_out, Tk=T_in, num_heads=num_heads)

    Tq = T_out
    for b in range(B):
        out_ref[b * Tq:(b + 1) * Tq, :] = outs[b].astype(out_ref.dtype)


# -----------------------------------------------------------------------------
# Forward pass wrapper (mirrors Seq2SeqAttention.forward).
# -----------------------------------------------------------------------------
def seq2seq_attention_forward(params, input_seq, output_seq, *, num_heads=4):
    B, T_in, D_in = input_seq.shape
    B2, T_out, dec_in = output_seq.shape
    assert B == B2

    enc = params["encoder"]
    dec = params["decoder"]
    wq, wk, wv, wo, bq, bk, bv, bo = params["attention"]
    E = wq.shape[0]
    enc_hidden = enc[-1][1].shape[0]
    dec_out = dec[-1][1].shape[0]
    # The cross-attention requires hidden_dim == output_dim == embed_dim.
    assert enc_hidden == E and dec_out == E, (
        "attention requires encoder hidden_dim == decoder output_dim == embed_dim")
    assert E % num_heads == 0, "embed_dim must be divisible by num_heads"
    assert len(enc) == len(dec)
    assert D_in == enc[0][0].shape[0] and dec_in == dec[0][0].shape[0]
    hd = E // num_heads

    # --- one-time layout / dtype plumbing (plain XLA, outside the kernel) ---
    x_enc_tm = jnp.swapaxes(input_seq, 0, 1).reshape(T_in * B, D_in)
    x_dec_tm = jnp.swapaxes(output_seq, 0, 1).reshape(T_out * B, dec_in)

    def _prep_lstm(layers):   # pre-cast matmul weights to bf16 (MXU fast path)
        flat = []
        for (w_ih, w_hh, b) in layers:
            flat += [w_ih.astype(jnp.bfloat16), w_hh.astype(jnp.bfloat16), b]
        return flat

    wkv = jnp.concatenate([wk, wv], axis=-1).astype(jnp.bfloat16)     # (E, 2E)
    bkv = jnp.concatenate([bk, bv], axis=-1).reshape(1, 2 * E)
    wo_heads = [wo[h * hd:(h + 1) * hd, :].astype(jnp.bfloat16)       # per-head
                for h in range(num_heads)]                            # row blocks

    flat_args = ([x_enc_tm, x_dec_tm] + _prep_lstm(enc) + _prep_lstm(dec) +
                 [wq.astype(jnp.bfloat16), wkv,
                  bq.reshape(1, E), bkv, bo.reshape(1, E)] + wo_heads)

    kernel = functools.partial(_seq2seq_fused_kernel,
                               num_layers=len(enc), num_heads=num_heads,
                               B=B, T_in=T_in, T_out=T_out)

    out = pl.pallas_call(
        kernel,
        out_shape=jax.ShapeDtypeStruct((B * T_out, E), jnp.float32),
        compiler_params=pltpu.CompilerParams(
            # Everything (weights + activations) is < 200 KB here; keep the
            # VMEM budget explicit so scaling H/T/B is a conscious decision
            # (v7x only has 64 MiB of physical VMEM).
            vmem_limit_bytes=16 * 1024 * 1024),
    )(*flat_args)
    return out.reshape(B, T_out, E)


# -----------------------------------------------------------------------------
# Parameter init (deterministic, synthetic — no checkpoint loading).
# -----------------------------------------------------------------------------
def _init_lstm(key, in_dim, hidden, num_layers):
    layers = []
    scale = 1.0 / (hidden ** 0.5)
    for layer in range(num_layers):
        d = in_dim if layer == 0 else hidden
        key, k1, k2, k3 = jax.random.split(key, 4)
        w_ih = jax.random.uniform(k1, (d, 4 * hidden), jnp.float32, -scale, scale)
        w_hh = jax.random.uniform(k2, (hidden, 4 * hidden), jnp.float32, -scale, scale)
        b = jax.random.uniform(k3, (1, 4 * hidden), jnp.float32, -scale, scale)
        layers.append((w_ih, w_hh, b))
    return key, layers


def _init_mha(key, embed_dim):
    scale = 1.0 / (embed_dim ** 0.5)
    key, *ks = jax.random.split(key, 9)
    wq = jax.random.uniform(ks[0], (embed_dim, embed_dim), jnp.float32, -scale, scale)
    wk = jax.random.uniform(ks[1], (embed_dim, embed_dim), jnp.float32, -scale, scale)
    wv = jax.random.uniform(ks[2], (embed_dim, embed_dim), jnp.float32, -scale, scale)
    wo = jax.random.uniform(ks[3], (embed_dim, embed_dim), jnp.float32, -scale, scale)
    bq = jax.random.uniform(ks[4], (embed_dim,), jnp.float32, -scale, scale)
    bk = jax.random.uniform(ks[5], (embed_dim,), jnp.float32, -scale, scale)
    bv = jax.random.uniform(ks[6], (embed_dim,), jnp.float32, -scale, scale)
    bo = jax.random.uniform(ks[7], (embed_dim,), jnp.float32, -scale, scale)
    return key, (wq, wk, wv, wo, bq, bk, bv, bo)


def init_params(key, input_dim, hidden_dim, output_dim, num_layers):
    assert output_dim == hidden_dim, (
        "attention(decoder_out, encoder_out) requires output_dim == hidden_dim")
    key, encoder = _init_lstm(key, input_dim, hidden_dim, num_layers)
    key, decoder = _init_lstm(key, hidden_dim, output_dim, num_layers)
    key, attention = _init_mha(key, hidden_dim)
    return {"encoder": encoder, "decoder": decoder, "attention": attention}


if __name__ == "__main__":
    input_dim, hidden_dim, output_dim = 16, 32, 32   # output_dim == hidden_dim (required)
    num_layers = 2
    num_heads = 4                                    # head_dim = 8 (reference head_dim=1 is degenerate)
    B, T_in, T_out = 2, 8, 8

    key = jax.random.PRNGKey(0)
    k_in, k_out, k_params = jax.random.split(key, 3)
    input_seq = jax.random.normal(k_in, (B, T_in, input_dim), jnp.float32)
    output_seq = jax.random.normal(k_out, (B, T_out, hidden_dim), jnp.float32)

    params = init_params(k_params, input_dim, hidden_dim, output_dim, num_layers)

    fwd = jax.jit(functools.partial(seq2seq_attention_forward, num_heads=num_heads))
    result = fwd(params, input_seq, output_seq)
    jax.block_until_ready(result)

    assert result.shape == (B, T_out, hidden_dim), result.shape
    assert result.dtype == jnp.float32
    assert bool(jnp.all(jnp.isfinite(result)))
    print("KERNEL_OK")
</pallas_src>

<mosaic_0001>
module attributes {stable_mosaic.version = 11 : i64} {
  func.func @_seq2seq_fused_kernel(%arg0: memref<16x16xf32, #tpu.memory_space<vmem>>, %arg1: memref<16x32xf32, #tpu.memory_space<vmem>>, %arg2: memref<16x128xbf16, #tpu.memory_space<vmem>>, %arg3: memref<32x128xbf16, #tpu.memory_space<vmem>>, %arg4: memref<1x128xf32, #tpu.memory_space<vmem>>, %arg5: memref<32x128xbf16, #tpu.memory_space<vmem>>, %arg6: memref<32x128xbf16, #tpu.memory_space<vmem>>, %arg7: memref<1x128xf32, #tpu.memory_space<vmem>>, %arg8: memref<32x128xbf16, #tpu.memory_space<vmem>>, %arg9: memref<32x128xbf16, #tpu.memory_space<vmem>>, %arg10: memref<1x128xf32, #tpu.memory_space<vmem>>, %arg11: memref<32x128xbf16, #tpu.memory_space<vmem>>, %arg12: memref<32x128xbf16, #tpu.memory_space<vmem>>, %arg13: memref<1x128xf32, #tpu.memory_space<vmem>>, %arg14: memref<32x32xbf16, #tpu.memory_space<vmem>>, %arg15: memref<32x64xbf16, #tpu.memory_space<vmem>>, %arg16: memref<1x32xf32, #tpu.memory_space<vmem>>, %arg17: memref<1x64xf32, #tpu.memory_space<vmem>>, %arg18: memref<1x32xf32, #tpu.memory_space<vmem>>, %arg19: memref<8x32xbf16, #tpu.memory_space<vmem>>, %arg20: memref<8x32xbf16, #tpu.memory_space<vmem>>, %arg21: memref<8x32xbf16, #tpu.memory_space<vmem>>, %arg22: memref<8x32xbf16, #tpu.memory_space<vmem>>, %arg23: memref<16x32xf32, #tpu.memory_space<vmem>>) attributes {dimension_semantics = [], scalar_prefetch = 0 : i64, scratch_operands = 0 : i64, tpu.core_type = #tpu.core_type<tc>} {
    %c0 = arith.constant 0 : index
    %c0_0 = arith.constant 0 : index
    %0 = vector.load %arg0[%c0, %c0_0] : memref<16x16xf32, #tpu.memory_space<vmem>>, vector<16x16xf32>
    %c0_1 = arith.constant 0 : index
    %c0_2 = arith.constant 0 : index
    %1 = vector.load %arg2[%c0_1, %c0_2] : memref<16x128xbf16, #tpu.memory_space<vmem>>, vector<16x128xbf16>
    %c0_3 = arith.constant 0 : index
    %c0_4 = arith.constant 0 : index
    %2 = vector.load %arg3[%c0_3, %c0_4] : memref<32x128xbf16, #tpu.memory_space<vmem>>, vector<32x128xbf16>
    %c0_5 = arith.constant 0 : index
    %c0_6 = arith.constant 0 : index
    %3 = vector.load %arg4[%c0_5, %c0_6] : memref<1x128xf32, #tpu.memory_space<vmem>>, vector<1x128xf32>
    %4 = arith.truncf %0 : vector<16x16xf32> to vector<16x16xbf16>
    %cst = arith.constant dense<0.000000e+00> : vector<16x128xf32>
    %5 = tpu.matmul %4, %1, %cst {dimension_numbers = #tpu.dot_dimension_numbers<[1], [0], [0], [1], [0, 0, 1, 1], [], []>} : vector<16x16xbf16>, vector<16x128xbf16>, vector<16x128xf32> -> vector<16x128xf32>
    %6 = vector.broadcast %3 : vector<1x128xf32> to vector<16x128xf32>
    %7 = arith.addf %5, %6 : vector<16x128xf32>
    %cst_7 = arith.constant 0.000000e+00 : f32
    %8 = vector.broadcast %cst_7 : f32 to vector<2x32xf32>
    %cst_8 = arith.constant 0.000000e+00 : f32
    %9 = vector.broadcast %cst_8 : f32 to vector<2x32xf32>
    %10 = vector.extract_strided_slice %7 {offsets = [0, 0], sizes = [2, 128], strides = [1, 1]} : vector<16x128xf32> to vector<2x128xf32>
    %11 = arith.truncf %8 : vector<2x32xf32> to vector<2x32xbf16>
    %cst_9 = arith.constant dense<0.000000e+00> : vector<2x128xf32>
    %12 = tpu.matmul %11, %2, %cst_9 {dimension_numbers = #tpu.dot_dimension_numbers<[1], [0], [0], [1], [0, 0, 1, 1], [], []>} : vector<2x32xbf16>, vector<32x128xbf16>, vector<2x128xf32> -> vector<2x128xf32>
    %13 = arith.addf %10, %12 : vector<2x128xf32>
    %14 = arith.negf %13 : vector<2x128xf32>
    %15 = math.exp %14 : vector<2x128xf32>
    %cst_10 = arith.constant 1.000000e+00 : f32
    %16 = vector.broadcast %cst_10 : f32 to vector<2x128xf32>
    %17 = arith.addf %16, %15 : vector<2x128xf32>
    %18 = arith.divf %16, %17 : vector<2x128xf32>
    %19 = math.tanh %13 : vector<2x128xf32>
    %20 = vector.extract_strided_slice %18 {offsets = [0, 0], sizes = [2, 32], strides = [1, 1]} : vector<2x128xf32> to vector<2x32xf32>
    %21 = vector.extract_strided_slice %18 {offsets = [0, 32], sizes = [2, 32], strides = [1, 1]} : vector<2x128xf32> to vector<2x32xf32>
    %22 = vector.extract_strided_slice %19 {offsets = [0, 64], sizes = [2, 32], strides = [1, 1]} : vector<2x128xf32> to vector<2x32xf32>
    %23 = vector.extract_strided_slice %18 {offsets = [0, 96], sizes = [2, 32], strides = [1, 1]} : vector<2x128xf32> to vector<2x32xf32>
    %24 = arith.mulf %21, %9 : vector<2x32xf32>
    %25 = arith.mulf %20, %22 : vector<2x32xf32>
    %26 = arith.addf %24, %25 : vector<2x32xf32>
    %27 = math.tanh %26 : vector<2x32xf32>
    %28 = arith.mulf %23, %27 : vector<2x32xf32>
    %29 = vector.extract_strided_slice %7 {offsets = [2, 0], sizes = [2, 128], strides = [1, 1]} : vector<16x128xf32> to vector<2x128xf32>
    %30 = arith.truncf %28 : vector<2x32xf32> to vector<2x32xbf16>
    %cst_11 = arith.constant dense<0.000000e+00> : vector<2x128xf32>
    %31 = tpu.matmul %30, %2, %cst_11 {dimension_numbers = #tpu.dot_dimension_numbers<[1], [0], [0], [1], [0, 0, 1, 1], [], []>} : vector<2x32xbf16>, vector<32x128xbf16>, vector<2x128xf32> -> vector<2x128xf32>
    %32 = arith.addf %29, %31 : vector<2x128xf32>
    %33 = arith.negf %32 : vector<2x128xf32>
    %34 = math.exp %33 : vector<2x128xf32>
    %cst_12 = arith.constant 1.000000e+00 : f32
    %35 = vector.broadcast %cst_12 : f32 to vector<2x128xf32>
    %36 = arith.addf %35, %34 : vector<2x128xf32>
    %37 = arith.divf %35, %36 : vector<2x128xf32>
    %38 = math.tanh %32 : vector<2x128xf32>
    %39 = vector.extract_strided_slice %37 {offsets = [0, 0], sizes = [2, 32], strides = [1, 1]} : vector<2x128xf32> to vector<2x32xf32>
    %40 = vector.extract_strided_slice %37 {offsets = [0, 32], sizes = [2, 32], strides = [1, 1]} : vector<2x128xf32> to vector<2x32xf32>
    %41 = vector.extract_strided_slice %38 {offsets = [0, 64], sizes = [2, 32], strides = [1, 1]} : vector<2x128xf32> to vector<2x32xf32>
    %42 = vector.extract_strided_slice %37 {offsets = [0, 96], sizes = [2, 32], strides = [1, 1]} : vector<2x128xf32> to vector<2x32xf32>
    %43 = arith.mulf %40, %26 : vector<2x32xf32>
    %44 = arith.mulf %39, %41 : vector<2x32xf32>
    %45 = arith.addf %43, %44 : vector<2x32xf32>
    %46 = math.tanh %45 : vector<2x32xf32>
    %47 = arith.mulf %42, %46 : vector<2x32xf32>
    %48 = vector.extract_strided_slice %7 {offsets = [4, 0], sizes = [2, 128], strides = [1, 1]} : vector<16x128xf32> to vector<2x128xf32>
    %49 = arith.truncf %47 : vector<2x32xf32> to vector<2x32xbf16>
    %cst_13 = arith.constant dense<0.000000e+00> : vector<2x128xf32>
    %50 = tpu.matmul %49, %2, %cst_13 {dimension_numbers = #tpu.dot_dimension_numbers<[1], [0], [0], [1], [0, 0, 1, 1], [], []>} : vector<2x32xbf16>, vector<32x128xbf16>, vector<2x128xf32> -> vector<2x128xf32>
    %51 = arith.addf %48, %50 : vector<2x128xf32>
    %52 = arith.negf %51 : vector<2x128xf32>
    %53 = math.exp %52 : vector<2x128xf32>
    %cst_14 = arith.constant 1.000000e+00 : f32
    %54 = vector.broadcast %cst_14 : f32 to vector<2x128xf32>
    %55 = arith.addf %54, %53 : vector<2x128xf32>
    %56 = arith.divf %54, %55 : vector<2x128xf32>
    %57 = math.tanh %51 : vector<2x128xf32>
    %58 = vector.extract_strided_slice %56 {offsets = [0, 0], sizes = [2, 32], strides = [1, 1]} : vector<2x128xf32> to vector<2x32xf32>
    %59 = vector.extract_strided_slice %56 {offsets = [0, 32], sizes = [2, 32], strides = [1, 1]} : vector<2x128xf32> to vector<2x32xf32>
    %60 = vector.extract_strided_slice %57 {offsets = [0, 64], sizes = [2, 32], strides = [1, 1]} : vector<2x128xf32> to vector<2x32xf32>
    %61 = vector.extract_strided_slice %56 {offsets = [0, 96], sizes = [2, 32], strides = [1, 1]} : vector<2x128xf32> to vector<2x32xf32>
    %62 = arith.mulf %59, %45 : vector<2x32xf32>
    %63 = arith.mulf %58, %60 : vector<2x32xf32>
    %64 = arith.addf %62, %63 : vector<2x32xf32>
    %65 = math.tanh %64 : vector<2x32xf32>
    %66 = arith.mulf %61, %65 : vector<2x32xf32>
    %67 = vector.extract_strided_slice %7 {offsets = [6, 0], sizes = [2, 128], strides = [1, 1]} : vector<16x128xf32> to vector<2x128xf32>
    %68 = arith.truncf %66 : vector<2x32xf32> to vector<2x32xbf16>
    %cst_15 = arith.constant dense<0.000000e+00> : vector<2x128xf32>
    %69 = tpu.matmul %68, %2, %cst_15 {dimension_numbers = #tpu.dot_dimension_numbers<[1], [0], [0], [1], [0, 0, 1, 1], [], []>} : vector<2x32xbf16>, vector<32x128xbf16>, vector<2x128xf32> -> vector<2x128xf32>
    %70 = arith.addf %67, %69 : vector<2x128xf32>
    %71 = arith.negf %70 : vector<2x128xf32>
    %72 = math.exp %71 : vector<2x128xf32>
    %cst_16 = arith.constant 1.000000e+00 : f32
    %73 = vector.broadcast %cst_16 : f32 to vector<2x128xf32>
    %74 = arith.addf %73, %72 : vector<2x128xf32>
    %75 = arith.divf %73, %74 : vector<2x128xf32>
    %76 = math.tanh %70 : vector<2x128xf32>
    %77 = vector.extract_strided_slice %75 {offsets = [0, 0], sizes = [2, 32], strides = [1, 1]} : vector<2x128xf32> to vector<2x32xf32>
    %78 = vector.extract_strided_slice %75 {offsets = [0, 32], sizes = [2, 32], strides = [1, 1]} : vector<2x128xf32> to vector<2x32xf32>
    %79 = vector.extract_strided_slice %76 {offsets = [0, 64], sizes = [2, 32], strides = [1, 1]} : vector<2x128xf32> to vector<2x32xf32>
    %80 = vector.extract_strided_slice %75 {offsets = [0, 96], sizes = [2, 32], strides = [1, 1]} : vector<2x128xf32> to vector<2x32xf32>
    %81 = arith.mulf %78, %64 : vector<2x32xf32>
    %82 = arith.mulf %77, %79 : vector<2x32xf32>
    %83 = arith.addf %81, %82 : vector<2x32xf32>
    %84 = math.tanh %83 : vector<2x32xf32>
    %85 = arith.mulf %80, %84 : vector<2x32xf32>
    %86 = vector.extract_strided_slice %7 {offsets = [8, 0], sizes = [2, 128], strides = [1, 1]} : vector<16x128xf32> to vector<2x128xf32>
    %87 = arith.truncf %85 : vector<2x32xf32> to vector<2x32xbf16>
    %cst_17 = arith.constant dense<0.000000e+00> : vector<2x128xf32>
    %88 = tpu.matmul %87, %2, %cst_17 {dimension_numbers = #tpu.dot_dimension_numbers<[1], [0], [0], [1], [0, 0, 1, 1], [], []>} : vector<2x32xbf16>, vector<32x128xbf16>, vector<2x128xf32> -> vector<2x128xf32>
    %89 = arith.addf %86, %88 : vector<2x128xf32>
    %90 = arith.negf %89 : vector<2x128xf32>
    %91 = math.exp %90 : vector<2x128xf32>
    %cst_18 = arith.constant 1.000000e+00 : f32
    %92 = vector.broadcast %cst_18 : f32 to vector<2x128xf32>
    %93 = arith.addf %92, %91 : vector<2x128xf32>
    %94 = arith.divf %92, %93 : vector<2x128xf32>
    %95 = math.tanh %89 : vector<2x128xf32>
    %96 = vector.extract_strided_slice %94 {offsets = [0, 0], sizes = [2, 32], strides = [1, 1]} : vector<2x128xf32> to vector<2x32xf32>
    %97 = vector.extract_strided_slice %94 {offsets = [0, 32], sizes = [2, 32], strides = [1, 1]} : vector<2x128xf32> to vector<2x32xf32>
    %98 = vector.extract_strided_slice %95 {offsets = [0, 64], sizes = [2, 32], strides = [1, 1]} : vector<2x128xf32> to vector<2x32xf32>
    %99 = vector.extract_strided_slice %94 {offsets = [0, 96], sizes = [2, 32], strides = [1, 1]} : vector<2x128xf32> to vector<2x32xf32>
    %100 = arith.mulf %97, %83 : vector<2x32xf32>
    %101 = arith.mulf %96, %98 : vector<2x32xf32>
    %102 = arith.addf %100, %101 : vector<2x32xf32>
    %103 = math.tanh %102 : vector<2x32xf32>
    %104 = arith.mulf %99, %103 : vector<2x32xf32>
    %105 = vector.extract_strided_slice %7 {offsets = [10, 0], sizes = [2, 128], strides = [1, 1]} : vector<16x128xf32> to vector<2x128xf32>
    %106 = arith.truncf %104 : vector<2x32xf32> to vector<2x32xbf16>
    %cst_19 = arith.constant dense<0.000000e+00> : vector<2x128xf32>
    %107 = tpu.matmul %106, %2, %cst_19 {dimension_numbers = #tpu.dot_dimension_numbers<[1], [0], [0], [1], [0, 0, 1, 1], [], []>} : vector<2x32xbf16>, vector<32x128xbf16>, vector<2x128xf32> -> vector<2x128xf32>
    %108 = arith.addf %105, %107 : vector<2x128xf32>
    %109 = arith.negf %108 : vector<2x128xf32>
    %110 = math.exp %109 : vector<2x128xf32>
    %cst_20 = arith.constant 1.000000e+00 : f32
    %111 = vector.broadcast %cst_20 : f32 to vector<2x128xf32>
    %112 = arith.addf %111, %110 : vector<2x128xf32>
    %113 = arith.divf %111, %112 : vector<2x128xf32>
    %114 = math.tanh %108 : vector<2x128xf32>
    %115 = vector.extract_strided_slice %113 {offsets = [0, 0], sizes = [2, 32], strides = [1, 1]} : vector<2x128xf32> to vector<2x32xf32>
    %116 = vector.extract_strided_slice %113 {offsets = [0, 32], sizes = [2, 32], strides = [1, 1]} : vector<2x128xf32> to vector<2x32xf32>
    %117 = vector.extract_strided_slice %114 {offsets = [0, 64], sizes = [2, 32], strides = [1, 1]} : vector<2x128xf32> to vector<2x32xf32>
    %118 = vector.extract_strided_slice %113 {offsets = [0, 96], sizes = [2, 32], strides = [1, 1]} : vector<2x128xf32> to vector<2x32xf32>
    %119 = arith.mulf %116, %102 : vector<2x32xf32>
    %120 = arith.mulf %115, %117 : vector<2x32xf32>
    %121 = arith.addf %119, %120 : vector<2x32xf32>
    %122 = math.tanh %121 : vector<2x32xf32>
    %123 = arith.mulf %118, %122 : vector<2x32xf32>
    %124 = vector.extract_strided_slice %7 {offsets = [12, 0], sizes = [2, 128], strides = [1, 1]} : vector<16x128xf32> to vector<2x128xf32>
    %125 = arith.truncf %123 : vector<2x32xf32> to vector<2x32xbf16>
    %cst_21 = arith.constant dense<0.000000e+00> : vector<2x128xf32>
    %126 = tpu.matmul %125, %2, %cst_21 {dimension_numbers = #tpu.dot_dimension_numbers<[1], [0], [0], [1], [0, 0, 1, 1], [], []>} : vector<2x32xbf16>, vector<32x128xbf16>, vector<2x128xf32> -> vector<2x128xf32>
    %127 = arith.addf %124, %126 : vector<2x128xf32>
    %128 = arith.negf %127 : vector<2x128xf32>
    %129 = math.exp %128 : vector<2x128xf32>
    %cst_22 = arith.constant 1.000000e+00 : f32
    %130 = vector.broadcast %cst_22 : f32 to vector<2x128xf32>
    %131 = arith.addf %130, %129 : vector<2x128xf32>
    %132 = arith.divf %130, %131 : vector<2x128xf32>
    %133 = math.tanh %127 : vector<2x128xf32>
    %134 = vector.extract_strided_slice %132 {offsets = [0, 0], sizes = [2, 32], strides = [1, 1]} : vector<2x128xf32> to vector<2x32xf32>
    %135 = vector.extract_strided_slice %132 {offsets = [0, 32], sizes = [2, 32], strides = [1, 1]} : vector<2x128xf32> to vector<2x32xf32>
    %136 = vector.extract_strided_slice %133 {offsets = [0, 64], sizes = [2, 32], strides = [1, 1]} : vector<2x128xf32> to vector<2x32xf32>
    %137 = vector.extract_strided_slice %132 {offsets = [0, 96], sizes = [2, 32], strides = [1, 1]} : vector<2x128xf32> to vector<2x32xf32>
    %138 = arith.mulf %135, %121 : vector<2x32xf32>
    %139 = arith.mulf %134, %136 : vector<2x32xf32>
    %140 = arith.addf %138, %139 : vector<2x32xf32>
    %141 = math.tanh %140 : vector<2x32xf32>
    %142 = arith.mulf %137, %141 : vector<2x32xf32>
    %143 = vector.extract_strided_slice %7 {offsets = [14, 0], sizes = [2, 128], strides = [1, 1]} : vector<16x128xf32> to vector<2x128xf32>
    %144 = arith.truncf %142 : vector<2x32xf32> to vector<2x32xbf16>
    %cst_23 = arith.constant dense<0.000000e+00> : vector<2x128xf32>
    %145 = tpu.matmul %144, %2, %cst_23 {dimension_numbers = #tpu.dot_dimension_numbers<[1], [0], [0], [1], [0, 0, 1, 1], [], []>} : vector<2x32xbf16>, vector<32x128xbf16>, vector<2x128xf32> -> vector<2x128xf32>
    %146 = arith.addf %143, %145 : vector<2x128xf32>
    %147 = arith.negf %146 : vector<2x128xf32>
    %148 = math.exp %147 : vector<2x128xf32>
    %cst_24 = arith.constant 1.000000e+00 : f32
    %149 = vector.broadcast %cst_24 : f32 to vector<2x128xf32>
    %150 = arith.addf %149, %148 : vector<2x128xf32>
    %151 = arith.divf %149, %150 : vector<2x128xf32>
    %152 = math.tanh %146 : vector<2x128xf32>
    %153 = vector.extract_strided_slice %151 {offsets = [0, 0], sizes = [2, 32], strides = [1, 1]} : vector<2x128xf32> to vector<2x32xf32>
    %154 = vector.extract_strided_slice %151 {offsets = [0, 32], sizes = [2, 32], strides = [1, 1]} : vector<2x128xf32> to vector<2x32xf32>
    %155 = vector.extract_strided_slice %152 {offsets = [0, 64], sizes = [2, 32], strides = [1, 1]} : vector<2x128xf32> to vector<2x32xf32>
    %156 = vector.extract_strided_slice %151 {offsets = [0, 96], sizes = [2, 32], strides = [1, 1]} : vector<2x128xf32> to vector<2x32xf32>
    %157 = arith.mulf %154, %140 : vector<2x32xf32>
    %158 = arith.mulf %153, %155 : vector<2x32xf32>
    %159 = arith.addf %157, %158 : vector<2x32xf32>
    %160 = math.tanh %159 : vector<2x32xf32>
    %161 = arith.mulf %156, %160 : vector<2x32xf32>
    %162 = tpu.concatenate %28, %47, %66, %85, %104, %123, %142, %161 in 0 : vector<2x32xf32>, vector<2x32xf32>, vector<2x32xf32>, vector<2x32xf32>, vector<2x32xf32>, vector<2x32xf32>, vector<2x32xf32>, vector<2x32xf32> -> vector<16x32xf32>
    %c0_25 = arith.constant 0 : index
    %c0_26 = arith.constant 0 : index
    %163 = vector.load %arg5[%c0_25, %c0_26] : memref<32x128xbf16, #tpu.memory_space<vmem>>, vector<32x128xbf16>
    %c0_27 = arith.constant 0 : index
    %c0_28 = arith.constant 0 : index
    %164 = vector.load %arg6[%c0_27, %c0_28] : memref<32x128xbf16, #tpu.memory_space<vmem>>, vector<32x128xbf16>
    %c0_29 = arith.constant 0 : index
    %c0_30 = arith.constant 0 : index
    %165 = vector.load %arg7[%c0_29, %c0_30] : memref<1x128xf32, #tpu.memory_space<vmem>>, vector<1x128xf32>
    %166 = arith.truncf %162 : vector<16x32xf32> to vector<16x32xbf16>
    %cst_31 = arith.constant dense<0.000000e+00> : vector<16x128xf32>
    %167 = tpu.matmul %166, %163, %cst_31 {dimension_numbers = #tpu.dot_dimension_numbers<[1], [0], [0], [1], [0, 0, 1, 1], [], []>} : vector<16x32xbf16>, vector<32x128xbf16>, vector<16x128xf32> -> vector<16x128xf32>
    %168 = vector.broadcast %165 : vector<1x128xf32> to vector<16x128xf32>
    %169 = arith.addf %167, %168 : vector<16x128xf32>
    %cst_32 = arith.constant 0.000000e+00 : f32
    %170 = vector.broadcast %cst_32 : f32 to vector<2x32xf32>
    %cst_33 = arith.constant 0.000000e+00 : f32
    %171 = vector.broadcast %cst_33 : f32 to vector<2x32xf32>
    %172 = vector.extract_strided_slice %169 {offsets = [0, 0], sizes = [2, 128], strides = [1, 1]} : vector<16x128xf32> to vector<2x128xf32>
    %173 = arith.truncf %170 : vector<2x32xf32> to vector<2x32xbf16>
    %cst_34 = arith.constant dense<0.000000e+00> : vector<2x128xf32>
    %174 = tpu.matmul %173, %164, %cst_34 {dimension_numbers = #tpu.dot_dimension_numbers<[1], [0], [0], [1], [0, 0, 1, 1], [], []>} : vector<2x32xbf16>, vector<32x128xbf16>, vector<2x128xf32> -> vector<2x128xf32>
    %175 = arith.addf %172, %174 : vector<2x128xf32>
    %176 = arith.negf %175 : vector<2x128xf32>
    %177 = math.exp %176 : vector<2x128xf32>
    %cst_35 = arith.constant 1.000000e+00 : f32
    %178 = vector.broadcast %cst_35 : f32 to vector<2x128xf32>
    %179 = arith.addf %178, %177 : vector<2x128xf32>
    %180 = arith.divf %178, %179 : vector<2x128xf32>
    %181 = math.tanh %175 : vector<2x128xf32>
    %182 = vector.extract_strided_slice %180 {offsets = [0, 0], sizes = [2, 32], strides = [1, 1]} : vector<2x128xf32> to vector<2x32xf32>
    %183 = vector.extract_strided_slice %180 {offsets = [0, 32], sizes = [2, 32], strides = [1, 1]} : vector<2x128xf32> to vector<2x32xf32>
    %184 = vector.extract_strided_slice %181 {offsets = [0, 64], sizes = [2, 32], strides = [1, 1]} : vector<2x128xf32> to vector<2x32xf32>
    %185 = vector.extract_strided_slice %180 {offsets = [0, 96], sizes = [2, 32], strides = [1, 1]} : vector<2x128xf32> to vector<2x32xf32>
    %186 = arith.mulf %183, %171 : vector<2x32xf32>
    %187 = arith.mulf %182, %184 : vector<2x32xf32>
    %188 = arith.addf %186, %187 : vector<2x32xf32>
    %189 = math.tanh %188 : vector<2x32xf32>
    %190 = arith.mulf %185, %189 : vector<2x32xf32>
    %191 = vector.extract_strided_slice %169 {offsets = [2, 0], sizes = [2, 128], strides = [1, 1]} : vector<16x128xf32> to vector<2x128xf32>
    %192 = arith.truncf %190 : vector<2x32xf32> to vector<2x32xbf16>
    %cst_36 = arith.constant dense<0.000000e+00> : vector<2x128xf32>
    %193 = tpu.matmul %192, %164, %cst_36 {dimension_numbers = #tpu.dot_dimension_numbers<[1], [0], [0], [1], [0, 0, 1, 1], [], []>} : vector<2x32xbf16>, vector<32x128xbf16>, vector<2x128xf32> -> vector<2x128xf32>
    %194 = arith.addf %191, %193 : vector<2x128xf32>
    %195 = arith.negf %194 : vector<2x128xf32>
    %196 = math.exp %195 : vector<2x128xf32>
    %cst_37 = arith.constant 1.000000e+00 : f32
    %197 = vector.broadcast %cst_37 : f32 to vector<2x128xf32>
    %198 = arith.addf %197, %196 : vector<2x128xf32>
    %199 = arith.divf %197, %198 : vector<2x128xf32>
    %200 = math.tanh %194 : vector<2x128xf32>
    %201 = vector.extract_strided_slice %199 {offsets = [0, 0], sizes = [2, 32], strides = [1, 1]} : vector<2x128xf32> to vector<2x32xf32>
    %202 = vector.extract_strided_slice %199 {offsets = [0, 32], sizes = [2, 32], strides = [1, 1]} : vector<2x128xf32> to vector<2x32xf32>
    %203 = vector.extract_strided_slice %200 {offsets = [0, 64], sizes = [2, 32], strides = [1, 1]} : vector<2x128xf32> to vector<2x32xf32>
    %204 = vector.extract_strided_slice %199 {offsets = [0, 96], sizes = [2, 32], strides = [1, 1]} : vector<2x128xf32> to vector<2x32xf32>
    %205 = arith.mulf %202, %188 : vector<2x32xf32>
    %206 = arith.mulf %201, %203 : vector<2x32xf32>
    %207 = arith.addf %205, %206 : vector<2x32xf32>
    %208 = math.tanh %207 : vector<2x32xf32>
    %209 = arith.mulf %204, %208 : vector<2x32xf32>
    %210 = vector.extract_strided_slice %169 {offsets = [4, 0], sizes = [2, 128], strides = [1, 1]} : vector<16x128xf32> to vector<2x128xf32>
    %211 = arith.truncf %209 : vector<2x32xf32> to vector<2x32xbf16>
    %cst_38 = arith.constant dense<0.000000e+00> : vector<2x128xf32>
    %212 = tpu.matmul %211, %164, %cst_38 {dimension_numbers = #tpu.dot_dimension_numbers<[1], [0], [0], [1], [0, 0, 1, 1], [], []>} : vector<2x32xbf16>, vector<32x128xbf16>, vector<2x128xf32> -> vector<2x128xf32>
    %213 = arith.addf %210, %212 : vector<2x128xf32>
    %214 = arith.negf %213 : vector<2x128xf32>
    %215 = math.exp %214 : vector<2x128xf32>
    %cst_39 = arith.constant 1.000000e+00 : f32
    %216 = vector.broadcast %cst_39 : f32 to vector<2x128xf32>
    %217 = arith.addf %216, %215 : vector<2x128xf32>
    %218 = arith.divf %216, %217 : vector<2x128xf32>
    %219 = math.tanh %213 : vector<2x128xf32>
    %220 = vector.extract_strided_slice %218 {offsets = [0, 0], sizes = [2, 32], strides = [1, 1]} : vector<2x128xf32> to vector<2x32xf32>
    %221 = vector.extract_strided_slice %218 {offsets = [0, 32], sizes = [2, 32], strides = [1, 1]} : vector<2x128xf32> to vector<2x32xf32>
    %222 = vector.extract_strided_slice %219 {offsets = [0, 64], sizes = [2, 32], strides = [1, 1]} : vector<2x128xf32> to vector<2x32xf32>
    %223 = vector.extract_strided_slice %218 {offsets = [0, 96], sizes = [2, 32], strides = [1, 1]} : vector<2x128xf32> to vector<2x32xf32>
    %224 = arith.mulf %221, %207 : vector<2x32xf32>
    %225 = arith.mulf %220, %222 : vector<2x32xf32>
    %226 = arith.addf %224, %225 : vector<2x32xf32>
    %227 = math.tanh %226 : vector<2x32xf32>
    %228 = arith.mulf %223, %227 : vector<2x32xf32>
    %229 = vector.extract_strided_slice %169 {offsets = [6, 0], sizes = [2, 128], strides = [1, 1]} : vector<16x128xf32> to vector<2x128xf32>
    %230 = arith.truncf %228 : vector<2x32xf32> to vector<2x32xbf16>
    %cst_40 = arith.constant dense<0.000000e+00> : vector<2x128xf32>
    %231 = tpu.matmul %230, %164, %cst_40 {dimension_numbers = #tpu.dot_dimension_numbers<[1], [0], [0], [1], [0, 0, 1, 1], [], []>} : vector<2x32xbf16>, vector<32x128xbf16>, vector<2x128xf32> -> vector<2x128xf32>
    %232 = arith.addf %229, %231 : vector<2x128xf32>
    %233 = arith.negf %232 : vector<2x128xf32>
    %234 = math.exp %233 : vector<2x128xf32>
    %cst_41 = arith.constant 1.000000e+00 : f32
    %235 = vector.broadcast %cst_41 : f32 to vector<2x128xf32>
    %236 = arith.addf %235, %234 : vector<2x128xf32>
    %237 = arith.divf %235, %236 : vector<2x128xf32>
    %238 = math.tanh %232 : vector<2x128xf32>
    %239 = vector.extract_strided_slice %237 {offsets = [0, 0], sizes = [2, 32], strides = [1, 1]} : vector<2x128xf32> to vector<2x32xf32>
    %240 = vector.extract_strided_slice %237 {offsets = [0, 32], sizes = [2, 32], strides = [1, 1]} : vector<2x128xf32> to vector<2x32xf32>
    %241 = vector.extract_strided_slice %238 {offsets = [0, 64], sizes = [2, 32], strides = [1, 1]} : vector<2x128xf32> to vector<2x32xf32>
    %242 = vector.extract_strided_slice %237 {offsets = [0, 96], sizes = [2, 32], strides = [1, 1]} : vector<2x128xf32> to vector<2x32xf32>
    %243 = arith.mulf %240, %226 : vector<2x32xf32>
    %244 = arith.mulf %239, %241 : vector<2x32xf32>
    %245 = arith.addf %243, %244 : vector<2x32xf32>
    %246 = math.tanh %245 : vector<2x32xf32>
    %247 = arith.mulf %242, %246 : vector<2x32xf32>
    %248 = vector.extract_strided_slice %169 {offsets = [8, 0], sizes = [2, 128], strides = [1, 1]} : vector<16x128xf32> to vector<2x128xf32>
    %249 = arith.truncf %247 : vector<2x32xf32> to vector<2x32xbf16>
    %cst_42 = arith.constant dense<0.000000e+00> : vector<2x128xf32>
    %250 = tpu.matmul %249, %164, %cst_42 {dimension_numbers = #tpu.dot_dimension_numbers<[1], [0], [0], [1], [0, 0, 1, 1], [], []>} : vector<2x32xbf16>, vector<32x128xbf16>, vector<2x128xf32> -> vector<2x128xf32>
    %251 = arith.addf %248, %250 : vector<2x128xf32>
    %252 = arith.negf %251 : vector<2x128xf32>
    %253 = math.exp %252 : vector<2x128xf32>
    %cst_43 = arith.constant 1.000000e+00 : f32
    %254 = vector.broadcast %cst_43 : f32 to vector<2x128xf32>
    %255 = arith.addf %254, %253 : vector<2x128xf32>
    %256 = arith.divf %254, %255 : vector<2x128xf32>
    %257 = math.tanh %251 : vector<2x128xf32>
    %258 = vector.extract_strided_slice %256 {offsets = [0, 0], sizes = [2, 32], strides = [1, 1]} : vector<2x128xf32> to vector<2x32xf32>
    %259 = vector.extract_strided_slice %256 {offsets = [0, 32], sizes = [2, 32], strides = [1, 1]} : vector<2x128xf32> to vector<2x32xf32>
    %260 = vector.extract_strided_slice %257 {offsets = [0, 64], sizes = [2, 32], strides = [1, 1]} : vector<2x128xf32> to vector<2x32xf32>
    %261 = vector.extract_strided_slice %256 {offsets = [0, 96], sizes = [2, 32], strides = [1, 1]} : vector<2x128xf32> to vector<2x32xf32>
    %262 = arith.mulf %259, %245 : vector<2x32xf32>
    %263 = arith.mulf %258, %260 : vector<2x32xf32>
    %264 = arith.addf %262, %263 : vector<2x32xf32>
    %265 = math.tanh %264 : vector<2x32xf32>
    %266 = arith.mulf %261, %265 : vector<2x32xf32>
    %267 = vector.extract_strided_slice %169 {offsets = [10, 0], sizes = [2, 128], strides = [1, 1]} : vector<16x128xf32> to vector<2x128xf32>
    %268 = arith.truncf %266 : vector<2x32xf32> to vector<2x32xbf16>
    %cst_44 = arith.constant dense<0.000000e+00> : vector<2x128xf32>
    %269 = tpu.matmul %268, %164, %cst_44 {dimension_numbers = #tpu.dot_dimension_numbers<[1], [0], [0], [1], [0, 0, 1, 1], [], []>} : vector<2x32xbf16>, vector<32x128xbf16>, vector<2x128xf32> -> vector<2x128xf32>
    %270 = arith.addf %267, %269 : vector<2x128xf32>
    %271 = arith.negf %270 : vector<2x128xf32>
    %272 = math.exp %271 : vector<2x128xf32>
    %cst_45 = arith.constant 1.000000e+00 : f32
    %273 = vector.broadcast %cst_45 : f32 to vector<2x128xf32>
    %274 = arith.addf %273, %272 : vector<2x128xf32>
    %275 = arith.divf %273, %274 : vector<2x128xf32>
    %276 = math.tanh %270 : vector<2x128xf32>
    %277 = vector.extract_strided_slice %275 {offsets = [0, 0], sizes = [2, 32], strides = [1, 1]} : vector<2x128xf32> to vector<2x32xf32>
    %278 = vector.extract_strided_slice %275 {offsets = [0, 32], sizes = [2, 32], strides = [1, 1]} : vector<2x128xf32> to vector<2x32xf32>
    %279 = vector.extract_strided_slice %276 {offsets = [0, 64], sizes = [2, 32], strides = [1, 1]} : vector<2x128xf32> to vector<2x32xf32>
    %280 = vector.extract_strided_slice %275 {offsets = [0, 96], sizes = [2, 32], strides = [1, 1]} : vector<2x128xf32> to vector<2x32xf32>
    %281 = arith.mulf %278, %264 : vector<2x32xf32>
    %282 = arith.mulf %277, %279 : vector<2x32xf32>
    %283 = arith.addf %281, %282 : vector<2x32xf32>
    %284 = math.tanh %283 : vector<2x32xf32>
    %285 = arith.mulf %280, %284 : vector<2x32xf32>
    %286 = vector.extract_strided_slice %169 {offsets = [12, 0], sizes = [2, 128], strides = [1, 1]} : vector<16x128xf32> to vector<2x128xf32>
    %287 = arith.truncf %285 : vector<2x32xf32> to vector<2x32xbf16>
    %cst_46 = arith.constant dense<0.000000e+00> : vector<2x128xf32>
    %288 = tpu.matmul %287, %164, %cst_46 {dimension_numbers = #tpu.dot_dimension_numbers<[1], [0], [0], [1], [0, 0, 1, 1], [], []>} : vector<2x32xbf16>, vector<32x128xbf16>, vector<2x128xf32> -> vector<2x128xf32>
    %289 = arith.addf %286, %288 : vector<2x128xf32>
    %290 = arith.negf %289 : vector<2x128xf32>
    %291 = math.exp %290 : vector<2x128xf32>
    %cst_47 = arith.constant 1.000000e+00 : f32
    %292 = vector.broadcast %cst_47 : f32 to vector<2x128xf32>
    %293 = arith.addf %292, %291 : vector<2x128xf32>
    %294 = arith.divf %292, %293 : vector<2x128xf32>
    %295 = math.tanh %289 : vector<2x128xf32>
    %296 = vector.extract_strided_slice %294 {offsets = [0, 0], sizes = [2, 32], strides = [1, 1]} : vector<2x128xf32> to vector<2x32xf32>
    %297 = vector.extract_strided_slice %294 {offsets = [0, 32], sizes = [2, 32], strides = [1, 1]} : vector<2x128xf32> to vector<2x32xf32>
    %298 = vector.extract_strided_slice %295 {offsets = [0, 64], sizes = [2, 32], strides = [1, 1]} : vector<2x128xf32> to vector<2x32xf32>
    %299 = vector.extract_strided_slice %294 {offsets = [0, 96], sizes = [2, 32], strides = [1, 1]} : vector<2x128xf32> to vector<2x32xf32>
    %300 = arith.mulf %297, %283 : vector<2x32xf32>
    %301 = arith.mulf %296, %298 : vector<2x32xf32>
    %302 = arith.addf %300, %301 : vector<2x32xf32>
    %303 = math.tanh %302 : vector<2x32xf32>
    %304 = arith.mulf %299, %303 : vector<2x32xf32>
    %305 = vector.extract_strided_slice %169 {offsets = [14, 0], sizes = [2, 128], strides = [1, 1]} : vector<16x128xf32> to vector<2x128xf32>
    %306 = arith.truncf %304 : vector<2x32xf32> to vector<2x32xbf16>
    %cst_48 = arith.constant dense<0.000000e+00> : vector<2x128xf32>
    %307 = tpu.matmul %306, %164, %cst_48 {dimension_numbers = #tpu.dot_dimension_numbers<[1], [0], [0], [1], [0, 0, 1, 1], [], []>} : vector<2x32xbf16>, vector<32x128xbf16>, vector<2x128xf32> -> vector<2x128xf32>
    %308 = arith.addf %305, %307 : vector<2x128xf32>
    %309 = arith.negf %308 : vector<2x128xf32>
    %310 = math.exp %309 : vector<2x128xf32>
    %cst_49 = arith.constant 1.000000e+00 : f32
    %311 = vector.broadcast %cst_49 : f32 to vector<2x128xf32>
    %312 = arith.addf %311, %310 : vector<2x128xf32>
    %313 = arith.divf %311, %312 : vector<2x128xf32>
    %314 = math.tanh %308 : vector<2x128xf32>
    %315 = vector.extract_strided_slice %313 {offsets = [0, 0], sizes = [2, 32], strides = [1, 1]} : vector<2x128xf32> to vector<2x32xf32>
    %316 = vector.extract_strided_slice %313 {offsets = [0, 32], sizes = [2, 32], strides = [1, 1]} : vector<2x128xf32> to vector<2x32xf32>
    %317 = vector.extract_strided_slice %314 {offsets = [0, 64], sizes = [2, 32], strides = [1, 1]} : vector<2x128xf32> to vector<2x32xf32>
    %318 = vector.extract_strided_slice %313 {offsets = [0, 96], sizes = [2, 32], strides = [1, 1]} : vector<2x128xf32> to vector<2x32xf32>
    %319 = arith.mulf %316, %302 : vector<2x32xf32>
    %320 = arith.mulf %315, %317 : vector<2x32xf32>
    %321 = arith.addf %319, %320 : vector<2x32xf32>
    %322 = math.tanh %321 : vector<2x32xf32>
    %323 = arith.mulf %318, %322 : vector<2x32xf32>
    %c0_50 = arith.constant 0 : index
    %c0_51 = arith.constant 0 : index
    %324 = vector.load %arg1[%c0_50, %c0_51] : memref<16x32xf32, #tpu.memory_space<vmem>>, vector<16x32xf32>
    %c0_52 = arith.constant 0 : index
    %c0_53 = arith.constant 0 : index
    %325 = vector.load %arg8[%c0_52, %c0_53] : memref<32x128xbf16, #tpu.memory_space<vmem>>, vector<32x128xbf16>
    %c0_54 = arith.constant 0 : index
    %c0_55 = arith.constant 0 : index
    %326 = vector.load %arg9[%c0_54, %c0_55] : memref<32x128xbf16, #tpu.memory_space<vmem>>, vector<32x128xbf16>
    %c0_56 = arith.constant 0 : index
    %c0_57 = arith.constant 0 : index
    %327 = vector.load %arg10[%c0_56, %c0_57] : memref<1x128xf32, #tpu.memory_space<vmem>>, vector<1x128xf32>
    %328 = arith.truncf %324 : vector<16x32xf32> to vector<16x32xbf16>
    %cst_58 = arith.constant dense<0.000000e+00> : vector<16x128xf32>
    %329 = tpu.matmul %328, %325, %cst_58 {dimension_numbers = #tpu.dot_dimension_numbers<[1], [0], [0], [1], [0, 0, 1, 1], [], []>} : vector<16x32xbf16>, vector<32x128xbf16>, vector<16x128xf32> -> vector<16x128xf32>
    %330 = vector.broadcast %327 : vector<1x128xf32> to vector<16x128xf32>
    %331 = arith.addf %329, %330 : vector<16x128xf32>
    %cst_59 = arith.constant 0.000000e+00 : f32
    %332 = vector.broadcast %cst_59 : f32 to vector<2x32xf32>
    %cst_60 = arith.constant 0.000000e+00 : f32
    %333 = vector.broadcast %cst_60 : f32 to vector<2x32xf32>
    %334 = vector.extract_strided_slice %331 {offsets = [0, 0], sizes = [2, 128], strides = [1, 1]} : vector<16x128xf32> to vector<2x128xf32>
    %335 = arith.truncf %332 : vector<2x32xf32> to vector<2x32xbf16>
    %cst_61 = arith.constant dense<0.000000e+00> : vector<2x128xf32>
    %336 = tpu.matmul %335, %326, %cst_61 {dimension_numbers = #tpu.dot_dimension_numbers<[1], [0], [0], [1], [0, 0, 1, 1], [], []>} : vector<2x32xbf16>, vector<32x128xbf16>, vector<2x128xf32> -> vector<2x128xf32>
    %337 = arith.addf %334, %336 : vector<2x128xf32>
    %338 = arith.negf %337 : vector<2x128xf32>
    %339 = math.exp %338 : vector<2x128xf32>
    %cst_62 = arith.constant 1.000000e+00 : f32
    %340 = vector.broadcast %cst_62 : f32 to vector<2x128xf32>
    %341 = arith.addf %340, %339 : vector<2x128xf32>
    %342 = arith.divf %340, %341 : vector<2x128xf32>
    %343 = math.tanh %337 : vector<2x128xf32>
    %344 = vector.extract_strided_slice %342 {offsets = [0, 0], sizes = [2, 32], strides = [1, 1]} : vector<2x128xf32> to vector<2x32xf32>
    %345 = vector.extract_strided_slice %342 {offsets = [0, 32], sizes = [2, 32], strides = [1, 1]} : vector<2x128xf32> to vector<2x32xf32>
    %346 = vector.extract_strided_slice %343 {offsets = [0, 64], sizes = [2, 32], strides = [1, 1]} : vector<2x128xf32> to vector<2x32xf32>
    %347 = vector.extract_strided_slice %342 {offsets = [0, 96], sizes = [2, 32], strides = [1, 1]} : vector<2x128xf32> to vector<2x32xf32>
    %348 = arith.mulf %345, %333 : vector<2x32xf32>
    %349 = arith.mulf %344, %346 : vector<2x32xf32>
    %350 = arith.addf %348, %349 : vector<2x32xf32>
    %351 = math.tanh %350 : vector<2x32xf32>
    %352 = arith.mulf %347, %351 : vector<2x32xf32>
    %353 = vector.extract_strided_slice %331 {offsets = [2, 0], sizes = [2, 128], strides = [1, 1]} : vector<16x128xf32> to vector<2x128xf32>
    %354 = arith.truncf %352 : vector<2x32xf32> to vector<2x32xbf16>
    %cst_63 = arith.constant dense<0.000000e+00> : vector<2x128xf32>
    %355 = tpu.matmul %354, %326, %cst_63 {dimension_numbers = #tpu.dot_dimension_numbers<[1], [0], [0], [1], [0, 0, 1, 1], [], []>} : vector<2x32xbf16>, vector<32x128xbf16>, vector<2x128xf32> -> vector<2x128xf32>
    %356 = arith.addf %353, %355 : vector<2x128xf32>
    %357 = arith.negf %356 : vector<2x128xf32>
    %358 = math.exp %357 : vector<2x128xf32>
    %cst_64 = arith.constant 1.000000e+00 : f32
    %359 = vector.broadcast %cst_64 : f32 to vector<2x128xf32>
    %360 = arith.addf %359, %358 : vector<2x128xf32>
    %361 = arith.divf %359, %360 : vector<2x128xf32>
    %362 = math.tanh %356 : vector<2x128xf32>
    %363 = vector.extract_strided_slice %361 {offsets = [0, 0], sizes = [2, 32], strides = [1, 1]} : vector<2x128xf32> to vector<2x32xf32>
    %364 = vector.extract_strided_slice %361 {offsets = [0, 32], sizes = [2, 32], strides = [1, 1]} : vector<2x128xf32> to vector<2x32xf32>
    %365 = vector.extract_strided_slice %362 {offsets = [0, 64], sizes = [2, 32], strides = [1, 1]} : vector<2x128xf32> to vector<2x32xf32>
    %366 = vector.extract_strided_slice %361 {offsets = [0, 96], sizes = [2, 32], strides = [1, 1]} : vector<2x128xf32> to vector<2x32xf32>
    %367 = arith.mulf %364, %350 : vector<2x32xf32>
    %368 = arith.mulf %363, %365 : vector<2x32xf32>
    %369 = arith.addf %367, %368 : vector<2x32xf32>
    %370 = math.tanh %369 : vector<2x32xf32>
    %371 = arith.mulf %366, %370 : vector<2x32xf32>
    %372 = vector.extract_strided_slice %331 {offsets = [4, 0], sizes = [2, 128], strides = [1, 1]} : vector<16x128xf32> to vector<2x128xf32>
    %373 = arith.truncf %371 : vector<2x32xf32> to vector<2x32xbf16>
    %cst_65 = arith.constant dense<0.000000e+00> : vector<2x128xf32>
    %374 = tpu.matmul %373, %326, %cst_65 {dimension_numbers = #tpu.dot_dimension_numbers<[1], [0], [0], [1], [0, 0, 1, 1], [], []>} : vector<2x32xbf16>, vector<32x128xbf16>, vector<2x128xf32> -> vector<2x128xf32>
    %375 = arith.addf %372, %374 : vector<2x128xf32>
    %376 = arith.negf %375 : vector<2x128xf32>
    %377 = math.exp %376 : vector<2x128xf32>
    %cst_66 = arith.constant 1.000000e+00 : f32
    %378 = vector.broadcast %cst_66 : f32 to vector<2x128xf32>
    %379 = arith.addf %378, %377 : vector<2x128xf32>
    %380 = arith.divf %378, %379 : vector<2x128xf32>
    %381 = math.tanh %375 : vector<2x128xf32>
    %382 = vector.extract_strided_slice %380 {offsets = [0, 0], sizes = [2, 32], strides = [1, 1]} : vector<2x128xf32> to vector<2x32xf32>
    %383 = vector.extract_strided_slice %380 {offsets = [0, 32], sizes = [2, 32], strides = [1, 1]} : vector<2x128xf32> to vector<2x32xf32>
    %384 = vector.extract_strided_slice %381 {offsets = [0, 64], sizes = [2, 32], strides = [1, 1]} : vector<2x128xf32> to vector<2x32xf32>
    %385 = vector.extract_strided_slice %380 {offsets = [0, 96], sizes = [2, 32], strides = [1, 1]} : vector<2x128xf32> to vector<2x32xf32>
    %386 = arith.mulf %383, %369 : vector<2x32xf32>
    %387 = arith.mulf %382, %384 : vector<2x32xf32>
    %388 = arith.addf %386, %387 : vector<2x32xf32>
    %389 = math.tanh %388 : vector<2x32xf32>
    %390 = arith.mulf %385, %389 : vector<2x32xf32>
    %391 = vector.extract_strided_slice %331 {offsets = [6, 0], sizes = [2, 128], strides = [1, 1]} : vector<16x128xf32> to vector<2x128xf32>
    %392 = arith.truncf %390 : vector<2x32xf32> to vector<2x32xbf16>
    %cst_67 = arith.constant dense<0.000000e+00> : vector<2x128xf32>
    %393 = tpu.matmul %392, %326, %cst_67 {dimension_numbers = #tpu.dot_dimension_numbers<[1], [0], [0], [1], [0, 0, 1, 1], [], []>} : vector<2x32xbf16>, vector<32x128xbf16>, vector<2x128xf32> -> vector<2x128xf32>
    %394 = arith.addf %391, %393 : vector<2x128xf32>
    %395 = arith.negf %394 : vector<2x128xf32>
    %396 = math.exp %395 : vector<2x128xf32>
    %cst_68 = arith.constant 1.000000e+00 : f32
    %397 = vector.broadcast %cst_68 : f32 to vector<2x128xf32>
    %398 = arith.addf %397, %396 : vector<2x128xf32>
    %399 = arith.divf %397, %398 : vector<2x128xf32>
    %400 = math.tanh %394 : vector<2x128xf32>
    %401 = vector.extract_strided_slice %399 {offsets = [0, 0], sizes = [2, 32], strides = [1, 1]} : vector<2x128xf32> to vector<2x32xf32>
    %402 = vector.extract_strided_slice %399 {offsets = [0, 32], sizes = [2, 32], strides = [1, 1]} : vector<2x128xf32> to vector<2x32xf32>
    %403 = vector.extract_strided_slice %400 {offsets = [0, 64], sizes = [2, 32], strides = [1, 1]} : vector<2x128xf32> to vector<2x32xf32>
    %404 = vector.extract_strided_slice %399 {offsets = [0, 96], sizes = [2, 32], strides = [1, 1]} : vector<2x128xf32> to vector<2x32xf32>
    %405 = arith.mulf %402, %388 : vector<2x32xf32>
    %406 = arith.mulf %401, %403 : vector<2x32xf32>
    %407 = arith.addf %405, %406 : vector<2x32xf32>
    %408 = math.tanh %407 : vector<2x32xf32>
    %409 = arith.mulf %404, %408 : vector<2x32xf32>
    %410 = vector.extract_strided_slice %331 {offsets = [8, 0], sizes = [2, 128], strides = [1, 1]} : vector<16x128xf32> to vector<2x128xf32>
    %411 = arith.truncf %409 : vector<2x32xf32> to vector<2x32xbf16>
    %cst_69 = arith.constant dense<0.000000e+00> : vector<2x128xf32>
    %412 = tpu.matmul %411, %326, %cst_69 {dimension_numbers = #tpu.dot_dimension_numbers<[1], [0], [0], [1], [0, 0, 1, 1], [], []>} : vector<2x32xbf16>, vector<32x128xbf16>, vector<2x128xf32> -> vector<2x128xf32>
    %413 = arith.addf %410, %412 : vector<2x128xf32>
    %414 = arith.negf %413 : vector<2x128xf32>
    %415 = math.exp %414 : vector<2x128xf32>
    %cst_70 = arith.constant 1.000000e+00 : f32
    %416 = vector.broadcast %cst_70 : f32 to vector<2x128xf32>
    %417 = arith.addf %416, %415 : vector<2x128xf32>
    %418 = arith.divf %416, %417 : vector<2x128xf32>
    %419 = math.tanh %413 : vector<2x128xf32>
    %420 = vector.extract_strided_slice %418 {offsets = [0, 0], sizes = [2, 32], strides = [1, 1]} : vector<2x128xf32> to vector<2x32xf32>
    %421 = vector.extract_strided_slice %418 {offsets = [0, 32], sizes = [2, 32], strides = [1, 1]} : vector<2x128xf32> to vector<2x32xf32>
    %422 = vector.extract_strided_slice %419 {offsets = [0, 64], sizes = [2, 32], strides = [1, 1]} : vector<2x128xf32> to vector<2x32xf32>
    %423 = vector.extract_strided_slice %418 {offsets = [0, 96], sizes = [2, 32], strides = [1, 1]} : vector<2x128xf32> to vector<2x32xf32>
    %424 = arith.mulf %421, %407 : vector<2x32xf32>
    %425 = arith.mulf %420, %422 : vector<2x32xf32>
    %426 = arith.addf %424, %425 : vector<2x32xf32>
    %427 = math.tanh %426 : vector<2x32xf32>
    %428 = arith.mulf %423, %427 : vector<2x32xf32>
    %429 = vector.extract_strided_slice %331 {offsets = [10, 0], sizes = [2, 128], strides = [1, 1]} : vector<16x128xf32> to vector<2x128xf32>
    %430 = arith.truncf %428 : vector<2x32xf32> to vector<2x32xbf16>
    %cst_71 = arith.constant dense<0.000000e+00> : vector<2x128xf32>
    %431 = tpu.matmul %430, %326, %cst_71 {dimension_numbers = #tpu.dot_dimension_numbers<[1], [0], [0], [1], [0, 0, 1, 1], [], []>} : vector<2x32xbf16>, vector<32x128xbf16>, vector<2x128xf32> -> vector<2x128xf32>
    %432 = arith.addf %429, %431 : vector<2x128xf32>
    %433 = arith.negf %432 : vector<2x128xf32>
    %434 = math.exp %433 : vector<2x128xf32>
    %cst_72 = arith.constant 1.000000e+00 : f32
    %435 = vector.broadcast %cst_72 : f32 to vector<2x128xf32>
    %436 = arith.addf %435, %434 : vector<2x128xf32>
    %437 = arith.divf %435, %436 : vector<2x128xf32>
    %438 = math.tanh %432 : vector<2x128xf32>
    %439 = vector.extract_strided_slice %437 {offsets = [0, 0], sizes = [2, 32], strides = [1, 1]} : vector<2x128xf32> to vector<2x32xf32>
    %440 = vector.extract_strided_slice %437 {offsets = [0, 32], sizes = [2, 32], strides = [1, 1]} : vector<2x128xf32> to vector<2x32xf32>
    %441 = vector.extract_strided_slice %438 {offsets = [0, 64], sizes = [2, 32], strides = [1, 1]} : vector<2x128xf32> to vector<2x32xf32>
    %442 = vector.extract_strided_slice %437 {offsets = [0, 96], sizes = [2, 32], strides = [1, 1]} : vector<2x128xf32> to vector<2x32xf32>
    %443 = arith.mulf %440, %426 : vector<2x32xf32>
    %444 = arith.mulf %439, %441 : vector<2x32xf32>
    %445 = arith.addf %443, %444 : vector<2x32xf32>
    %446 = math.tanh %445 : vector<2x32xf32>
    %447 = arith.mulf %442, %446 : vector<2x32xf32>
    %448 = vector.extract_strided_slice %331 {offsets = [12, 0], sizes = [2, 128], strides = [1, 1]} : vector<16x128xf32> to vector<2x128xf32>
    %449 = arith.truncf %447 : vector<2x32xf32> to vector<2x32xbf16>
    %cst_73 = arith.constant dense<0.000000e+00> : vector<2x128xf32>
    %450 = tpu.matmul %449, %326, %cst_73 {dimension_numbers = #tpu.dot_dimension_numbers<[1], [0], [0], [1], [0, 0, 1, 1], [], []>} : vector<2x32xbf16>, vector<32x128xbf16>, vector<2x128xf32> -> vector<2x128xf32>
    %451 = arith.addf %448, %450 : vector<2x128xf32>
    %452 = arith.negf %451 : vector<2x128xf32>
    %453 = math.exp %452 : vector<2x128xf32>
    %cst_74 = arith.constant 1.000000e+00 : f32
    %454 = vector.broadcast %cst_74 : f32 to vector<2x128xf32>
    %455 = arith.addf %454, %453 : vector<2x128xf32>
    %456 = arith.divf %454, %455 : vector<2x128xf32>
    %457 = math.tanh %451 : vector<2x128xf32>
    %458 = vector.extract_strided_slice %456 {offsets = [0, 0], sizes = [2, 32], strides = [1, 1]} : vector<2x128xf32> to vector<2x32xf32>
    %459 = vector.extract_strided_slice %456 {offsets = [0, 32], sizes = [2, 32], strides = [1, 1]} : vector<2x128xf32> to vector<2x32xf32>
    %460 = vector.extract_strided_slice %457 {offsets = [0, 64], sizes = [2, 32], strides = [1, 1]} : vector<2x128xf32> to vector<2x32xf32>
    %461 = vector.extract_strided_slice %456 {offsets = [0, 96], sizes = [2, 32], strides = [1, 1]} : vector<2x128xf32> to vector<2x32xf32>
    %462 = arith.mulf %459, %445 : vector<2x32xf32>
    %463 = arith.mulf %458, %460 : vector<2x32xf32>
    %464 = arith.addf %462, %463 : vector<2x32xf32>
    %465 = math.tanh %464 : vector<2x32xf32>
    %466 = arith.mulf %461, %465 : vector<2x32xf32>
    %467 = vector.extract_strided_slice %331 {offsets = [14, 0], sizes = [2, 128], strides = [1, 1]} : vector<16x128xf32> to vector<2x128xf32>
    %468 = arith.truncf %466 : vector<2x32xf32> to vector<2x32xbf16>
    %cst_75 = arith.constant dense<0.000000e+00> : vector<2x128xf32>
    %469 = tpu.matmul %468, %326, %cst_75 {dimension_numbers = #tpu.dot_dimension_numbers<[1], [0], [0], [1], [0, 0, 1, 1], [], []>} : vector<2x32xbf16>, vector<32x128xbf16>, vector<2x128xf32> -> vector<2x128xf32>
    %470 = arith.addf %467, %469 : vector<2x128xf32>
    %471 = arith.negf %470 : vector<2x128xf32>
    %472 = math.exp %471 : vector<2x128xf32>
    %cst_76 = arith.constant 1.000000e+00 : f32
    %473 = vector.broadcast %cst_76 : f32 to vector<2x128xf32>
    %474 = arith.addf %473, %472 : vector<2x128xf32>
    %475 = arith.divf %473, %474 : vector<2x128xf32>
    %476 = math.tanh %470 : vector<2x128xf32>
    %477 = vector.extract_strided_slice %475 {offsets = [0, 0], sizes = [2, 32], strides = [1, 1]} : vector<2x128xf32> to vector<2x32xf32>
    %478 = vector.extract_strided_slice %475 {offsets = [0, 32], sizes = [2, 32], strides = [1, 1]} : vector<2x128xf32> to vector<2x32xf32>
    %479 = vector.extract_strided_slice %476 {offsets = [0, 64], sizes = [2, 32], strides = [1, 1]} : vector<2x128xf32> to vector<2x32xf32>
    %480 = vector.extract_strided_slice %475 {offsets = [0, 96], sizes = [2, 32], strides = [1, 1]} : vector<2x128xf32> to vector<2x32xf32>
    %481 = arith.mulf %478, %464 : vector<2x32xf32>
    %482 = arith.mulf %477, %479 : vector<2x32xf32>
    %483 = arith.addf %481, %482 : vector<2x32xf32>
    %484 = math.tanh %483 : vector<2x32xf32>
    %485 = arith.mulf %480, %484 : vector<2x32xf32>
    %486 = tpu.concatenate %352, %371, %390, %409, %428, %447, %466, %485 in 0 : vector<2x32xf32>, vector<2x32xf32>, vector<2x32xf32>, vector<2x32xf32>, vector<2x32xf32>, vector<2x32xf32>, vector<2x32xf32>, vector<2x32xf32> -> vector<16x32xf32>
    %c0_77 = arith.constant 0 : index
    %c0_78 = arith.constant 0 : index
    %487 = vector.load %arg11[%c0_77, %c0_78] : memref<32x128xbf16, #tpu.memory_space<vmem>>, vector<32x128xbf16>
    %c0_79 = arith.constant 0 : index
    %c0_80 = arith.constant 0 : index
    %488 = vector.load %arg12[%c0_79, %c0_80] : memref<32x128xbf16, #tpu.memory_space<vmem>>, vector<32x128xbf16>
    %c0_81 = arith.constant 0 : index
    %c0_82 = arith.constant 0 : index
    %489 = vector.load %arg13[%c0_81, %c0_82] : memref<1x128xf32, #tpu.memory_space<vmem>>, vector<1x128xf32>
    %490 = arith.truncf %486 : vector<16x32xf32> to vector<16x32xbf16>
    %cst_83 = arith.constant dense<0.000000e+00> : vector<16x128xf32>
    %491 = tpu.matmul %490, %487, %cst_83 {dimension_numbers = #tpu.dot_dimension_numbers<[1], [0], [0], [1], [0, 0, 1, 1], [], []>} : vector<16x32xbf16>, vector<32x128xbf16>, vector<16x128xf32> -> vector<16x128xf32>
    %492 = vector.broadcast %489 : vector<1x128xf32> to vector<16x128xf32>
    %493 = arith.addf %491, %492 : vector<16x128xf32>
    %cst_84 = arith.constant 0.000000e+00 : f32
    %494 = vector.broadcast %cst_84 : f32 to vector<2x32xf32>
    %cst_85 = arith.constant 0.000000e+00 : f32
    %495 = vector.broadcast %cst_85 : f32 to vector<2x32xf32>
    %496 = vector.extract_strided_slice %493 {offsets = [0, 0], sizes = [2, 128], strides = [1, 1]} : vector<16x128xf32> to vector<2x128xf32>
    %497 = arith.truncf %494 : vector<2x32xf32> to vector<2x32xbf16>
    %cst_86 = arith.constant dense<0.000000e+00> : vector<2x128xf32>
    %498 = tpu.matmul %497, %488, %cst_86 {dimension_numbers = #tpu.dot_dimension_numbers<[1], [0], [0], [1], [0, 0, 1, 1], [], []>} : vector<2x32xbf16>, vector<32x128xbf16>, vector<2x128xf32> -> vector<2x128xf32>
    %499 = arith.addf %496, %498 : vector<2x128xf32>
    %500 = arith.negf %499 : vector<2x128xf32>
    %501 = math.exp %500 : vector<2x128xf32>
    %cst_87 = arith.constant 1.000000e+00 : f32
    %502 = vector.broadcast %cst_87 : f32 to vector<2x128xf32>
    %503 = arith.addf %502, %501 : vector<2x128xf32>
    %504 = arith.divf %502, %503 : vector<2x128xf32>
    %505 = math.tanh %499 : vector<2x128xf32>
    %506 = vector.extract_strided_slice %504 {offsets = [0, 0], sizes = [2, 32], strides = [1, 1]} : vector<2x128xf32> to vector<2x32xf32>
    %507 = vector.extract_strided_slice %504 {offsets = [0, 32], sizes = [2, 32], strides = [1, 1]} : vector<2x128xf32> to vector<2x32xf32>
    %508 = vector.extract_strided_slice %505 {offsets = [0, 64], sizes = [2, 32], strides = [1, 1]} : vector<2x128xf32> to vector<2x32xf32>
    %509 = vector.extract_strided_slice %504 {offsets = [0, 96], sizes = [2, 32], strides = [1, 1]} : vector<2x128xf32> to vector<2x32xf32>
    %510 = arith.mulf %507, %495 : vector<2x32xf32>
    %511 = arith.mulf %506, %508 : vector<2x32xf32>
    %512 = arith.addf %510, %511 : vector<2x32xf32>
    %513 = math.tanh %512 : vector<2x32xf32>
    %514 = arith.mulf %509, %513 : vector<2x32xf32>
    %515 = vector.extract_strided_slice %493 {offsets = [2, 0], sizes = [2, 128], strides = [1, 1]} : vector<16x128xf32> to vector<2x128xf32>
    %516 = arith.truncf %514 : vector<2x32xf32> to vector<2x32xbf16>
    %cst_88 = arith.constant dense<0.000000e+00> : vector<2x128xf32>
    %517 = tpu.matmul %516, %488, %cst_88 {dimension_numbers = #tpu.dot_dimension_numbers<[1], [0], [0], [1], [0, 0, 1, 1], [], []>} : vector<2x32xbf16>, vector<32x128xbf16>, vector<2x128xf32> -> vector<2x128xf32>
    %518 = arith.addf %515, %517 : vector<2x128xf32>
    %519 = arith.negf %518 : vector<2x128xf32>
    %520 = math.exp %519 : vector<2x128xf32>
    %cst_89 = arith.constant 1.000000e+00 : f32
    %521 = vector.broadcast %cst_89 : f32 to vector<2x128xf32>
    %522 = arith.addf %521, %520 : vector<2x128xf32>
    %523 = arith.divf %521, %522 : vector<2x128xf32>
    %524 = math.tanh %518 : vector<2x128xf32>
    %525 = vector.extract_strided_slice %523 {offsets = [0, 0], sizes = [2, 32], strides = [1, 1]} : vector<2x128xf32> to vector<2x32xf32>
    %526 = vector.extract_strided_slice %523 {offsets = [0, 32], sizes = [2, 32], strides = [1, 1]} : vector<2x128xf32> to vector<2x32xf32>
    %527 = vector.extract_strided_slice %524 {offsets = [0, 64], sizes = [2, 32], strides = [1, 1]} : vector<2x128xf32> to vector<2x32xf32>
    %528 = vector.extract_strided_slice %523 {offsets = [0, 96], sizes = [2, 32], strides = [1, 1]} : vector<2x128xf32> to vector<2x32xf32>
    %529 = arith.mulf %526, %512 : vector<2x32xf32>
    %530 = arith.mulf %525, %527 : vector<2x32xf32>
    %531 = arith.addf %529, %530 : vector<2x32xf32>
    %532 = math.tanh %531 : vector<2x32xf32>
    %533 = arith.mulf %528, %532 : vector<2x32xf32>
    %534 = vector.extract_strided_slice %493 {offsets = [4, 0], sizes = [2, 128], strides = [1, 1]} : vector<16x128xf32> to vector<2x128xf32>
    %535 = arith.truncf %533 : vector<2x32xf32> to vector<2x32xbf16>
    %cst_90 = arith.constant dense<0.000000e+00> : vector<2x128xf32>
    %536 = tpu.matmul %535, %488, %cst_90 {dimension_numbers = #tpu.dot_dimension_numbers<[1], [0], [0], [1], [0, 0, 1, 1], [], []>} : vector<2x32xbf16>, vector<32x128xbf16>, vector<2x128xf32> -> vector<2x128xf32>
    %537 = arith.addf %534, %536 : vector<2x128xf32>
    %538 = arith.negf %537 : vector<2x128xf32>
    %539 = math.exp %538 : vector<2x128xf32>
    %cst_91 = arith.constant 1.000000e+00 : f32
    %540 = vector.broadcast %cst_91 : f32 to vector<2x128xf32>
    %541 = arith.addf %540, %539 : vector<2x128xf32>
    %542 = arith.divf %540, %541 : vector<2x128xf32>
    %543 = math.tanh %537 : vector<2x128xf32>
    %544 = vector.extract_strided_slice %542 {offsets = [0, 0], sizes = [2, 32], strides = [1, 1]} : vector<2x128xf32> to vector<2x32xf32>
    %545 = vector.extract_strided_slice %542 {offsets = [0, 32], sizes = [2, 32], strides = [1, 1]} : vector<2x128xf32> to vector<2x32xf32>
    %546 = vector.extract_strided_slice %543 {offsets = [0, 64], sizes = [2, 32], strides = [1, 1]} : vector<2x128xf32> to vector<2x32xf32>
    %547 = vector.extract_strided_slice %542 {offsets = [0, 96], sizes = [2, 32], strides = [1, 1]} : vector<2x128xf32> to vector<2x32xf32>
    %548 = arith.mulf %545, %531 : vector<2x32xf32>
    %549 = arith.mulf %544, %546 : vector<2x32xf32>
    %550 = arith.addf %548, %549 : vector<2x32xf32>
    %551 = math.tanh %550 : vector<2x32xf32>
    %552 = arith.mulf %547, %551 : vector<2x32xf32>
    %553 = vector.extract_strided_slice %493 {offsets = [6, 0], sizes = [2, 128], strides = [1, 1]} : vector<16x128xf32> to vector<2x128xf32>
    %554 = arith.truncf %552 : vector<2x32xf32> to vector<2x32xbf16>
    %cst_92 = arith.constant dense<0.000000e+00> : vector<2x128xf32>
    %555 = tpu.matmul %554, %488, %cst_92 {dimension_numbers = #tpu.dot_dimension_numbers<[1], [0], [0], [1], [0, 0, 1, 1], [], []>} : vector<2x32xbf16>, vector<32x128xbf16>, vector<2x128xf32> -> vector<2x128xf32>
    %556 = arith.addf %553, %555 : vector<2x128xf32>
    %557 = arith.negf %556 : vector<2x128xf32>
    %558 = math.exp %557 : vector<2x128xf32>
    %cst_93 = arith.constant 1.000000e+00 : f32
    %559 = vector.broadcast %cst_93 : f32 to vector<2x128xf32>
    %560 = arith.addf %559, %558 : vector<2x128xf32>
    %561 = arith.divf %559, %560 : vector<2x128xf32>
    %562 = math.tanh %556 : vector<2x128xf32>
    %563 = vector.extract_strided_slice %561 {offsets = [0, 0], sizes = [2, 32], strides = [1, 1]} : vector<2x128xf32> to vector<2x32xf32>
    %564 = vector.extract_strided_slice %561 {offsets = [0, 32], sizes = [2, 32], strides = [1, 1]} : vector<2x128xf32> to vector<2x32xf32>
    %565 = vector.extract_strided_slice %562 {offsets = [0, 64], sizes = [2, 32], strides = [1, 1]} : vector<2x128xf32> to vector<2x32xf32>
    %566 = vector.extract_strided_slice %561 {offsets = [0, 96], sizes = [2, 32], strides = [1, 1]} : vector<2x128xf32> to vector<2x32xf32>
    %567 = arith.mulf %564, %550 : vector<2x32xf32>
    %568 = arith.mulf %563, %565 : vector<2x32xf32>
    %569 = arith.addf %567, %568 : vector<2x32xf32>
    %570 = math.tanh %569 : vector<2x32xf32>
    %571 = arith.mulf %566, %570 : vector<2x32xf32>
    %572 = vector.extract_strided_slice %493 {offsets = [8, 0], sizes = [2, 128], strides = [1, 1]} : vector<16x128xf32> to vector<2x128xf32>
    %573 = arith.truncf %571 : vector<2x32xf32> to vector<2x32xbf16>
    %cst_94 = arith.constant dense<0.000000e+00> : vector<2x128xf32>
    %574 = tpu.matmul %573, %488, %cst_94 {dimension_numbers = #tpu.dot_dimension_numbers<[1], [0], [0], [1], [0, 0, 1, 1], [], []>} : vector<2x32xbf16>, vector<32x128xbf16>, vector<2x128xf32> -> vector<2x128xf32>
    %575 = arith.addf %572, %574 : vector<2x128xf32>
    %576 = arith.negf %575 : vector<2x128xf32>
    %577 = math.exp %576 : vector<2x128xf32>
    %cst_95 = arith.constant 1.000000e+00 : f32
    %578 = vector.broadcast %cst_95 : f32 to vector<2x128xf32>
    %579 = arith.addf %578, %577 : vector<2x128xf32>
    %580 = arith.divf %578, %579 : vector<2x128xf32>
    %581 = math.tanh %575 : vector<2x128xf32>
    %582 = vector.extract_strided_slice %580 {offsets = [0, 0], sizes = [2, 32], strides = [1, 1]} : vector<2x128xf32> to vector<2x32xf32>
    %583 = vector.extract_strided_slice %580 {offsets = [0, 32], sizes = [2, 32], strides = [1, 1]} : vector<2x128xf32> to vector<2x32xf32>
    %584 = vector.extract_strided_slice %581 {offsets = [0, 64], sizes = [2, 32], strides = [1, 1]} : vector<2x128xf32> to vector<2x32xf32>
    %585 = vector.extract_strided_slice %580 {offsets = [0, 96], sizes = [2, 32], strides = [1, 1]} : vector<2x128xf32> to vector<2x32xf32>
    %586 = arith.mulf %583, %569 : vector<2x32xf32>
    %587 = arith.mulf %582, %584 : vector<2x32xf32>
    %588 = arith.addf %586, %587 : vector<2x32xf32>
    %589 = math.tanh %588 : vector<2x32xf32>
    %590 = arith.mulf %585, %589 : vector<2x32xf32>
    %591 = vector.extract_strided_slice %493 {offsets = [10, 0], sizes = [2, 128], strides = [1, 1]} : vector<16x128xf32> to vector<2x128xf32>
    %592 = arith.truncf %590 : vector<2x32xf32> to vector<2x32xbf16>
    %cst_96 = arith.constant dense<0.000000e+00> : vector<2x128xf32>
    %593 = tpu.matmul %592, %488, %cst_96 {dimension_numbers = #tpu.dot_dimension_numbers<[1], [0], [0], [1], [0, 0, 1, 1], [], []>} : vector<2x32xbf16>, vector<32x128xbf16>, vector<2x128xf32> -> vector<2x128xf32>
    %594 = arith.addf %591, %593 : vector<2x128xf32>
    %595 = arith.negf %594 : vector<2x128xf32>
    %596 = math.exp %595 : vector<2x128xf32>
    %cst_97 = arith.constant 1.000000e+00 : f32
    %597 = vector.broadcast %cst_97 : f32 to vector<2x128xf32>
    %598 = arith.addf %597, %596 : vector<2x128xf32>
    %599 = arith.divf %597, %598 : vector<2x128xf32>
    %600 = math.tanh %594 : vector<2x128xf32>
    %601 = vector.extract_strided_slice %599 {offsets = [0, 0], sizes = [2, 32], strides = [1, 1]} : vector<2x128xf32> to vector<2x32xf32>
    %602 = vector.extract_strided_slice %599 {offsets = [0, 32], sizes = [2, 32], strides = [1, 1]} : vector<2x128xf32> to vector<2x32xf32>
    %603 = vector.extract_strided_slice %600 {offsets = [0, 64], sizes = [2, 32], strides = [1, 1]} : vector<2x128xf32> to vector<2x32xf32>
    %604 = vector.extract_strided_slice %599 {offsets = [0, 96], sizes = [2, 32], strides = [1, 1]} : vector<2x128xf32> to vector<2x32xf32>
    %605 = arith.mulf %602, %588 : vector<2x32xf32>
    %606 = arith.mulf %601, %603 : vector<2x32xf32>
    %607 = arith.addf %605, %606 : vector<2x32xf32>
    %608 = math.tanh %607 : vector<2x32xf32>
    %609 = arith.mulf %604, %608 : vector<2x32xf32>
    %610 = vector.extract_strided_slice %493 {offsets = [12, 0], sizes = [2, 128], strides = [1, 1]} : vector<16x128xf32> to vector<2x128xf32>
    %611 = arith.truncf %609 : vector<2x32xf32> to vector<2x32xbf16>
    %cst_98 = arith.constant dense<0.000000e+00> : vector<2x128xf32>
    %612 = tpu.matmul %611, %488, %cst_98 {dimension_numbers = #tpu.dot_dimension_numbers<[1], [0], [0], [1], [0, 0, 1, 1], [], []>} : vector<2x32xbf16>, vector<32x128xbf16>, vector<2x128xf32> -> vector<2x128xf32>
    %613 = arith.addf %610, %612 : vector<2x128xf32>
    %614 = arith.negf %613 : vector<2x128xf32>
    %615 = math.exp %614 : vector<2x128xf32>
    %cst_99 = arith.constant 1.000000e+00 : f32
    %616 = vector.broadcast %cst_99 : f32 to vector<2x128xf32>
    %617 = arith.addf %616, %615 : vector<2x128xf32>
    %618 = arith.divf %616, %617 : vector<2x128xf32>
    %619 = math.tanh %613 : vector<2x128xf32>
    %620 = vector.extract_strided_slice %618 {offsets = [0, 0], sizes = [2, 32], strides = [1, 1]} : vector<2x128xf32> to vector<2x32xf32>
    %621 = vector.extract_strided_slice %618 {offsets = [0, 32], sizes = [2, 32], strides = [1, 1]} : vector<2x128xf32> to vector<2x32xf32>
    %622 = vector.extract_strided_slice %619 {offsets = [0, 64], sizes = [2, 32], strides = [1, 1]} : vector<2x128xf32> to vector<2x32xf32>
    %623 = vector.extract_strided_slice %618 {offsets = [0, 96], sizes = [2, 32], strides = [1, 1]} : vector<2x128xf32> to vector<2x32xf32>
    %624 = arith.mulf %621, %607 : vector<2x32xf32>
    %625 = arith.mulf %620, %622 : vector<2x32xf32>
    %626 = arith.addf %624, %625 : vector<2x32xf32>
    %627 = math.tanh %626 : vector<2x32xf32>
    %628 = arith.mulf %623, %627 : vector<2x32xf32>
    %629 = vector.extract_strided_slice %493 {offsets = [14, 0], sizes = [2, 128], strides = [1, 1]} : vector<16x128xf32> to vector<2x128xf32>
    %630 = arith.truncf %628 : vector<2x32xf32> to vector<2x32xbf16>
    %cst_100 = arith.constant dense<0.000000e+00> : vector<2x128xf32>
    %631 = tpu.matmul %630, %488, %cst_100 {dimension_numbers = #tpu.dot_dimension_numbers<[1], [0], [0], [1], [0, 0, 1, 1], [], []>} : vector<2x32xbf16>, vector<32x128xbf16>, vector<2x128xf32> -> vector<2x128xf32>
    %632 = arith.addf %629, %631 : vector<2x128xf32>
    %633 = arith.negf %632 : vector<2x128xf32>
    %634 = math.exp %633 : vector<2x128xf32>
    %cst_101 = arith.constant 1.000000e+00 : f32
    %635 = vector.broadcast %cst_101 : f32 to vector<2x128xf32>
    %636 = arith.addf %635, %634 : vector<2x128xf32>
    %637 = arith.divf %635, %636 : vector<2x128xf32>
    %638 = math.tanh %632 : vector<2x128xf32>
    %639 = vector.extract_strided_slice %637 {offsets = [0, 0], sizes = [2, 32], strides = [1, 1]} : vector<2x128xf32> to vector<2x32xf32>
    %640 = vector.extract_strided_slice %637 {offsets = [0, 32], sizes = [2, 32], strides = [1, 1]} : vector<2x128xf32> to vector<2x32xf32>
    %641 = vector.extract_strided_slice %638 {offsets = [0, 64], sizes = [2, 32], strides = [1, 1]} : vector<2x128xf32> to vector<2x32xf32>
    %642 = vector.extract_strided_slice %637 {offsets = [0, 96], sizes = [2, 32], strides = [1, 1]} : vector<2x128xf32> to vector<2x32xf32>
    %643 = arith.mulf %640, %626 : vector<2x32xf32>
    %644 = arith.mulf %639, %641 : vector<2x32xf32>
    %645 = arith.addf %643, %644 : vector<2x32xf32>
    %646 = math.tanh %645 : vector<2x32xf32>
    %647 = arith.mulf %642, %646 : vector<2x32xf32>
    %648 = vector.extract_strided_slice %190 {offsets = [0, 0], sizes = [1, 32], strides = [1, 1]} : vector<2x32xf32> to vector<1x32xf32>
    %649 = vector.extract_strided_slice %209 {offsets = [0, 0], sizes = [1, 32], strides = [1, 1]} : vector<2x32xf32> to vector<1x32xf32>
    %650 = vector.extract_strided_slice %228 {offsets = [0, 0], sizes = [1, 32], strides = [1, 1]} : vector<2x32xf32> to vector<1x32xf32>
    %651 = vector.extract_strided_slice %247 {offsets = [0, 0], sizes = [1, 32], strides = [1, 1]} : vector<2x32xf32> to vector<1x32xf32>
    %652 = vector.extract_strided_slice %266 {offsets = [0, 0], sizes = [1, 32], strides = [1, 1]} : vector<2x32xf32> to vector<1x32xf32>
    %653 = vector.extract_strided_slice %285 {offsets = [0, 0], sizes = [1, 32], strides = [1, 1]} : vector<2x32xf32> to vector<1x32xf32>
    %654 = vector.extract_strided_slice %304 {offsets = [0, 0], sizes = [1, 32], strides = [1, 1]} : vector<2x32xf32> to vector<1x32xf32>
    %655 = vector.extract_strided_slice %323 {offsets = [0, 0], sizes = [1, 32], strides = [1, 1]} : vector<2x32xf32> to vector<1x32xf32>
    %656 = vector.extract_strided_slice %190 {offsets = [1, 0], sizes = [1, 32], strides = [1, 1]} : vector<2x32xf32> to vector<1x32xf32>
    %657 = vector.extract_strided_slice %209 {offsets = [1, 0], sizes = [1, 32], strides = [1, 1]} : vector<2x32xf32> to vector<1x32xf32>
    %658 = vector.extract_strided_slice %228 {offsets = [1, 0], sizes = [1, 32], strides = [1, 1]} : vector<2x32xf32> to vector<1x32xf32>
    %659 = vector.extract_strided_slice %247 {offsets = [1, 0], sizes = [1, 32], strides = [1, 1]} : vector<2x32xf32> to vector<1x32xf32>
    %660 = vector.extract_strided_slice %266 {offsets = [1, 0], sizes = [1, 32], strides = [1, 1]} : vector<2x32xf32> to vector<1x32xf32>
    %661 = vector.extract_strided_slice %285 {offsets = [1, 0], sizes = [1, 32], strides = [1, 1]} : vector<2x32xf32> to vector<1x32xf32>
    %662 = vector.extract_strided_slice %304 {offsets = [1, 0], sizes = [1, 32], strides = [1, 1]} : vector<2x32xf32> to vector<1x32xf32>
    %663 = vector.extract_strided_slice %323 {offsets = [1, 0], sizes = [1, 32], strides = [1, 1]} : vector<2x32xf32> to vector<1x32xf32>
    %664 = tpu.concatenate %648, %649, %650, %651, %652, %653, %654, %655, %656, %657, %658, %659, %660, %661, %662, %663 in 0 : vector<1x32xf32>, vector<1x32xf32>, vector<1x32xf32>, vector<1x32xf32>, vector<1x32xf32>, vector<1x32xf32>, vector<1x32xf32>, vector<1x32xf32>, vector<1x32xf32>, vector<1x32xf32>, vector<1x32xf32>, vector<1x32xf32>, vector<1x32xf32>, vector<1x32xf32>, vector<1x32xf32>, vector<1x32xf32> -> vector<16x32xf32>
    %665 = vector.extract_strided_slice %514 {offsets = [0, 0], sizes = [1, 32], strides = [1, 1]} : vector<2x32xf32> to vector<1x32xf32>
    %666 = vector.extract_strided_slice %533 {offsets = [0, 0], sizes = [1, 32], strides = [1, 1]} : vector<2x32xf32> to vector<1x32xf32>
    %667 = vector.extract_strided_slice %552 {offsets = [0, 0], sizes = [1, 32], strides = [1, 1]} : vector<2x32xf32> to vector<1x32xf32>
    %668 = vector.extract_strided_slice %571 {offsets = [0, 0], sizes = [1, 32], strides = [1, 1]} : vector<2x32xf32> to vector<1x32xf32>
    %669 = vector.extract_strided_slice %590 {offsets = [0, 0], sizes = [1, 32], strides = [1, 1]} : vector<2x32xf32> to vector<1x32xf32>
    %670 = vector.extract_strided_slice %609 {offsets = [0, 0], sizes = [1, 32], strides = [1, 1]} : vector<2x32xf32> to vector<1x32xf32>
    %671 = vector.extract_strided_slice %628 {offsets = [0, 0], sizes = [1, 32], strides = [1, 1]} : vector<2x32xf32> to vector<1x32xf32>
    %672 = vector.extract_strided_slice %647 {offsets = [0, 0], sizes = [1, 32], strides = [1, 1]} : vector<2x32xf32> to vector<1x32xf32>
    %673 = vector.extract_strided_slice %514 {offsets = [1, 0], sizes = [1, 32], strides = [1, 1]} : vector<2x32xf32> to vector<1x32xf32>
    %674 = vector.extract_strided_slice %533 {offsets = [1, 0], sizes = [1, 32], strides = [1, 1]} : vector<2x32xf32> to vector<1x32xf32>
    %675 = vector.extract_strided_slice %552 {offsets = [1, 0], sizes = [1, 32], strides = [1, 1]} : vector<2x32xf32> to vector<1x32xf32>
    %676 = vector.extract_strided_slice %571 {offsets = [1, 0], sizes = [1, 32], strides = [1, 1]} : vector<2x32xf32> to vector<1x32xf32>
    %677 = vector.extract_strided_slice %590 {offsets = [1, 0], sizes = [1, 32], strides = [1, 1]} : vector<2x32xf32> to vector<1x32xf32>
    %678 = vector.extract_strided_slice %609 {offsets = [1, 0], sizes = [1, 32], strides = [1, 1]} : vector<2x32xf32> to vector<1x32xf32>
    %679 = vector.extract_strided_slice %628 {offsets = [1, 0], sizes = [1, 32], strides = [1, 1]} : vector<2x32xf32> to vector<1x32xf32>
    %680 = vector.extract_strided_slice %647 {offsets = [1, 0], sizes = [1, 32], strides = [1, 1]} : vector<2x32xf32> to vector<1x32xf32>
    %681 = tpu.concatenate %665, %666, %667, %668, %669, %670, %671, %672, %673, %674, %675, %676, %677, %678, %679, %680 in 0 : vector<1x32xf32>, vector<1x32xf32>, vector<1x32xf32>, vector<1x32xf32>, vector<1x32xf32>, vector<1x32xf32>, vector<1x32xf32>, vector<1x32xf32>, vector<1x32xf32>, vector<1x32xf32>, vector<1x32xf32>, vector<1x32xf32>, vector<1x32xf32>, vector<1x32xf32>, vector<1x32xf32>, vector<1x32xf32> -> vector<16x32xf32>
    %c0_102 = arith.constant 0 : index
    %c0_103 = arith.constant 0 : index
    %682 = vector.load %arg19[%c0_102, %c0_103] : memref<8x32xbf16, #tpu.memory_space<vmem>>, vector<8x32xbf16>
    %c0_104 = arith.constant 0 : index
    %c0_105 = arith.constant 0 : index
    %683 = vector.load %arg20[%c0_104, %c0_105] : memref<8x32xbf16, #tpu.memory_space<vmem>>, vector<8x32xbf16>
    %c0_106 = arith.constant 0 : index
    %c0_107 = arith.constant 0 : index
    %684 = vector.load %arg21[%c0_106, %c0_107] : memref<8x32xbf16, #tpu.memory_space<vmem>>, vector<8x32xbf16>
    %c0_108 = arith.constant 0 : index
    %c0_109 = arith.constant 0 : index
    %685 = vector.load %arg22[%c0_108, %c0_109] : memref<8x32xbf16, #tpu.memory_space<vmem>>, vector<8x32xbf16>
    %c0_110 = arith.constant 0 : index
    %c0_111 = arith.constant 0 : index
    %686 = vector.load %arg14[%c0_110, %c0_111] : memref<32x32xbf16, #tpu.memory_space<vmem>>, vector<32x32xbf16>
    %c0_112 = arith.constant 0 : index
    %c0_113 = arith.constant 0 : index
    %687 = vector.load %arg15[%c0_112, %c0_113] : memref<32x64xbf16, #tpu.memory_space<vmem>>, vector<32x64xbf16>
    %c0_114 = arith.constant 0 : index
    %c0_115 = arith.constant 0 : index
    %688 = vector.load %arg16[%c0_114, %c0_115] : memref<1x32xf32, #tpu.memory_space<vmem>>, vector<1x32xf32>
    %c0_116 = arith.constant 0 : index
    %c0_117 = arith.constant 0 : index
    %689 = vector.load %arg17[%c0_116, %c0_117] : memref<1x64xf32, #tpu.memory_space<vmem>>, vector<1x64xf32>
    %c0_118 = arith.constant 0 : index
    %c0_119 = arith.constant 0 : index
    %690 = vector.load %arg18[%c0_118, %c0_119] : memref<1x32xf32, #tpu.memory_space<vmem>>, vector<1x32xf32>
    %691 = arith.truncf %681 : vector<16x32xf32> to vector<16x32xbf16>
    %cst_120 = arith.constant dense<0.000000e+00> : vector<16x32xf32>
    %692 = tpu.matmul %691, %686, %cst_120 {dimension_numbers = #tpu.dot_dimension_numbers<[1], [0], [0], [1], [0, 0, 1, 1], [], []>} : vector<16x32xbf16>, vector<32x32xbf16>, vector<16x32xf32> -> vector<16x32xf32>
    %693 = vector.broadcast %688 : vector<1x32xf32> to vector<16x32xf32>
    %694 = arith.addf %692, %693 : vector<16x32xf32>
    %695 = arith.truncf %664 : vector<16x32xf32> to vector<16x32xbf16>
    %cst_121 = arith.constant dense<0.000000e+00> : vector<16x64xf32>
    %696 = tpu.matmul %695, %687, %cst_121 {dimension_numbers = #tpu.dot_dimension_numbers<[1], [0], [0], [1], [0, 0, 1, 1], [], []>} : vector<16x32xbf16>, vector<32x64xbf16>, vector<16x64xf32> -> vector<16x64xf32>
    %697 = vector.broadcast %689 : vector<1x64xf32> to vector<16x64xf32>
    %698 = arith.addf %696, %697 : vector<16x64xf32>
    %699 = vector.extract_strided_slice %698 {offsets = [0, 0], sizes = [16, 32], strides = [1, 1]} : vector<16x64xf32> to vector<16x32xf32>
    %700 = vector.extract_strided_slice %698 {offsets = [0, 32], sizes = [16, 32], strides = [1, 1]} : vector<16x64xf32> to vector<16x32xf32>
    %701 = vector.extract_strided_slice %694 {offsets = [0, 0], sizes = [8, 32], strides = [1, 1]} : vector<16x32xf32> to vector<8x32xf32>
    %702 = vector.extract_strided_slice %699 {offsets = [0, 0], sizes = [8, 32], strides = [1, 1]} : vector<16x32xf32> to vector<8x32xf32>
    %703 = vector.extract_strided_slice %700 {offsets = [0, 0], sizes = [8, 32], strides = [1, 1]} : vector<16x32xf32> to vector<8x32xf32>
    %cst_122 = arith.constant 0.000000e+00 : f32
    %704 = vector.broadcast %cst_122 : f32 to vector<8x32xf32>
    %705 = vector.extract_strided_slice %701 {offsets = [0, 0], sizes = [8, 8], strides = [1, 1]} : vector<8x32xf32> to vector<8x8xf32>
    %cst_123 = arith.constant 0.353553385 : f32
    %706 = vector.broadcast %cst_123 : f32 to vector<8x8xf32>
    %707 = arith.mulf %705, %706 : vector<8x8xf32>
    %708 = arith.truncf %707 : vector<8x8xf32> to vector<8x8xbf16>
    %709 = vector.extract_strided_slice %702 {offsets = [0, 0], sizes = [8, 8], strides = [1, 1]} : vector<8x32xf32> to vector<8x8xf32>
    %710 = arith.truncf %709 : vector<8x8xf32> to vector<8x8xbf16>
    %711 = vector.extract_strided_slice %703 {offsets = [0, 0], sizes = [8, 8], strides = [1, 1]} : vector<8x32xf32> to vector<8x8xf32>
    %712 = arith.truncf %711 : vector<8x8xf32> to vector<8x8xbf16>
    %cst_124 = arith.constant dense<0.000000e+00> : vector<8x8xf32>
    %713 = tpu.matmul %708, %710, %cst_124 {dimension_numbers = #tpu.dot_dimension_numbers<[1], [1], [0], [0], [0, 0, 1, 0], [], []>} : vector<8x8xbf16>, vector<8x8xbf16>, vector<8x8xf32> -> vector<8x8xf32>
    %cst_125 = arith.constant dense<0xFF800000> : vector<8xf32>
    %714 = vector.multi_reduction <maximumf>, %713, %cst_125 [1] : vector<8x8xf32> to vector<8xf32>
    %715 = vector.shape_cast %714 : vector<8xf32> to vector<8x1xf32>
    %716 = vector.broadcast %715 : vector<8x1xf32> to vector<8x8xf32>
    %717 = arith.subf %713, %716 : vector<8x8xf32>
    %718 = math.exp %717 : vector<8x8xf32>
    %cst_126 = arith.constant dense<0.000000e+00> : vector<8xf32>
    %719 = vector.multi_reduction <add>, %718, %cst_126 [1] : vector<8x8xf32> to vector<8xf32>
    %720 = vector.shape_cast %719 : vector<8xf32> to vector<8x1xf32>
    %721 = vector.broadcast %720 : vector<8x1xf32> to vector<8x8xf32>
    %722 = arith.divf %718, %721 : vector<8x8xf32>
    %723 = arith.truncf %722 : vector<8x8xf32> to vector<8x8xbf16>
    %cst_127 = arith.constant dense<0.000000e+00> : vector<8x8xf32>
    %724 = tpu.matmul %723, %712, %cst_127 {dimension_numbers = #tpu.dot_dimension_numbers<[1], [0], [0], [1], [0, 0, 1, 1], [], []>} : vector<8x8xbf16>, vector<8x8xbf16>, vector<8x8xf32> -> vector<8x8xf32>
    %725 = arith.truncf %724 : vector<8x8xf32> to vector<8x8xbf16>
    %cst_128 = arith.constant dense<0.000000e+00> : vector<8x32xf32>
    %726 = tpu.matmul %725, %682, %cst_128 {dimension_numbers = #tpu.dot_dimension_numbers<[1], [0], [0], [1], [0, 0, 1, 1], [], []>} : vector<8x8xbf16>, vector<8x32xbf16>, vector<8x32xf32> -> vector<8x32xf32>
    %727 = arith.addf %704, %726 : vector<8x32xf32>
    %728 = vector.extract_strided_slice %701 {offsets = [0, 8], sizes = [8, 8], strides = [1, 1]} : vector<8x32xf32> to vector<8x8xf32>
    %cst_129 = arith.constant 0.353553385 : f32
    %729 = vector.broadcast %cst_129 : f32 to vector<8x8xf32>
    %730 = arith.mulf %728, %729 : vector<8x8xf32>
    %731 = arith.truncf %730 : vector<8x8xf32> to vector<8x8xbf16>
    %732 = vector.extract_strided_slice %702 {offsets = [0, 8], sizes = [8, 8], strides = [1, 1]} : vector<8x32xf32> to vector<8x8xf32>
    %733 = arith.truncf %732 : vector<8x8xf32> to vector<8x8xbf16>
    %734 = vector.extract_strided_slice %703 {offsets = [0, 8], sizes = [8, 8], strides = [1, 1]} : vector<8x32xf32> to vector<8x8xf32>
    %735 = arith.truncf %734 : vector<8x8xf32> to vector<8x8xbf16>
    %cst_130 = arith.constant dense<0.000000e+00> : vector<8x8xf32>
    %736 = tpu.matmul %731, %733, %cst_130 {dimension_numbers = #tpu.dot_dimension_numbers<[1], [1], [0], [0], [0, 0, 1, 0], [], []>} : vector<8x8xbf16>, vector<8x8xbf16>, vector<8x8xf32> -> vector<8x8xf32>
    %cst_131 = arith.constant dense<0xFF800000> : vector<8xf32>
    %737 = vector.multi_reduction <maximumf>, %736, %cst_131 [1] : vector<8x8xf32> to vector<8xf32>
    %738 = vector.shape_cast %737 : vector<8xf32> to vector<8x1xf32>
    %739 = vector.broadcast %738 : vector<8x1xf32> to vector<8x8xf32>
    %740 = arith.subf %736, %739 : vector<8x8xf32>
    %741 = math.exp %740 : vector<8x8xf32>
    %cst_132 = arith.constant dense<0.000000e+00> : vector<8xf32>
    %742 = vector.multi_reduction <add>, %741, %cst_132 [1] : vector<8x8xf32> to vector<8xf32>
    %743 = vector.shape_cast %742 : vector<8xf32> to vector<8x1xf32>
    %744 = vector.broadcast %743 : vector<8x1xf32> to vector<8x8xf32>
    %745 = arith.divf %741, %744 : vector<8x8xf32>
    %746 = arith.truncf %745 : vector<8x8xf32> to vector<8x8xbf16>
    %cst_133 = arith.constant dense<0.000000e+00> : vector<8x8xf32>
    %747 = tpu.matmul %746, %735, %cst_133 {dimension_numbers = #tpu.dot_dimension_numbers<[1], [0], [0], [1], [0, 0, 1, 1], [], []>} : vector<8x8xbf16>, vector<8x8xbf16>, vector<8x8xf32> -> vector<8x8xf32>
    %748 = arith.truncf %747 : vector<8x8xf32> to vector<8x8xbf16>
    %cst_134 = arith.constant dense<0.000000e+00> : vector<8x32xf32>
    %749 = tpu.matmul %748, %683, %cst_134 {dimension_numbers = #tpu.dot_dimension_numbers<[1], [0], [0], [1], [0, 0, 1, 1], [], []>} : vector<8x8xbf16>, vector<8x32xbf16>, vector<8x32xf32> -> vector<8x32xf32>
    %750 = arith.addf %727, %749 : vector<8x32xf32>
    %751 = vector.extract_strided_slice %701 {offsets = [0, 16], sizes = [8, 8], strides = [1, 1]} : vector<8x32xf32> to vector<8x8xf32>
    %cst_135 = arith.constant 0.353553385 : f32
    %752 = vector.broadcast %cst_135 : f32 to vector<8x8xf32>
    %753 = arith.mulf %751, %752 : vector<8x8xf32>
    %754 = arith.truncf %753 : vector<8x8xf32> to vector<8x8xbf16>
    %755 = vector.extract_strided_slice %702 {offsets = [0, 16], sizes = [8, 8], strides = [1, 1]} : vector<8x32xf32> to vector<8x8xf32>
    %756 = arith.truncf %755 : vector<8x8xf32> to vector<8x8xbf16>
    %757 = vector.extract_strided_slice %703 {offsets = [0, 16], sizes = [8, 8], strides = [1, 1]} : vector<8x32xf32> to vector<8x8xf32>
    %758 = arith.truncf %757 : vector<8x8xf32> to vector<8x8xbf16>
    %cst_136 = arith.constant dense<0.000000e+00> : vector<8x8xf32>
    %759 = tpu.matmul %754, %756, %cst_136 {dimension_numbers = #tpu.dot_dimension_numbers<[1], [1], [0], [0], [0, 0, 1, 0], [], []>} : vector<8x8xbf16>, vector<8x8xbf16>, vector<8x8xf32> -> vector<8x8xf32>
    %cst_137 = arith.constant dense<0xFF800000> : vector<8xf32>
    %760 = vector.multi_reduction <maximumf>, %759, %cst_137 [1] : vector<8x8xf32> to vector<8xf32>
    %761 = vector.shape_cast %760 : vector<8xf32> to vector<8x1xf32>
    %762 = vector.broadcast %761 : vector<8x1xf32> to vector<8x8xf32>
    %763 = arith.subf %759, %762 : vector<8x8xf32>
    %764 = math.exp %763 : vector<8x8xf32>
    %cst_138 = arith.constant dense<0.000000e+00> : vector<8xf32>
    %765 = vector.multi_reduction <add>, %764, %cst_138 [1] : vector<8x8xf32> to vector<8xf32>
    %766 = vector.shape_cast %765 : vector<8xf32> to vector<8x1xf32>
    %767 = vector.broadcast %766 : vector<8x1xf32> to vector<8x8xf32>
    %768 = arith.divf %764, %767 : vector<8x8xf32>
    %769 = arith.truncf %768 : vector<8x8xf32> to vector<8x8xbf16>
    %cst_139 = arith.constant dense<0.000000e+00> : vector<8x8xf32>
    %770 = tpu.matmul %769, %758, %cst_139 {dimension_numbers = #tpu.dot_dimension_numbers<[1], [0], [0], [1], [0, 0, 1, 1], [], []>} : vector<8x8xbf16>, vector<8x8xbf16>, vector<8x8xf32> -> vector<8x8xf32>
    %771 = arith.truncf %770 : vector<8x8xf32> to vector<8x8xbf16>
    %cst_140 = arith.constant dense<0.000000e+00> : vector<8x32xf32>
    %772 = tpu.matmul %771, %684, %cst_140 {dimension_numbers = #tpu.dot_dimension_numbers<[1], [0], [0], [1], [0, 0, 1, 1], [], []>} : vector<8x8xbf16>, vector<8x32xbf16>, vector<8x32xf32> -> vector<8x32xf32>
    %773 = arith.addf %750, %772 : vector<8x32xf32>
    %774 = vector.extract_strided_slice %701 {offsets = [0, 24], sizes = [8, 8], strides = [1, 1]} : vector<8x32xf32> to vector<8x8xf32>
    %cst_141 = arith.constant 0.353553385 : f32
    %775 = vector.broadcast %cst_141 : f32 to vector<8x8xf32>
    %776 = arith.mulf %774, %775 : vector<8x8xf32>
    %777 = arith.truncf %776 : vector<8x8xf32> to vector<8x8xbf16>
    %778 = vector.extract_strided_slice %702 {offsets = [0, 24], sizes = [8, 8], strides = [1, 1]} : vector<8x32xf32> to vector<8x8xf32>
    %779 = arith.truncf %778 : vector<8x8xf32> to vector<8x8xbf16>
    %780 = vector.extract_strided_slice %703 {offsets = [0, 24], sizes = [8, 8], strides = [1, 1]} : vector<8x32xf32> to vector<8x8xf32>
    %781 = arith.truncf %780 : vector<8x8xf32> to vector<8x8xbf16>
    %cst_142 = arith.constant dense<0.000000e+00> : vector<8x8xf32>
    %782 = tpu.matmul %777, %779, %cst_142 {dimension_numbers = #tpu.dot_dimension_numbers<[1], [1], [0], [0], [0, 0, 1, 0], [], []>} : vector<8x8xbf16>, vector<8x8xbf16>, vector<8x8xf32> -> vector<8x8xf32>
    %cst_143 = arith.constant dense<0xFF800000> : vector<8xf32>
    %783 = vector.multi_reduction <maximumf>, %782, %cst_143 [1] : vector<8x8xf32> to vector<8xf32>
    %784 = vector.shape_cast %783 : vector<8xf32> to vector<8x1xf32>
    %785 = vector.broadcast %784 : vector<8x1xf32> to vector<8x8xf32>
    %786 = arith.subf %782, %785 : vector<8x8xf32>
    %787 = math.exp %786 : vector<8x8xf32>
    %cst_144 = arith.constant dense<0.000000e+00> : vector<8xf32>
    %788 = vector.multi_reduction <add>, %787, %cst_144 [1] : vector<8x8xf32> to vector<8xf32>
    %789 = vector.shape_cast %788 : vector<8xf32> to vector<8x1xf32>
    %790 = vector.broadcast %789 : vector<8x1xf32> to vector<8x8xf32>
    %791 = arith.divf %787, %790 : vector<8x8xf32>
    %792 = arith.truncf %791 : vector<8x8xf32> to vector<8x8xbf16>
    %cst_145 = arith.constant dense<0.000000e+00> : vector<8x8xf32>
    %793 = tpu.matmul %792, %781, %cst_145 {dimension_numbers = #tpu.dot_dimension_numbers<[1], [0], [0], [1], [0, 0, 1, 1], [], []>} : vector<8x8xbf16>, vector<8x8xbf16>, vector<8x8xf32> -> vector<8x8xf32>
    %794 = arith.truncf %793 : vector<8x8xf32> to vector<8x8xbf16>
    %cst_146 = arith.constant dense<0.000000e+00> : vector<8x32xf32>
    %795 = tpu.matmul %794, %685, %cst_146 {dimension_numbers = #tpu.dot_dimension_numbers<[1], [0], [0], [1], [0, 0, 1, 1], [], []>} : vector<8x8xbf16>, vector<8x32xbf16>, vector<8x32xf32> -> vector<8x32xf32>
    %796 = arith.addf %773, %795 : vector<8x32xf32>
    %797 = vector.broadcast %690 : vector<1x32xf32> to vector<8x32xf32>
    %798 = arith.addf %796, %797 : vector<8x32xf32>
    %799 = vector.extract_strided_slice %694 {offsets = [8, 0], sizes = [8, 32], strides = [1, 1]} : vector<16x32xf32> to vector<8x32xf32>
    %800 = vector.extract_strided_slice %699 {offsets = [8, 0], sizes = [8, 32], strides = [1, 1]} : vector<16x32xf32> to vector<8x32xf32>
    %801 = vector.extract_strided_slice %700 {offsets = [8, 0], sizes = [8, 32], strides = [1, 1]} : vector<16x32xf32> to vector<8x32xf32>
    %cst_147 = arith.constant 0.000000e+00 : f32
    %802 = vector.broadcast %cst_147 : f32 to vector<8x32xf32>
    %803 = vector.extract_strided_slice %799 {offsets = [0, 0], sizes = [8, 8], strides = [1, 1]} : vector<8x32xf32> to vector<8x8xf32>
    %cst_148 = arith.constant 0.353553385 : f32
    %804 = vector.broadcast %cst_148 : f32 to vector<8x8xf32>
    %805 = arith.mulf %803, %804 : vector<8x8xf32>
    %806 = arith.truncf %805 : vector<8x8xf32> to vector<8x8xbf16>
    %807 = vector.extract_strided_slice %800 {offsets = [0, 0], sizes = [8, 8], strides = [1, 1]} : vector<8x32xf32> to vector<8x8xf32>
    %808 = arith.truncf %807 : vector<8x8xf32> to vector<8x8xbf16>
    %809 = vector.extract_strided_slice %801 {offsets = [0, 0], sizes = [8, 8], strides = [1, 1]} : vector<8x32xf32> to vector<8x8xf32>
    %810 = arith.truncf %809 : vector<8x8xf32> to vector<8x8xbf16>
    %cst_149 = arith.constant dense<0.000000e+00> : vector<8x8xf32>
    %811 = tpu.matmul %806, %808, %cst_149 {dimension_numbers = #tpu.dot_dimension_numbers<[1], [1], [0], [0], [0, 0, 1, 0], [], []>} : vector<8x8xbf16>, vector<8x8xbf16>, vector<8x8xf32> -> vector<8x8xf32>
    %cst_150 = arith.constant dense<0xFF800000> : vector<8xf32>
    %812 = vector.multi_reduction <maximumf>, %811, %cst_150 [1] : vector<8x8xf32> to vector<8xf32>
    %813 = vector.shape_cast %812 : vector<8xf32> to vector<8x1xf32>
    %814 = vector.broadcast %813 : vector<8x1xf32> to vector<8x8xf32>
    %815 = arith.subf %811, %814 : vector<8x8xf32>
    %816 = math.exp %815 : vector<8x8xf32>
    %cst_151 = arith.constant dense<0.000000e+00> : vector<8xf32>
    %817 = vector.multi_reduction <add>, %816, %cst_151 [1] : vector<8x8xf32> to vector<8xf32>
    %818 = vector.shape_cast %817 : vector<8xf32> to vector<8x1xf32>
    %819 = vector.broadcast %818 : vector<8x1xf32> to vector<8x8xf32>
    %820 = arith.divf %816, %819 : vector<8x8xf32>
    %821 = arith.truncf %820 : vector<8x8xf32> to vector<8x8xbf16>
    %cst_152 = arith.constant dense<0.000000e+00> : vector<8x8xf32>
    %822 = tpu.matmul %821, %810, %cst_152 {dimension_numbers = #tpu.dot_dimension_numbers<[1], [0], [0], [1], [0, 0, 1, 1], [], []>} : vector<8x8xbf16>, vector<8x8xbf16>, vector<8x8xf32> -> vector<8x8xf32>
    %823 = arith.truncf %822 : vector<8x8xf32> to vector<8x8xbf16>
    %cst_153 = arith.constant dense<0.000000e+00> : vector<8x32xf32>
    %824 = tpu.matmul %823, %682, %cst_153 {dimension_numbers = #tpu.dot_dimension_numbers<[1], [0], [0], [1], [0, 0, 1, 1], [], []>} : vector<8x8xbf16>, vector<8x32xbf16>, vector<8x32xf32> -> vector<8x32xf32>
    %825 = arith.addf %802, %824 : vector<8x32xf32>
    %826 = vector.extract_strided_slice %799 {offsets = [0, 8], sizes = [8, 8], strides = [1, 1]} : vector<8x32xf32> to vector<8x8xf32>
    %cst_154 = arith.constant 0.353553385 : f32
    %827 = vector.broadcast %cst_154 : f32 to vector<8x8xf32>
    %828 = arith.mulf %826, %827 : vector<8x8xf32>
    %829 = arith.truncf %828 : vector<8x8xf32> to vector<8x8xbf16>
    %830 = vector.extract_strided_slice %800 {offsets = [0, 8], sizes = [8, 8], strides = [1, 1]} : vector<8x32xf32> to vector<8x8xf32>
    %831 = arith.truncf %830 : vector<8x8xf32> to vector<8x8xbf16>
    %832 = vector.extract_strided_slice %801 {offsets = [0, 8], sizes = [8, 8], strides = [1, 1]} : vector<8x32xf32> to vector<8x8xf32>
    %833 = arith.truncf %832 : vector<8x8xf32> to vector<8x8xbf16>
    %cst_155 = arith.constant dense<0.000000e+00> : vector<8x8xf32>
    %834 = tpu.matmul %829, %831, %cst_155 {dimension_numbers = #tpu.dot_dimension_numbers<[1], [1], [0], [0], [0, 0, 1, 0], [], []>} : vector<8x8xbf16>, vector<8x8xbf16>, vector<8x8xf32> -> vector<8x8xf32>
    %cst_156 = arith.constant dense<0xFF800000> : vector<8xf32>
    %835 = vector.multi_reduction <maximumf>, %834, %cst_156 [1] : vector<8x8xf32> to vector<8xf32>
    %836 = vector.shape_cast %835 : vector<8xf32> to vector<8x1xf32>
    %837 = vector.broadcast %836 : vector<8x1xf32> to vector<8x8xf32>
    %838 = arith.subf %834, %837 : vector<8x8xf32>
    %839 = math.exp %838 : vector<8x8xf32>
    %cst_157 = arith.constant dense<0.000000e+00> : vector<8xf32>
    %840 = vector.multi_reduction <add>, %839, %cst_157 [1] : vector<8x8xf32> to vector<8xf32>
    %841 = vector.shape_cast %840 : vector<8xf32> to vector<8x1xf32>
    %842 = vector.broadcast %841 : vector<8x1xf32> to vector<8x8xf32>
    %843 = arith.divf %839, %842 : vector<8x8xf32>
    %844 = arith.truncf %843 : vector<8x8xf32> to vector<8x8xbf16>
    %cst_158 = arith.constant dense<0.000000e+00> : vector<8x8xf32>
    %845 = tpu.matmul %844, %833, %cst_158 {dimension_numbers = #tpu.dot_dimension_numbers<[1], [0], [0], [1], [0, 0, 1, 1], [], []>} : vector<8x8xbf16>, vector<8x8xbf16>, vector<8x8xf32> -> vector<8x8xf32>
    %846 = arith.truncf %845 : vector<8x8xf32> to vector<8x8xbf16>
    %cst_159 = arith.constant dense<0.000000e+00> : vector<8x32xf32>
    %847 = tpu.matmul %846, %683, %cst_159 {dimension_numbers = #tpu.dot_dimension_numbers<[1], [0], [0], [1], [0, 0, 1, 1], [], []>} : vector<8x8xbf16>, vector<8x32xbf16>, vector<8x32xf32> -> vector<8x32xf32>
    %848 = arith.addf %825, %847 : vector<8x32xf32>
    %849 = vector.extract_strided_slice %799 {offsets = [0, 16], sizes = [8, 8], strides = [1, 1]} : vector<8x32xf32> to vector<8x8xf32>
    %cst_160 = arith.constant 0.353553385 : f32
    %850 = vector.broadcast %cst_160 : f32 to vector<8x8xf32>
    %851 = arith.mulf %849, %850 : vector<8x8xf32>
    %852 = arith.truncf %851 : vector<8x8xf32> to vector<8x8xbf16>
    %853 = vector.extract_strided_slice %800 {offsets = [0, 16], sizes = [8, 8], strides = [1, 1]} : vector<8x32xf32> to vector<8x8xf32>
    %854 = arith.truncf %853 : vector<8x8xf32> to vector<8x8xbf16>
    %855 = vector.extract_strided_slice %801 {offsets = [0, 16], sizes = [8, 8], strides = [1, 1]} : vector<8x32xf32> to vector<8x8xf32>
    %856 = arith.truncf %855 : vector<8x8xf32> to vector<8x8xbf16>
    %cst_161 = arith.constant dense<0.000000e+00> : vector<8x8xf32>
    %857 = tpu.matmul %852, %854, %cst_161 {dimension_numbers = #tpu.dot_dimension_numbers<[1], [1], [0], [0], [0, 0, 1, 0], [], []>} : vector<8x8xbf16>, vector<8x8xbf16>, vector<8x8xf32> -> vector<8x8xf32>
    %cst_162 = arith.constant dense<0xFF800000> : vector<8xf32>
    %858 = vector.multi_reduction <maximumf>, %857, %cst_162 [1] : vector<8x8xf32> to vector<8xf32>
    %859 = vector.shape_cast %858 : vector<8xf32> to vector<8x1xf32>
    %860 = vector.broadcast %859 : vector<8x1xf32> to vector<8x8xf32>
    %861 = arith.subf %857, %860 : vector<8x8xf32>
    %862 = math.exp %861 : vector<8x8xf32>
    %cst_163 = arith.constant dense<0.000000e+00> : vector<8xf32>
    %863 = vector.multi_reduction <add>, %862, %cst_163 [1] : vector<8x8xf32> to vector<8xf32>
    %864 = vector.shape_cast %863 : vector<8xf32> to vector<8x1xf32>
    %865 = vector.broadcast %864 : vector<8x1xf32> to vector<8x8xf32>
    %866 = arith.divf %862, %865 : vector<8x8xf32>
    %867 = arith.truncf %866 : vector<8x8xf32> to vector<8x8xbf16>
    %cst_164 = arith.constant dense<0.000000e+00> : vector<8x8xf32>
    %868 = tpu.matmul %867, %856, %cst_164 {dimension_numbers = #tpu.dot_dimension_numbers<[1], [0], [0], [1], [0, 0, 1, 1], [], []>} : vector<8x8xbf16>, vector<8x8xbf16>, vector<8x8xf32> -> vector<8x8xf32>
    %869 = arith.truncf %868 : vector<8x8xf32> to vector<8x8xbf16>
    %cst_165 = arith.constant dense<0.000000e+00> : vector<8x32xf32>
    %870 = tpu.matmul %869, %684, %cst_165 {dimension_numbers = #tpu.dot_dimension_numbers<[1], [0], [0], [1], [0, 0, 1, 1], [], []>} : vector<8x8xbf16>, vector<8x32xbf16>, vector<8x32xf32> -> vector<8x32xf32>
    %871 = arith.addf %848, %870 : vector<8x32xf32>
    %872 = vector.extract_strided_slice %799 {offsets = [0, 24], sizes = [8, 8], strides = [1, 1]} : vector<8x32xf32> to vector<8x8xf32>
    %cst_166 = arith.constant 0.353553385 : f32
    %873 = vector.broadcast %cst_166 : f32 to vector<8x8xf32>
    %874 = arith.mulf %872, %873 : vector<8x8xf32>
    %875 = arith.truncf %874 : vector<8x8xf32> to vector<8x8xbf16>
    %876 = vector.extract_strided_slice %800 {offsets = [0, 24], sizes = [8, 8], strides = [1, 1]} : vector<8x32xf32> to vector<8x8xf32>
    %877 = arith.truncf %876 : vector<8x8xf32> to vector<8x8xbf16>
    %878 = vector.extract_strided_slice %801 {offsets = [0, 24], sizes = [8, 8], strides = [1, 1]} : vector<8x32xf32> to vector<8x8xf32>
    %879 = arith.truncf %878 : vector<8x8xf32> to vector<8x8xbf16>
    %cst_167 = arith.constant dense<0.000000e+00> : vector<8x8xf32>
    %880 = tpu.matmul %875, %877, %cst_167 {dimension_numbers = #tpu.dot_dimension_numbers<[1], [1], [0], [0], [0, 0, 1, 0], [], []>} : vector<8x8xbf16>, vector<8x8xbf16>, vector<8x8xf32> -> vector<8x8xf32>
    %cst_168 = arith.constant dense<0xFF800000> : vector<8xf32>
    %881 = vector.multi_reduction <maximumf>, %880, %cst_168 [1] : vector<8x8xf32> to vector<8xf32>
    %882 = vector.shape_cast %881 : vector<8xf32> to vector<8x1xf32>
    %883 = vector.broadcast %882 : vector<8x1xf32> to vector<8x8xf32>
    %884 = arith.subf %880, %883 : vector<8x8xf32>
    %885 = math.exp %884 : vector<8x8xf32>
    %cst_169 = arith.constant dense<0.000000e+00> : vector<8xf32>
    %886 = vector.multi_reduction <add>, %885, %cst_169 [1] : vector<8x8xf32> to vector<8xf32>
    %887 = vector.shape_cast %886 : vector<8xf32> to vector<8x1xf32>
    %888 = vector.broadcast %887 : vector<8x1xf32> to vector<8x8xf32>
    %889 = arith.divf %885, %888 : vector<8x8xf32>
    %890 = arith.truncf %889 : vector<8x8xf32> to vector<8x8xbf16>
    %cst_170 = arith.constant dense<0.000000e+00> : vector<8x8xf32>
    %891 = tpu.matmul %890, %879, %cst_170 {dimension_numbers = #tpu.dot_dimension_numbers<[1], [0], [0], [1], [0, 0, 1, 1], [], []>} : vector<8x8xbf16>, vector<8x8xbf16>, vector<8x8xf32> -> vector<8x8xf32>
    %892 = arith.truncf %891 : vector<8x8xf32> to vector<8x8xbf16>
    %cst_171 = arith.constant dense<0.000000e+00> : vector<8x32xf32>
    %893 = tpu.matmul %892, %685, %cst_171 {dimension_numbers = #tpu.dot_dimension_numbers<[1], [0], [0], [1], [0, 0, 1, 1], [], []>} : vector<8x8xbf16>, vector<8x32xbf16>, vector<8x32xf32> -> vector<8x32xf32>
    %894 = arith.addf %871, %893 : vector<8x32xf32>
    %895 = vector.broadcast %690 : vector<1x32xf32> to vector<8x32xf32>
    %896 = arith.addf %894, %895 : vector<8x32xf32>
    %c0_172 = arith.constant 0 : index
    %c0_173 = arith.constant 0 : index
    %897 = vector.load %arg23[%c0_172, %c0_173] : memref<16x32xf32, #tpu.memory_space<vmem>>, vector<8x32xf32>
    tpu.vector_store %arg23[%c0_172, %c0_173], %798 {strides = array<i32>} : memref<16x32xf32, #tpu.memory_space<vmem>>, vector<8x32xf32>,
    %c8 = arith.constant 8 : index
    %c0_174 = arith.constant 0 : index
    %898 = vector.load %arg23[%c8, %c0_174] : memref<16x32xf32, #tpu.memory_space<vmem>>, vector<8x32xf32>
    tpu.vector_store %arg23[%c8, %c0_174], %896 {strides = array<i32>} : memref<16x32xf32, #tpu.memory_space<vmem>>, vector<8x32xf32>,
    return
  }
}

</mosaic_0001>

<bundles_post_ra>
// kernel: seq2seq_attention_forward.1
= control target key start
LH: loop header
LB: loop body
LE: loop exit
PB: predicated region body
PF: predicated region fallthrough
CT: control target
= control target key end

     0   :  { %s6496_s0 = inlined_call_operand.vmem [shape: f32[16,16], index: 0, kind: input, shape index: {}]   ;;  %s6497_s1 = inlined_call_operand.vmem [shape: f32[16,32], index: 1, kind: input, shape index: {}]   ;;  %s6498_s2 = inlined_call_operand.vmem [shape: bf16[16,128], index: 2, kind: input, shape index: {}]   ;;  %s6499_s3 = inlined_call_operand.vmem [shape: bf16[32,128], index: 3, kind: input, shape index: {}]   ;;  %s6500_s4 = inlined_call_operand.vmem [shape: f32[1,128], index: 4, kind: input, shape index: {}]   ;;  %s6501_s5 = inlined_call_operand.vmem [shape: bf16[32,128], index: 5, kind: input, shape index: {}]   ;;  %s6502_s6 = inlined_call_operand.vmem [shape: bf16[32,128], index: 6, kind: input, shape index: {}]   ;;  %s6503_s7 = inlined_call_operand.vmem [shape: f32[1,128], index: 7, kind: input, shape index: {}]   ;;  %s6504_s8 = inlined_call_operand.vmem [shape: bf16[32,128], index: 8, kind: input, shape index: {}]   ;;  %s6505_s9 = inlined_call_operand.vmem [shape: bf16[32,128], index: 9, kind: input, shape index: {}]   ;;  %s6506_s10 = inlined_call_operand.vmem [shape: f32[1,128], index: 10, kind: input, shape index: {}]   ;;  %s6507_s11 = inlined_call_operand.vmem [shape: bf16[32,128], index: 11, kind: input, shape index: {}]   ;;  %s6508_s12 = inlined_call_operand.vmem [shape: bf16[32,128], index: 12, kind: input, shape index: {}]   ;;  %s6509_s13 = inlined_call_operand.vmem [shape: f32[1,128], index: 13, kind: input, shape index: {}]   ;;  %s6510_s14 = inlined_call_operand.vmem [shape: bf16[32,32], index: 14, kind: input, shape index: {}]   ;;  %s6511_s15 = inlined_call_operand.vmem [shape: bf16[32,64], index: 15, kind: input, shape index: {}]   ;;  %s6512_s16 = inlined_call_operand.vmem [shape: f32[1,32], index: 16, kind: input, shape index: {}]   ;;  %s6513_s17 = inlined_call_operand.vmem [shape: f32[1,64], index: 17, kind: input, shape index: {}]   ;;  %s6514_s18 = inlined_call_operand.vmem [shape: f32[1,32], index: 18, kind: input, shape index: {}]   ;;  %s6515_s19 = inlined_call_operand.vmem [shape: bf16[8,32], index: 19, kind: input, shape index: {}]   ;;  %s6516_s20 = inlined_call_operand.vmem [shape: bf16[8,32], index: 20, kind: input, shape index: {}]   ;;  %s6517_s21 = inlined_call_operand.vmem [shape: bf16[8,32], index: 21, kind: input, shape index: {}]   ;;  %s6518_s22 = inlined_call_operand.vmem [shape: bf16[8,32], index: 22, kind: input, shape index: {}]   ;;  %s6519_s23 = inlined_call_operand.hbm [shape: f32[16,32], index: 23, kind: output, shape index: {}]  }
   0x1   :  { %6525 = sst [smem:[#allocation5_spill]] %s6496_s0 }
   0x2   :  { %6526 = sst [smem:[#allocation6_spill]] %s6497_s1 }
   0x3   :  { %6527 = sst [smem:[#allocation7_spill]] %s6498_s2 }
   0x4   :  { %6528 = sst [smem:[#allocation8_spill]] %s6499_s3 }
   0x5   :  { %6529 = sst [smem:[#allocation9_spill]] %s6500_s4 }
   0x6   :  { %6530 = sst [smem:[#allocation10_spill]] %s6501_s5 }
   0x7   :  { %6531 = sst [smem:[#allocation11_spill]] %s6502_s6 }
   0x8   :  { %6532 = sst [smem:[#allocation12_spill]] %s6503_s7 }
   0x9   :  { %s6533_s24 = sld [smem:[#allocation7_spill]]  ;;  %v5483_v1 = vmov 0.0   ;;  %s6534_s1 = sld [smem:[#allocation8_spill]]  ;;  %vm5484_vm0 = vmmov 0   ;;  %vm98_vm1 = vcmask 130048   ;;  %v5485_v7 = vmov 0  }
   0xa   :  { %4691 = vmatprep.subr.bf16.mxu0 %v5483_v1  ;;  %4697 = vmatprep.subr.bf16.mxu1 %v5483_v1  ;;  %s6535_s6 = sld [smem:[#allocation5_spill]] }
   0xb   :  { %4693 = vmatprep.mubr.msk.bf16.mxu0 %vm5484_vm0, %v5483_v1  ;;  %4701 = vmatprep.mubr.msk.bf16.mxu1 %vm5484_vm0, %v5483_v1 }
   0xf   :  { %v5152_v0 = vld [vmem:[%s6533_s24] sm:$0xff]   ;;  %v5640_v6 = vld [vmem:[%s6534_s1 + $0x8] sm:$0xff]  }
  0x10   :  { %v5626_v2 = vld [vmem:[%s6534_s1] sm:$0xff]   ;;  %4692 = vmatpush3.bf16.msra.mxu0 %v5152_v0  ;;  %v77_v4 = vld [vmem:[%s6535_s6 + $0x8] sm:$0xff] }
  0x11   :  { %v76_v3 = vld [vmem:[%s6535_s6] sm:$0xff]  ;;  %4698 = vmatpush3.bf16.msra.mxu1 %v5626_v2  ;;  %4705 = vmatprep.subr.bf16.mxu0 %v5483_v1 }
  0x12   :  { %v85_v5 = vpack.c.bf16 %v77_v4, %v76_v3  ;;  %4699 = vmatprep.subr.bf16.mxu1 %v5483_v1 }
  0x14   :  { %4694 = vmatmul.mubr.msk.bf16.vlgmr.msra.gmra.mrb[0].mxu0 %vm98_vm1, %v85_v5 }
  0x15   :  { %4706 = vmatpush3.bf16.msra.mxu0 %v5626_v2  ;;  %4709 = vmatprep.mubr.msk.bf16.mxu0 %vm5484_vm0, %v5483_v1 }
  0x16   :  { %4700 = vmatpush3.bf16.msra.mxu1 %v5640_v6  ;;  %4707 = vmatprep.subr.bf16.mxu0 %v5483_v1 }
  0x17   :  { %4713 = vmatprep.subr.bf16.mxu1 %v5483_v1 }
  0x19   :  { %4702 = vmatmul.mubr.bf16.vlgmr.msra.gmra.mrb[0].mxu1 %v5485_v7  ;;  %4708 = vmatpush3.bf16.msra.mxu0 %v5640_v6 }
  0x1a   :  { %4714 = vmatpush3.bf16.msra.mxu1 %v5626_v2  ;;  %4717 = vmatprep.mubr.msk.bf16.mxu1 %vm5484_vm0, %v5483_v1 }
  0x1b   :  { %4715 = vmatprep.subr.bf16.mxu1 %v5483_v1  ;;  %4721 = vmatprep.subr.bf16.mxu0 %v5483_v1 }
  0x1c   :  { %28 = vsyncpa [#allocation3], 0  ;;  %s6536_s4 = sld [smem:[#allocation9_spill]]  ;;  %s5486_s30 = smov 64   ;;  %vm155_vm2 = vcmask 261120   ;;  %vm772_vm3 = vcmask 1041408  }
  0x1d   :  { %s5487_s24 = smov 32   ;;  %vm774_vm4 = vcmask 1043456   ;;  %vm776_vm5 = vcmask 1045504   ;;  %s6537_s1 = sld [smem:[#allocation10_spill]]  ;;  %vm2922_vm6 = vcmask 1040384   ;;  %vm2925_vm7 = vcmask 1042432  }
  0x1e   :  { %4716 = vmatpush3.bf16.msra.mxu1 %v5640_v6  ;;  %s6538_s6 = sld [smem:[#allocation11_spill]]  ;;  %vm2928_vm8 = vcmask 1044480   ;;  %s6540_s27 = sld [smem:[#allocation6_spill]]  ;;  %vm2931_vm9 = vcmask 1046528   ;;  %vm3140_vm10 = vcmask 64512  }
  0x1f   :  { %4729 = vmatprep.subr.bf16.mxu1 %v5483_v1 }
  0x22   :  { %v4414_v8 = vld [vmem:[%s6536_s4] ss:$0 sm:$0xff]  ;;  %s6539_s4 = sld [smem:[#allocation12_spill]] }
  0xe7   :  { %v136_v9 = vpop.f32.mrb[0].mxu0 }
  0xe8   :  { %v4695_v10 = vpop.f32.mrb[1].mxu0  ;;  %v5664_v11 = vadd.f32 %v4414_v8, %v136_v9 }
  0xe9   :  { %v139_v12 = vpop.f32.mrb[2].mxu0 }
  0xea   :  { %v5666_v13 = vadd.f32 %v4414_v8, %v139_v12  ;;  %v4696_v14 = vpop.f32.mrb[3].mxu0 }
  0xec   :  { %v193_v15 = vpop.f32.mrb[0].mxu1 }
  0xed   :  { %v199_v16 = vadd.f32 %v193_v15, %v5664_v11  ;;  %v4703_v17 = vpop.f32.mrb[1].mxu1 }
  0xee   :  { %v196_v18 = vpop.f32.mrb[2].mxu1 }
  0xef   :  { %5171 = vtanh.f32 %v199_v16  ;;  %v4704_v19 = vpop.f32.mrb[3].mxu1  ;;  %v4419_v21 = vmul.f32 -1.442695, %v199_v16 }
  0xf1   :  { %5173 = vpow2.f32 %v4419_v21 }
  0xf9   :  { %v5172_v20 = vpop.eup %5171 }
  0xfa   :  { %209 = vrot.lane.b32.xlu0 %v5172_v20, %s5486_s30 }
  0xfb   :  { %v5174_v22 = vpop.eup %5173 }
  0xfc   :  { %v203_v23 = vadd.f32 1.0, %v5174_v22 }
  0xfe   :  { %5175 = vrcp.f32 %v203_v23 }
 0x108   :  { %v5176_v24 = vpop.eup %5175 }
 0x109   :  { %v207_v27 = vmul.f32 0.0, %v5176_v24 }
 0x16c   :  { %v210_v25 = vpop.permute.xlu0 %209 }
 0x16d   :  { %v212_v26 = vmul.f32 %v5176_v24, %v210_v25 }
 0x16f   :  { %214 = vrot.lane.b32.xlu0 %v212_v26, %s5487_s24 }
 0x1e1   :  { %v215_v28 = vpop.permute.xlu0 %214 }
 0x1e2   :  { %v217_v29 = vadd.f32 %v215_v28, %v207_v27 }
 0x1e4   :  { %5177 = vtanh.f32 %v217_v29  ;;  %v283_v48 = vrot.slane %v217_v29, 6 }
 0x1ee   :  { %v5178_v30 = vpop.eup %5177 }
 0x1ef   :  { %220 = vrot.lane.b32.xlu1 %v5178_v30, %s5486_s30 }
 0x261   :  { %v221_v31 = vpop.permute.xlu1 %220 }
 0x262   :  { %v5672_v32 = vmul.f32 %v5176_v24, %v221_v31 }
 0x264   :  { %v224_v33 = vpack.c.bf16 %v5672_v32, %v5672_v32 }
 0x266   :  { %226 = vrot.lane.b32.xlu1 %v224_v33, %s5487_s24 }
 0x2d8   :  { %v227_v34 = vpop.permute.xlu1 %226 }
 0x2d9   :  { %4710 = vmatmul.mubr.msk.bf16.vlgmr.msra.gmra.mrb[4].mxu0 %vm155_vm2, %v227_v34 }
 0x2da   :  { %4722 = vmatpush3.bf16.msra.mxu0 %v5626_v2  ;;  %4725 = vmatprep.mubr.msk.bf16.mxu0 %vm5484_vm0, %v5483_v1 }
 0x2db   :  { %4723 = vmatprep.subr.bf16.mxu0 %v5483_v1 }
 0x2de   :  { %4724 = vmatpush3.bf16.msra.mxu0 %v5640_v6 }
 0x2df   :  { %4737 = vmatprep.subr.bf16.mxu0 %v5483_v1 }
 0x3ac   :  { %v265_v35 = vpop.f32.mrb[4].mxu0 }
 0x3ad   :  { %v272_v36 = vrot.slane %v265_v35, 6  ;;  %v4711_v37 = vpop.f32.mrb[5].mxu0 }
 0x3ae   :  { %v268_v38 = vpop.f32.mrb[6].mxu0 }
 0x3af   :  { %v274_v39 = vadd.f32 %v272_v36, %v5664_v11  ;;  %v4712_v40 = vpop.f32.mrb[7].mxu0 }
 0x3b1   :  { %5179 = vtanh.f32 %v274_v39  ;;  %v4421_v42 = vmul.f32 -1.442695, %v274_v39 }
 0x3b3   :  { %5181 = vpow2.f32 %v4421_v42 }
 0x3bb   :  { %v5180_v41 = vpop.eup %5179 }
 0x3bc   :  { %287 = vrot.lane.b32.xlu0 %v5180_v41, %s5486_s30 }
 0x3bd   :  { %v5182_v43 = vpop.eup %5181 }
 0x3be   :  { %v278_v44 = vadd.f32 1.0, %v5182_v43 }
 0x3c0   :  { %5183 = vrcp.f32 %v278_v44 }
 0x3ca   :  { %v5184_v45 = vpop.eup %5183 }
 0x3cb   :  { %v285_v49 = vmul.f32 %v5184_v45, %v283_v48 }
 0x42e   :  { %v288_v46 = vpop.permute.xlu0 %287 }
 0x42f   :  { %v290_v47 = vmul.f32 %v5184_v45, %v288_v46 }
 0x431   :  { %292 = vrot.lane.b32.xlu1 %v290_v47, %s5487_s24 }
 0x4a3   :  { %v293_v50 = vpop.permute.xlu1 %292 }
 0x4a4   :  { %v295_v51 = vadd.f32 %v293_v50, %v285_v49 }
 0x4a6   :  { %5185 = vtanh.f32 %v295_v51  ;;  %v362_v12 = vrot.slane %v295_v51, 6 }
 0x4b0   :  { %v5186_v52 = vpop.eup %5185 }
 0x4b1   :  { %298 = vrot.lane.b32.xlu0 %v5186_v52, %s5486_s30 }
 0x523   :  { %v299_v53 = vpop.permute.xlu0 %298 }
 0x524   :  { %v301_v54 = vmul.f32 %v5184_v45, %v299_v53 }
 0x526   :  { %v302_v55 = vpack.c.bf16 %v301_v54, %v301_v54  ;;  %v773_v20 = vsel %vm772_vm3, %v5672_v32, %v301_v54 }
 0x528   :  { %v304_v56 = vrot.slane %v302_v55, 1 }
 0x52a   :  { %305 = vrot.lane.b32.xlu1 %v304_v56, %s5487_s24 }
 0x59c   :  { %v306_v57 = vpop.permute.xlu1 %305 }
 0x59d   :  { %4718 = vmatmul.mubr.msk.bf16.vlgmr.msra.gmra.mrb[4].mxu1 %vm155_vm2, %v306_v57 }
 0x59e   :  { %4730 = vmatpush3.bf16.msra.mxu1 %v5626_v2  ;;  %4733 = vmatprep.mubr.msk.bf16.mxu1 %vm5484_vm0, %v5483_v1 }
 0x59f   :  { %4731 = vmatprep.subr.bf16.mxu1 %v5483_v1 }
 0x5a2   :  { %4732 = vmatpush3.bf16.msra.mxu1 %v5640_v6 }
 0x5a3   :  { %4745 = vmatprep.subr.bf16.mxu1 %v5483_v1 }
 0x670   :  { %v344_v58 = vpop.f32.mrb[4].mxu1 }
 0x671   :  { %v351_v59 = vrot.slane %v344_v58, 4  ;;  %v4719_v60 = vpop.f32.mrb[5].mxu1 }
 0x672   :  { %v347_v61 = vpop.f32.mrb[6].mxu1 }
 0x673   :  { %v353_v62 = vadd.f32 %v351_v59, %v5664_v11  ;;  %v4720_v63 = vpop.f32.mrb[7].mxu1 }
 0x675   :  { %5187 = vtanh.f32 %v353_v62  ;;  %v4423_v3 = vmul.f32 -1.442695, %v353_v62 }
 0x677   :  { %5189 = vpow2.f32 %v4423_v3 }
 0x67f   :  { %v5188_v0 = vpop.eup %5187 }
 0x680   :  { %366 = vrot.lane.b32.xlu0 %v5188_v0, %s5486_s30 }
 0x681   :  { %v5190_v4 = vpop.eup %5189 }
 0x682   :  { %v357_v5 = vadd.f32 1.0, %v5190_v4 }
 0x684   :  { %5191 = vrcp.f32 %v357_v5 }
 0x68e   :  { %v5192_v8 = vpop.eup %5191 }
 0x68f   :  { %v364_v14 = vmul.f32 %v5192_v8, %v362_v12 }
 0x6f2   :  { %v367_v9 = vpop.permute.xlu0 %366 }
 0x6f3   :  { %v369_v10 = vmul.f32 %v5192_v8, %v367_v9 }
 0x6f5   :  { %371 = vrot.lane.b32.xlu1 %v369_v10, %s5487_s24 }
 0x767   :  { %v372_v15 = vpop.permute.xlu1 %371 }
 0x768   :  { %v374_v16 = vadd.f32 %v372_v15, %v364_v14 }
 0x76a   :  { %5193 = vtanh.f32 %v374_v16  ;;  %v441_v38 = vrot.slane %v374_v16, 6 }
 0x774   :  { %v5194_v17 = vpop.eup %5193 }
 0x775   :  { %377 = vrot.lane.b32.xlu0 %v5194_v17, %s5486_s30 }
 0x7e7   :  { %v378_v18 = vpop.permute.xlu0 %377 }
 0x7e8   :  { %v380_v19 = vmul.f32 %v5192_v8, %v378_v18 }
 0x7ea   :  { %v381_v21 = vpack.c.bf16 %v380_v19, %v380_v19  ;;  %v775_v22 = vsel %vm774_vm4, %v773_v20, %v380_v19 }
 0x7ec   :  { %v383_v23 = vrot.slane %v381_v21, 2 }
 0x7ee   :  { %384 = vrot.lane.b32.xlu1 %v383_v23, %s5487_s24 }
 0x860   :  { %v385_v24 = vpop.permute.xlu1 %384 }
 0x861   :  { %4726 = vmatmul.mubr.msk.bf16.vlgmr.msra.gmra.mrb[8].mxu0 %vm155_vm2, %v385_v24 }
 0x862   :  { %4738 = vmatpush3.bf16.msra.mxu0 %v5626_v2  ;;  %4741 = vmatprep.mubr.msk.bf16.mxu0 %vm5484_vm0, %v5483_v1 }
 0x863   :  { %4739 = vmatprep.subr.bf16.mxu0 %v5483_v1 }
 0x866   :  { %4740 = vmatpush3.bf16.msra.mxu0 %v5640_v6 }
 0x867   :  { %4753 = vmatprep.subr.bf16.mxu0 %v5483_v1 }
 0x934   :  { %v423_v25 = vpop.f32.mrb[8].mxu0 }
 0x935   :  { %v430_v26 = vrot.slane %v423_v25, 2  ;;  %v4727_v27 = vpop.f32.mrb[9].mxu0 }
 0x936   :  { %v426_v28 = vpop.f32.mrb[10].mxu0 }
 0x937   :  { %v432_v29 = vadd.f32 %v430_v26, %v5664_v11  ;;  %v4728_v30 = vpop.f32.mrb[11].mxu0 }
 0x939   :  { %5195 = vtanh.f32 %v432_v29  ;;  %v4425_v32 = vmul.f32 -1.442695, %v432_v29 }
 0x93b   :  { %5197 = vpow2.f32 %v4425_v32 }
 0x943   :  { %v5196_v31 = vpop.eup %5195 }
 0x944   :  { %445 = vrot.lane.b32.xlu0 %v5196_v31, %s5486_s30 }
 0x945   :  { %v5198_v33 = vpop.eup %5197 }
 0x946   :  { %v436_v34 = vadd.f32 1.0, %v5198_v33 }
 0x948   :  { %5199 = vrcp.f32 %v436_v34 }
 0x952   :  { %v5200_v35 = vpop.eup %5199 }
 0x953   :  { %v443_v39 = vmul.f32 %v5200_v35, %v441_v38 }
 0x9b6   :  { %v446_v36 = vpop.permute.xlu0 %445 }
 0x9b7   :  { %v448_v37 = vmul.f32 %v5200_v35, %v446_v36 }
 0x9b9   :  { %450 = vrot.lane.b32.xlu1 %v448_v37, %s5487_s24 }
 0xa2b   :  { %v451_v40 = vpop.permute.xlu1 %450 }
 0xa2c   :  { %v453_v41 = vadd.f32 %v451_v40, %v443_v39 }
 0xa2e   :  { %5201 = vtanh.f32 %v453_v41  ;;  %v517_v60 = vrot.slane %v453_v41, 6 }
 0xa38   :  { %v5202_v11 = vpop.eup %5201 }
 0xa39   :  { %456 = vrot.lane.b32.xlu0 %v5202_v11, %s5486_s30 }
 0xaab   :  { %v457_v42 = vpop.permute.xlu0 %456 }
 0xaac   :  { %v459_v43 = vmul.f32 %v5200_v35, %v457_v42 }
 0xaae   :  { %v460_v44 = vpack.c.bf16 %v459_v43, %v459_v43  ;;  %v5716_v45 = vsel %vm776_vm5, %v775_v22, %v459_v43 }
 0xab0   :  { %v462_v46 = vrot.slane %v460_v44, 3 }
 0xab2   :  { %463 = vrot.lane.b32.xlu1 %v462_v46, %s5487_s24 }
 0xb24   :  { %v464_v47 = vpop.permute.xlu1 %463 }
 0xb25   :  { %4734 = vmatmul.mubr.msk.bf16.vlgmr.msra.gmra.mrb[8].mxu1 %vm155_vm2, %v464_v47 }
 0xb26   :  { %4746 = vmatpush3.bf16.msra.mxu1 %v5626_v2  ;;  %4749 = vmatprep.mubr.msk.bf16.mxu1 %vm5484_vm0, %v5483_v1 }
 0xb27   :  { %4747 = vmatprep.subr.bf16.mxu1 %v5483_v1 }
 0xb2a   :  { %4748 = vmatpush3.bf16.msra.mxu1 %v5640_v6 }
 0xb2b   :  { %4761 = vmatprep.subr.bf16.mxu1 %v5483_v1 }
 0xbf8   :  { %v502_v48 = vpop.f32.mrb[8].mxu1 }
 0xbf9   :  { %v508_v49 = vadd.f32 %v502_v48, %v5666_v13  ;;  %v4735_v50 = vpop.f32.mrb[9].mxu1 }
 0xbfa   :  { %v505_v51 = vpop.f32.mrb[10].mxu1 }
 0xbfb   :  { %5203 = vtanh.f32 %v508_v49  ;;  %v4736_v52 = vpop.f32.mrb[11].mxu1  ;;  %v4427_v54 = vmul.f32 -1.442695, %v508_v49 }
 0xbfd   :  { %5205 = vpow2.f32 %v4427_v54 }
 0xc05   :  { %v5204_v53 = vpop.eup %5203 }
 0xc06   :  { %521 = vrot.lane.b32.xlu0 %v5204_v53, %s5486_s30 }
 0xc07   :  { %v5206_v55 = vpop.eup %5205 }
 0xc08   :  { %v512_v56 = vadd.f32 1.0, %v5206_v55 }
 0xc0a   :  { %5207 = vrcp.f32 %v512_v56 }
 0xc14   :  { %v5208_v57 = vpop.eup %5207 }
 0xc15   :  { %v519_v61 = vmul.f32 %v5208_v57, %v517_v60 }
 0xc78   :  { %v522_v58 = vpop.permute.xlu0 %521 }
 0xc79   :  { %v524_v59 = vmul.f32 %v5208_v57, %v522_v58 }
 0xc7b   :  { %526 = vrot.lane.b32.xlu1 %v524_v59, %s5487_s24 }
 0xced   :  { %v527_v62 = vpop.permute.xlu1 %526 }
 0xcee   :  { %v529_v63 = vadd.f32 %v527_v62, %v519_v61 }
 0xcf0   :  { %5209 = vtanh.f32 %v529_v63  ;;  %v595_v22 = vrot.slane %v529_v63, 6 }
 0xcfa   :  { %v5210_v0 = vpop.eup %5209 }
 0xcfb   :  { %532 = vrot.lane.b32.xlu0 %v5210_v0, %s5486_s30 }
 0xd6d   :  { %v533_v3 = vpop.permute.xlu0 %532 }
 0xd6e   :  { %v5730_v4 = vmul.f32 %v5208_v57, %v533_v3 }
 0xd70   :  { %v536_v5 = vpack.c.bf16 %v5730_v4, %v5730_v4 }
 0xd72   :  { %538 = vrot.lane.b32.xlu1 %v536_v5, %s5487_s24 }
 0xde4   :  { %v539_v8 = vpop.permute.xlu1 %538 }
 0xde5   :  { %4742 = vmatmul.mubr.msk.bf16.vlgmr.msra.gmra.mrb[12].mxu0 %vm155_vm2, %v539_v8 }
 0xde6   :  { %4754 = vmatpush3.bf16.msra.mxu0 %v5626_v2  ;;  %4757 = vmatprep.mubr.msk.bf16.mxu0 %vm5484_vm0, %v5483_v1 }
 0xde7   :  { %4755 = vmatprep.subr.bf16.mxu0 %v5483_v1 }
 0xdea   :  { %4756 = vmatpush3.bf16.msra.mxu0 %v5640_v6 }
 0xdeb   :  { %4769 = vmatprep.subr.bf16.mxu0 %v5483_v1 }
 0xeb8   :  { %v577_v9 = vpop.f32.mrb[12].mxu0 }
 0xeb9   :  { %v584_v10 = vrot.slane %v577_v9, 6  ;;  %v4743_v12 = vpop.f32.mrb[13].mxu0 }
 0xeba   :  { %v580_v14 = vpop.f32.mrb[14].mxu0 }
 0xebb   :  { %v586_v15 = vadd.f32 %v584_v10, %v5666_v13  ;;  %v4744_v16 = vpop.f32.mrb[15].mxu0 }
 0xebc   :  { %v5770_v16 = vld [vmem:[%s6538_s6] sm:$0xff]  }
 0xebd   :  { %5211 = vtanh.f32 %v586_v15  ;;  %v4429_v2 = vmul.f32 -1.442695, %v586_v15 }
 0xebf   :  { %5213 = vpow2.f32 %v4429_v2  ;;  %v5779_v2 = vld [vmem:[%s6538_s6 + $0x8] sm:$0xff]  }
 0xec7   :  { %v5212_v17 = vpop.eup %5211 }
 0xec8   :  { %599 = vrot.lane.b32.xlu0 %v5212_v17, %s5486_s30  ;;  %v5157_v17 = vld [vmem:[%s6537_s1 + $0x8] sm:$0xff]  }
 0xec9   :  { %v5214_v18 = vpop.eup %5213 }
 0xeca   :  { %v590_v19 = vadd.f32 1.0, %v5214_v18 }
 0xecc   :  { %5215 = vrcp.f32 %v590_v19 }
 0xed6   :  { %v5216_v20 = vpop.eup %5215 }
 0xed7   :  { %v597_v23 = vmul.f32 %v5216_v20, %v595_v22 }
 0xf3a   :  { %v600_v6 = vpop.permute.xlu0 %599 }
 0xf3b   :  { %v602_v21 = vmul.f32 %v5216_v20, %v600_v6 }
 0xf3d   :  { %604 = vrot.lane.b32.xlu1 %v602_v21, %s5487_s24 }
 0xfaf   :  { %v605_v24 = vpop.permute.xlu1 %604 }
 0xfb0   :  { %v607_v25 = vadd.f32 %v605_v24, %v597_v23 }
 0xfb2   :  { %5217 = vtanh.f32 %v607_v25  ;;  %v674_v44 = vrot.slane %v607_v25, 6 }
 0xfbc   :  { %v5218_v26 = vpop.eup %5217 }
 0xfbd   :  { %610 = vrot.lane.b32.xlu0 %v5218_v26, %s5486_s30 }
0x102f   :  { %v611_v27 = vpop.permute.xlu0 %610 }
0x1030   :  { %v613_v28 = vmul.f32 %v5216_v20, %v611_v27 }
0x1032   :  { %v614_v29 = vpack.c.bf16 %v613_v28, %v613_v28  ;;  %v778_v52 = vsel %vm772_vm3, %v5730_v4, %v613_v28 }
0x1034   :  { %v616_v30 = vrot.slane %v614_v29, 1 }
0x1036   :  { %617 = vrot.lane.b32.xlu1 %v616_v30, %s5487_s24 }
0x10a8   :  { %v618_v31 = vpop.permute.xlu1 %617 }
0x10a9   :  { %4750 = vmatmul.mubr.msk.bf16.vlgmr.msra.gmra.mrb[12].mxu1 %vm155_vm2, %v618_v31 }
0x10aa   :  { %4765 = vmatprep.mubr.msk.bf16.mxu1 %vm5484_vm0, %v5483_v1 }
0x117c   :  { %v656_v32 = vpop.f32.mrb[12].mxu1 }
0x117d   :  { %v663_v33 = vrot.slane %v656_v32, 4  ;;  %v4751_v34 = vpop.f32.mrb[13].mxu1 }
0x117e   :  { %v659_v35 = vpop.f32.mrb[14].mxu1 }
0x117f   :  { %v665_v36 = vadd.f32 %v663_v33, %v5666_v13  ;;  %v4752_v37 = vpop.f32.mrb[15].mxu1 }
0x1181   :  { %5219 = vtanh.f32 %v665_v36  ;;  %v4431_v39 = vmul.f32 -1.442695, %v665_v36 }
0x1183   :  { %5221 = vpow2.f32 %v4431_v39 }
0x118b   :  { %v5220_v38 = vpop.eup %5219 }
0x118c   :  { %678 = vrot.lane.b32.xlu0 %v5220_v38, %s5486_s30 }
0x118d   :  { %v5222_v40 = vpop.eup %5221 }
0x118e   :  { %v669_v41 = vadd.f32 1.0, %v5222_v40 }
0x1190   :  { %5223 = vrcp.f32 %v669_v41 }
0x119a   :  { %v5224_v11 = vpop.eup %5223 }
0x119b   :  { %v676_v46 = vmul.f32 %v5224_v11, %v674_v44 }
0x11fe   :  { %v679_v42 = vpop.permute.xlu0 %678 }
0x11ff   :  { %v681_v43 = vmul.f32 %v5224_v11, %v679_v42 }
0x1201   :  { %683 = vrot.lane.b32.xlu1 %v681_v43, %s5487_s24 }
0x1273   :  { %v684_v47 = vpop.permute.xlu1 %683 }
0x1274   :  { %v686_v48 = vadd.f32 %v684_v47, %v676_v46 }
0x1276   :  { %5225 = vtanh.f32 %v686_v48  ;;  %v753_v10 = vrot.slane %v686_v48, 6 }
0x1280   :  { %v5226_v49 = vpop.eup %5225 }
0x1281   :  { %689 = vrot.lane.b32.xlu0 %v5226_v49, %s5486_s30 }
0x12f3   :  { %v690_v50 = vpop.permute.xlu0 %689 }
0x12f4   :  { %v692_v51 = vmul.f32 %v5224_v11, %v690_v50 }
0x12f6   :  { %v693_v53 = vpack.c.bf16 %v692_v51, %v692_v51  ;;  %v779_v54 = vsel %vm774_vm4, %v778_v52, %v692_v51 }
0x12f8   :  { %v695_v55 = vrot.slane %v693_v53, 2 }
0x12fa   :  { %696 = vrot.lane.b32.xlu1 %v695_v55, %s5487_s24 }
0x136c   :  { %v697_v56 = vpop.permute.xlu1 %696 }
0x136d   :  { %4758 = vmatmul.mubr.msk.bf16.vlgmr.msra.gmra.mrb[16].mxu0 %vm155_vm2, %v697_v56 }
0x136e   :  { %4773 = vmatprep.mubr.msk.bf16.mxu0 %vm5484_vm0, %v5483_v1  ;;  %4770 = vmatpush3.bf16.msra.mxu0 %v5770_v16 }
0x136f   :  { %4771 = vmatprep.subr.bf16.mxu0 %v5483_v1 }
0x1372   :  { %4772 = vmatpush3.bf16.msra.mxu0 %v5779_v2 }
0x1373   :  { %4785 = vmatprep.subr.bf16.mxu0 %v5483_v1 }
0x1375   :  { %4774 = vmatmul.mubr.bf16.vlgmr.msra.gmra.mrb[20].mxu0 %v5485_v7 }
0x1376   :  { %4786 = vmatpush3.bf16.msra.mxu0 %v5770_v16  ;;  %4789 = vmatprep.mubr.msk.bf16.mxu0 %vm5484_vm0, %v5483_v1 }
0x1377   :  { %4787 = vmatprep.subr.bf16.mxu0 %v5483_v1 }
0x137a   :  { %4788 = vmatpush3.bf16.msra.mxu0 %v5779_v2 }
0x137b   :  { %4801 = vmatprep.subr.bf16.mxu0 %v5483_v1 }
0x1440   :  { %v735_v57 = vpop.f32.mrb[16].mxu0 }
0x1441   :  { %v742_v58 = vrot.slane %v735_v57, 2  ;;  %v4759_v59 = vpop.f32.mrb[17].mxu0 }
0x1442   :  { %v738_v60 = vpop.f32.mrb[18].mxu0 }
0x1443   :  { %v744_v61 = vadd.f32 %v742_v58, %v5666_v13  ;;  %v4760_v62 = vpop.f32.mrb[19].mxu0  ;;  %v5155_v13 = vld [vmem:[%s6537_s1] sm:$0xff]  }
0x1444   :  { %4762 = vmatpush3.bf16.msra.mxu1 %v5155_v13 }
0x1445   :  { %5227 = vtanh.f32 %v744_v61  ;;  %v4433_v0 = vmul.f32 -1.442695, %v744_v61  ;;  %4763 = vmatprep.subr.bf16.mxu1 %v5483_v1 }
0x1447   :  { %5229 = vpow2.f32 %v4433_v0 }
0x1448   :  { %4764 = vmatpush3.bf16.msra.mxu1 %v5157_v17  ;;  %v902_v22 = vpop.f32.mrb[20].mxu0 }
0x1449   :  { %4777 = vmatprep.subr.bf16.mxu1 %v5483_v1  ;;  %v4775_v23 = vpop.f32.mrb[21].mxu0 }
0x144a   :  { %v905_v24 = vpop.f32.mrb[22].mxu0 }
0x144b   :  { %v4776_v25 = vpop.f32.mrb[23].mxu0 }
0x144f   :  { %v5228_v63 = vpop.eup %5227 }
0x1450   :  { %757 = vrot.lane.b32.xlu0 %v5228_v63, %s5486_s30 }
0x1451   :  { %v5230_v3 = vpop.eup %5229 }
0x1452   :  { %v748_v4 = vadd.f32 1.0, %v5230_v3 }
0x1454   :  { %5231 = vrcp.f32 %v748_v4 }
0x145e   :  { %v5232_v5 = vpop.eup %5231 }
0x145f   :  { %v755_v12 = vmul.f32 %v5232_v5, %v753_v10 }
0x14c2   :  { %v758_v8 = vpop.permute.xlu0 %757 }
0x14c3   :  { %v760_v9 = vmul.f32 %v5232_v5, %v758_v8 }
0x14c5   :  { %762 = vrot.lane.b32.xlu1 %v760_v9, %s5487_s24 }
0x1537   :  { %v763_v14 = vpop.permute.xlu1 %762 }
0x1538   :  { %v765_v15 = vadd.f32 %v763_v14, %v755_v12 }
0x153a   :  { %5233 = vtanh.f32 %v765_v15 }
0x1544   :  { %v5234_v18 = vpop.eup %5233 }
0x1545   :  { %768 = vrot.lane.b32.xlu0 %v5234_v18, %s5486_s30 }
0x15b7   :  { %v769_v19 = vpop.permute.xlu0 %768 }
0x15b8   :  { %v771_v20 = vmul.f32 %v5232_v5, %v769_v19 }
0x15ba   :  { %v780_v6 = vsel %vm776_vm5, %v779_v54, %v771_v20 }
0x15bb   :  { %v790_v21 = vpack.c.bf16 %v780_v6, %v5716_v45  ;;  %v4434_v45 = vld [vmem:[%s6539_s4] ss:$0 sm:$0xff] }
0x15bd   :  { %798 = vrot.lane.b32.xlu1 %v790_v21, %s5487_s24 }
0x162f   :  { %v799_v26 = vpop.permute.xlu1 %798 }
0x1630   :  { %4766 = vmatmul.mubr.msk.bf16.vlgmr.msra.gmra.mrb[16].mxu1 %vm155_vm2, %v799_v26 }
0x1631   :  { %4778 = vmatpush3.bf16.msra.mxu1 %v5770_v16  ;;  %4781 = vmatprep.mubr.msk.bf16.mxu1 %vm5484_vm0, %v5483_v1 }
0x1632   :  { %4779 = vmatprep.subr.bf16.mxu1 %v5483_v1 }
0x1635   :  { %4780 = vmatpush3.bf16.msra.mxu1 %v5779_v2 }
0x1636   :  { %4793 = vmatprep.subr.bf16.mxu1 %v5483_v1 }
0x1703   :  { %v849_v27 = vpop.f32.mrb[16].mxu1 }
0x1704   :  { %v5807_v28 = vadd.f32 %v4434_v45, %v849_v27  ;;  %v4767_v29 = vpop.f32.mrb[17].mxu1 }
0x1705   :  { %v852_v30 = vpop.f32.mrb[18].mxu1 }
0x1706   :  { %v908_v31 = vadd.f32 %v902_v22, %v5807_v28  ;;  %v5810_v32 = vadd.f32 %v4434_v45, %v852_v30  ;;  %v4768_v33 = vpop.f32.mrb[19].mxu1 }
0x1708   :  { %5235 = vtanh.f32 %v908_v31  ;;  %v4440_v35 = vmul.f32 -1.442695, %v908_v31 }
0x170a   :  { %5237 = vpow2.f32 %v4440_v35 }
0x1712   :  { %v5236_v34 = vpop.eup %5235 }
0x1713   :  { %918 = vrot.lane.b32.xlu0 %v5236_v34, %s5486_s30 }
0x1714   :  { %v5238_v36 = vpop.eup %5237 }
0x1715   :  { %v912_v37 = vadd.f32 1.0, %v5238_v36 }
0x1717   :  { %5239 = vrcp.f32 %v912_v37 }
0x1721   :  { %v5240_v38 = vpop.eup %5239 }
0x1722   :  { %v916_v41 = vmul.f32 0.0, %v5240_v38 }
0x1785   :  { %v919_v39 = vpop.permute.xlu0 %918 }
0x1786   :  { %v921_v40 = vmul.f32 %v5240_v38, %v919_v39 }
0x1788   :  { %923 = vrot.lane.b32.xlu1 %v921_v40, %s5487_s24 }
0x17fa   :  { %v924_v11 = vpop.permute.xlu1 %923 }
0x17fb   :  { %v926_v42 = vadd.f32 %v924_v11, %v916_v41 }
0x17fd   :  { %5241 = vtanh.f32 %v926_v42  ;;  %v992_v62 = vrot.slane %v926_v42, 6 }
0x1807   :  { %v5242_v43 = vpop.eup %5241 }
0x1808   :  { %929 = vrot.lane.b32.xlu0 %v5242_v43, %s5486_s30 }
0x187a   :  { %v930_v44 = vpop.permute.xlu0 %929 }
0x187b   :  { %v5815_v46 = vmul.f32 %v5240_v38, %v930_v44 }
0x187d   :  { %v933_v47 = vpack.c.bf16 %v5815_v46, %v5815_v46  ;;  %v2908_v36 = vrot.slane %v5815_v46, 1 }
0x187f   :  { %935 = vrot.lane.b32.xlu1 %v933_v47, %s5487_s24 }
0x18f1   :  { %v936_v48 = vpop.permute.xlu1 %935 }
0x18f2   :  { %4782 = vmatmul.mubr.msk.bf16.vlgmr.msra.gmra.mrb[20].mxu1 %vm155_vm2, %v936_v48 }
0x18f3   :  { %4794 = vmatpush3.bf16.msra.mxu1 %v5770_v16  ;;  %4797 = vmatprep.mubr.msk.bf16.mxu1 %vm5484_vm0, %v5483_v1 }
0x18f4   :  { %4795 = vmatprep.subr.bf16.mxu1 %v5483_v1 }
0x18f7   :  { %4796 = vmatpush3.bf16.msra.mxu1 %v5779_v2 }
0x18f8   :  { %4809 = vmatprep.subr.bf16.mxu1 %v5483_v1 }
0x19c5   :  { %v974_v49 = vpop.f32.mrb[20].mxu1 }
0x19c6   :  { %v981_v50 = vrot.slane %v974_v49, 6  ;;  %v4783_v51 = vpop.f32.mrb[21].mxu1 }
0x19c7   :  { %v977_v52 = vpop.f32.mrb[22].mxu1 }
0x19c8   :  { %v983_v53 = vadd.f32 %v981_v50, %v5807_v28  ;;  %v4784_v54 = vpop.f32.mrb[23].mxu1 }
0x19ca   :  { %5243 = vtanh.f32 %v983_v53  ;;  %v4442_v56 = vmul.f32 -1.442695, %v983_v53 }
0x19cc   :  { %5245 = vpow2.f32 %v4442_v56 }
0x19d4   :  { %v5244_v55 = vpop.eup %5243 }
0x19d5   :  { %996 = vrot.lane.b32.xlu0 %v5244_v55, %s5486_s30 }
0x19d6   :  { %v5246_v57 = vpop.eup %5245 }
0x19d7   :  { %v987_v58 = vadd.f32 1.0, %v5246_v57 }
0x19d9   :  { %5247 = vrcp.f32 %v987_v58 }
0x19e3   :  { %v5248_v59 = vpop.eup %5247 }
0x19e4   :  { %v994_v63 = vmul.f32 %v5248_v59, %v992_v62 }
0x1a47   :  { %v997_v60 = vpop.permute.xlu0 %996 }
0x1a48   :  { %v999_v61 = vmul.f32 %v5248_v59, %v997_v60 }
0x1a4a   :  { %1001 = vrot.lane.b32.xlu1 %v999_v61, %s5487_s24 }
0x1abc   :  { %v1002_v0 = vpop.permute.xlu1 %1001 }
0x1abd   :  { %v1004_v3 = vadd.f32 %v1002_v0, %v994_v63 }
0x1abf   :  { %5249 = vtanh.f32 %v1004_v3  ;;  %v1071_v26 = vrot.slane %v1004_v3, 6 }
0x1ac9   :  { %v5250_v4 = vpop.eup %5249 }
0x1aca   :  { %1007 = vrot.lane.b32.xlu0 %v5250_v4, %s5486_s30 }
0x1b3c   :  { %v1008_v5 = vpop.permute.xlu0 %1007 }
0x1b3d   :  { %v1010_v8 = vmul.f32 %v5248_v59, %v1008_v5 }
0x1b3f   :  { %v1011_v9 = vpack.c.bf16 %v1010_v8, %v1010_v8  ;;  %v2887_v31 = vrot.slane %v1010_v8, 1  ;;  %v2910_v33 = vrot.slane %v1010_v8, 2 }
0x1b41   :  { %v1013_v10 = vrot.slane %v1011_v9, 1  ;;  %v2923_v40 = vsel %vm2922_vm6, %v5815_v46, %v2887_v31  ;;  %v2933_v41 = vsel %vm2922_vm6, %v2908_v36, %v2910_v33 }
0x1b43   :  { %1014 = vrot.lane.b32.xlu1 %v1013_v10, %s5487_s24 }
0x1bb5   :  { %v1015_v12 = vpop.permute.xlu1 %1014 }
0x1bb6   :  { %4790 = vmatmul.mubr.msk.bf16.vlgmr.msra.gmra.mrb[24].mxu0 %vm155_vm2, %v1015_v12 }
0x1bb7   :  { %4802 = vmatpush3.bf16.msra.mxu0 %v5770_v16  ;;  %4805 = vmatprep.mubr.msk.bf16.mxu0 %vm5484_vm0, %v5483_v1 }
0x1bb8   :  { %4803 = vmatprep.subr.bf16.mxu0 %v5483_v1 }
0x1bbb   :  { %4804 = vmatpush3.bf16.msra.mxu0 %v5779_v2 }
0x1bbc   :  { %4817 = vmatprep.subr.bf16.mxu0 %v5483_v1 }
0x1c89   :  { %v1053_v14 = vpop.f32.mrb[24].mxu0 }
0x1c8a   :  { %v1060_v15 = vrot.slane %v1053_v14, 4  ;;  %v4791_v13 = vpop.f32.mrb[25].mxu0 }
0x1c8b   :  { %v1056_v17 = vpop.f32.mrb[26].mxu0 }
0x1c8c   :  { %v1062_v18 = vadd.f32 %v1060_v15, %v5807_v28  ;;  %v4792_v19 = vpop.f32.mrb[27].mxu0 }
0x1c8e   :  { %5251 = vtanh.f32 %v1062_v18  ;;  %v4444_v6 = vmul.f32 -1.442695, %v1062_v18 }
0x1c90   :  { %5253 = vpow2.f32 %v4444_v6 }
0x1c98   :  { %v5252_v20 = vpop.eup %5251 }
0x1c99   :  { %1075 = vrot.lane.b32.xlu0 %v5252_v20, %s5486_s30 }
0x1c9a   :  { %v5254_v21 = vpop.eup %5253 }
0x1c9b   :  { %v1066_v22 = vadd.f32 1.0, %v5254_v21 }
0x1c9d   :  { %5255 = vrcp.f32 %v1066_v22 }
0x1ca7   :  { %v5256_v23 = vpop.eup %5255 }
0x1ca8   :  { %v1073_v45 = vmul.f32 %v5256_v23, %v1071_v26 }
0x1d0b   :  { %v1076_v24 = vpop.permute.xlu0 %1075 }
0x1d0c   :  { %v1078_v25 = vmul.f32 %v5256_v23, %v1076_v24 }
0x1d0e   :  { %1080 = vrot.lane.b32.xlu1 %v1078_v25, %s5487_s24 }
0x1d80   :  { %v1081_v27 = vpop.permute.xlu1 %1080 }
0x1d81   :  { %v1083_v29 = vadd.f32 %v1081_v27, %v1073_v45 }
0x1d83   :  { %5257 = vtanh.f32 %v1083_v29  ;;  %v1150_v59 = vrot.slane %v1083_v29, 6 }
0x1d8d   :  { %v5258_v30 = vpop.eup %5257 }
0x1d8e   :  { %1086 = vrot.lane.b32.xlu0 %v5258_v30, %s5486_s30 }
0x1e00   :  { %v1087_v34 = vpop.permute.xlu0 %1086 }
0x1e01   :  { %v1089_v35 = vmul.f32 %v5256_v23, %v1087_v34 }
0x1e03   :  { %v2890_v37 = vrot.slane %v1089_v35, 2  ;;  %v2912_v38 = vrot.slane %v1089_v35, 3  ;;  %v1090_v39 = vpack.c.bf16 %v1089_v35, %v1089_v35 }
0x1e05   :  { %v2924_v11 = vsel %vm772_vm3, %v2923_v40, %v2890_v37  ;;  %v2934_v42 = vsel %vm772_vm3, %v2933_v41, %v2912_v38  ;;  %v1092_v43 = vrot.slane %v1090_v39, 2 }
0x1e07   :  { %1093 = vrot.lane.b32.xlu1 %v1092_v43, %s5487_s24 }
0x1e79   :  { %v1094_v44 = vpop.permute.xlu1 %1093 }
0x1e7a   :  { %4798 = vmatmul.mubr.msk.bf16.vlgmr.msra.gmra.mrb[24].mxu1 %vm155_vm2, %v1094_v44 }
0x1e7b   :  { %4810 = vmatpush3.bf16.msra.mxu1 %v5770_v16  ;;  %4813 = vmatprep.mubr.msk.bf16.mxu1 %vm5484_vm0, %v5483_v1 }
0x1e7c   :  { %4811 = vmatprep.subr.bf16.mxu1 %v5483_v1 }
0x1e7f   :  { %4812 = vmatpush3.bf16.msra.mxu1 %v5779_v2 }
0x1e80   :  { %4825 = vmatprep.subr.bf16.mxu1 %v5483_v1 }
0x1f4d   :  { %v1132_v46 = vpop.f32.mrb[24].mxu1 }
0x1f4e   :  { %v1139_v47 = vrot.slane %v1132_v46, 2  ;;  %v4799_v48 = vpop.f32.mrb[25].mxu1 }
0x1f4f   :  { %v1135_v49 = vpop.f32.mrb[26].mxu1 }
0x1f50   :  { %v1141_v50 = vadd.f32 %v1139_v47, %v5807_v28  ;;  %v4800_v51 = vpop.f32.mrb[27].mxu1 }
0x1f52   :  { %5259 = vtanh.f32 %v1141_v50  ;;  %v4446_v53 = vmul.f32 -1.442695, %v1141_v50 }
0x1f54   :  { %5261 = vpow2.f32 %v4446_v53 }
0x1f5c   :  { %v5260_v52 = vpop.eup %5259 }
0x1f5d   :  { %1154 = vrot.lane.b32.xlu0 %v5260_v52, %s5486_s30 }
0x1f5e   :  { %v5262_v54 = vpop.eup %5261 }
0x1f5f   :  { %v1145_v55 = vadd.f32 1.0, %v5262_v54 }
0x1f61   :  { %5263 = vrcp.f32 %v1145_v55 }
0x1f6b   :  { %v5264_v56 = vpop.eup %5263 }
0x1f6c   :  { %v1152_v60 = vmul.f32 %v5264_v56, %v1150_v59 }
0x1fcf   :  { %v1155_v57 = vpop.permute.xlu0 %1154 }
0x1fd0   :  { %v1157_v58 = vmul.f32 %v5264_v56, %v1155_v57 }
0x1fd2   :  { %1159 = vrot.lane.b32.xlu1 %v1157_v58, %s5487_s24 }
0x2044   :  { %v1160_v61 = vpop.permute.xlu1 %1159 }
0x2045   :  { %v1162_v62 = vadd.f32 %v1160_v61, %v1152_v60 }
0x2047   :  { %5265 = vtanh.f32 %v1162_v62  ;;  %v1226_v25 = vrot.slane %v1162_v62, 6 }
0x2051   :  { %v5266_v28 = vpop.eup %5265 }
0x2052   :  { %1165 = vrot.lane.b32.xlu0 %v5266_v28, %s5486_s30 }
0x20c4   :  { %v1166_v63 = vpop.permute.xlu0 %1165 }
0x20c5   :  { %v1168_v0 = vmul.f32 %v5264_v56, %v1166_v63 }
0x20c7   :  { %v2893_v3 = vrot.slane %v1168_v0, 3  ;;  %v2914_v4 = vrot.slane %v1168_v0, 4  ;;  %v1169_v5 = vpack.c.bf16 %v1168_v0, %v1168_v0 }
0x20c9   :  { %v2926_v8 = vsel %vm2925_vm7, %v2924_v11, %v2893_v3  ;;  %v2935_v9 = vsel %vm2925_vm7, %v2934_v42, %v2914_v4  ;;  %v1171_v10 = vrot.slane %v1169_v5, 3 }
0x20cb   :  { %1172 = vrot.lane.b32.xlu1 %v1171_v10, %s5487_s24 }
0x213d   :  { %v1173_v12 = vpop.permute.xlu1 %1172 }
0x213e   :  { %4806 = vmatmul.mubr.msk.bf16.vlgmr.msra.gmra.mrb[28].mxu0 %vm155_vm2, %v1173_v12 }
0x213f   :  { %4818 = vmatpush3.bf16.msra.mxu0 %v5770_v16  ;;  %4821 = vmatprep.mubr.msk.bf16.mxu0 %vm5484_vm0, %v5483_v1 }
0x2140   :  { %4819 = vmatprep.subr.bf16.mxu0 %v5483_v1 }
0x2143   :  { %4820 = vmatpush3.bf16.msra.mxu0 %v5779_v2 }
0x2144   :  { %4833 = vmatprep.subr.bf16.mxu0 %v5483_v1 }
0x2211   :  { %v1211_v14 = vpop.f32.mrb[28].mxu0 }
0x2212   :  { %v1217_v15 = vadd.f32 %v1211_v14, %v5810_v32  ;;  %v4807_v13 = vpop.f32.mrb[29].mxu0 }
0x2213   :  { %v1214_v17 = vpop.f32.mrb[30].mxu0 }
0x2214   :  { %5267 = vtanh.f32 %v1217_v15  ;;  %v4808_v18 = vpop.f32.mrb[31].mxu0  ;;  %v4448_v20 = vmul.f32 -1.442695, %v1217_v15 }
0x2216   :  { %5269 = vpow2.f32 %v4448_v20 }
0x221e   :  { %v5268_v19 = vpop.eup %5267 }
0x221f   :  { %1230 = vrot.lane.b32.xlu0 %v5268_v19, %s5486_s30 }
0x2220   :  { %v5270_v6 = vpop.eup %5269 }
0x2221   :  { %v1221_v21 = vadd.f32 1.0, %v5270_v6 }
0x2223   :  { %5271 = vrcp.f32 %v1221_v21  ;;  %v5159_v21 = vld [vmem:[%s6504_s8] sm:$0xff]  }
0x222d   :  { %v5272_v22 = vpop.eup %5271 }
0x222e   :  { %v1228_v26 = vmul.f32 %v5272_v22, %v1226_v25  ;;  %v1482_v25 = vld [vmem:[%s6540_s27 + $0x8] sm:$0xff] }
0x2291   :  { %v1231_v23 = vpop.permute.xlu0 %1230 }
0x2292   :  { %v1233_v24 = vmul.f32 %v5272_v22, %v1231_v23  ;;  %v5160_v23 = vld [vmem:[%s6504_s8 + $0x8] sm:$0xff]   ;;  %s5488_s8 = smov 120  }
0x2294   :  { %1235 = vrot.lane.b32.xlu1 %v1233_v24, %s5487_s24  ;;  %v1481_v24 = vld [vmem:[%s6540_s27] sm:$0xff] }
0x2306   :  { %v1236_v45 = vpop.permute.xlu1 %1235 }
0x2307   :  { %v1238_v27 = vadd.f32 %v1236_v45, %v1228_v26  ;;  %v1492_v26 = vpack.c.bf16 %v1482_v25, %v1481_v24  ;;  %v5919_v45 = vld [vmem:[%s6505_s9] sm:$0xff]  }
0x2309   :  { %5273 = vtanh.f32 %v1238_v27  ;;  %v1304_v50 = vrot.slane %v1238_v27, 6 }
0x2313   :  { %v5274_v29 = vpop.eup %5273 }
0x2314   :  { %1241 = vrot.lane.b32.xlu0 %v5274_v29, %s5486_s30  ;;  %v5929_v29 = vld [vmem:[%s6505_s9 + $0x8] sm:$0xff]  }
0x2386   :  { %v1242_v30 = vpop.permute.xlu0 %1241 }
0x2387   :  { %v1244_v31 = vmul.f32 %v5272_v22, %v1242_v30 }
0x2389   :  { %v2896_v33 = vrot.slane %v1244_v31, 4  ;;  %v2916_v34 = vrot.slane %v1244_v31, 5  ;;  %v1245_v35 = vpack.c.bf16 %v1244_v31, %v1244_v31 }
0x238b   :  { %v2927_v36 = vsel %vm774_vm4, %v2926_v8, %v2896_v33  ;;  %v2936_v37 = vsel %vm774_vm4, %v2935_v9, %v2916_v34  ;;  %1247 = vrot.lane.b32.xlu1 %v1245_v35, %s5487_s24 }
0x23fd   :  { %v1248_v38 = vpop.permute.xlu1 %1247 }
0x23fe   :  { %4814 = vmatmul.mubr.msk.bf16.vlgmr.msra.gmra.mrb[28].mxu1 %vm155_vm2, %v1248_v38 }
0x23ff   :  { %4826 = vmatpush3.bf16.msra.mxu1 %v5770_v16  ;;  %4829 = vmatprep.mubr.msk.bf16.mxu1 %vm5484_vm0, %v5483_v1 }
0x2400   :  { %4827 = vmatprep.subr.bf16.mxu1 %v5483_v1 }
0x2403   :  { %4828 = vmatpush3.bf16.msra.mxu1 %v5779_v2 }
0x2404   :  { %4841 = vmatprep.subr.bf16.mxu1 %v5483_v1 }
0x24d1   :  { %v1286_v39 = vpop.f32.mrb[28].mxu1 }
0x24d2   :  { %v1293_v40 = vrot.slane %v1286_v39, 6  ;;  %v4815_v41 = vpop.f32.mrb[29].mxu1 }
0x24d3   :  { %v1289_v11 = vpop.f32.mrb[30].mxu1 }
0x24d4   :  { %v1295_v42 = vadd.f32 %v1293_v40, %v5810_v32  ;;  %v4816_v43 = vpop.f32.mrb[31].mxu1  ;;  %v4455_v11 = vld [vmem:[%s6506_s10] ss:$0 sm:$0xff]  ;;  %s5491_s10 = smov 88  }
0x24d6   :  { %5275 = vtanh.f32 %v1295_v42  ;;  %v4450_v16 = vmul.f32 -1.442695, %v1295_v42 }
0x24d8   :  { %5277 = vpow2.f32 %v4450_v16 }
0x24e0   :  { %v5276_v44 = vpop.eup %5275 }
0x24e1   :  { %1308 = vrot.lane.b32.xlu0 %v5276_v44, %s5486_s30 }
0x24e2   :  { %v5278_v46 = vpop.eup %5277 }
0x24e3   :  { %v1299_v47 = vadd.f32 1.0, %v5278_v46 }
0x24e5   :  { %5279 = vrcp.f32 %v1299_v47 }
0x24ef   :  { %v5280_v48 = vpop.eup %5279 }
0x24f0   :  { %v1306_v51 = vmul.f32 %v5280_v48, %v1304_v50 }
0x2553   :  { %v1309_v2 = vpop.permute.xlu0 %1308 }
0x2554   :  { %v1311_v49 = vmul.f32 %v5280_v48, %v1309_v2 }
0x2556   :  { %1313 = vrot.lane.b32.xlu1 %v1311_v49, %s5487_s24 }
0x25c8   :  { %v1314_v52 = vpop.permute.xlu1 %1313 }
0x25c9   :  { %v1316_v53 = vadd.f32 %v1314_v52, %v1306_v51 }
0x25cb   :  { %5281 = vtanh.f32 %v1316_v53  ;;  %v1383_v18 = vrot.slane %v1316_v53, 6 }
0x25d5   :  { %v5282_v54 = vpop.eup %5281 }
0x25d6   :  { %1319 = vrot.lane.b32.xlu0 %v5282_v54, %s5486_s30 }
0x2648   :  { %v1320_v55 = vpop.permute.xlu0 %1319 }
0x2649   :  { %v1322_v56 = vmul.f32 %v5280_v48, %v1320_v55 }
0x264b   :  { %v2899_v57 = vrot.slane %v1322_v56, 5  ;;  %v2918_v58 = vrot.slane %v1322_v56, 6  ;;  %v1323_v59 = vpack.c.bf16 %v1322_v56, %v1322_v56 }
0x264d   :  { %v2929_v60 = vsel %vm2928_vm8, %v2927_v36, %v2899_v57  ;;  %v1325_v61 = vrot.slane %v1323_v59, 1  ;;  %v2937_v62 = vsel %vm2928_vm8, %v2936_v37, %v2918_v58 }
0x264f   :  { %1326 = vrot.lane.b32.xlu1 %v1325_v61, %s5487_s24 }
0x26c1   :  { %v1327_v28 = vpop.permute.xlu1 %1326 }
0x26c2   :  { %4822 = vmatmul.mubr.msk.bf16.vlgmr.msra.gmra.mrb[32].mxu0 %vm155_vm2, %v1327_v28 }
0x26c3   :  { %4837 = vmatprep.mubr.msk.bf16.mxu0 %vm5484_vm0, %v5483_v1  ;;  %4834 = vmatpush3.bf16.msra.mxu0 %v5159_v21 }
0x26c4   :  { %4835 = vmatprep.subr.bf16.mxu0 %v5483_v1 }
0x26c7   :  { %4836 = vmatpush3.bf16.msra.mxu0 %v5160_v23 }
0x26c8   :  { %4849 = vmatprep.subr.bf16.mxu0 %v5483_v1 }
0x26ca   :  { %4838 = vmatmul.mubr.msk.bf16.vlgmr.msra.gmra.mrb[36].mxu0 %vm155_vm2, %v1492_v26 }
0x26cb   :  { %4850 = vmatpush3.bf16.msra.mxu0 %v5919_v45  ;;  %4853 = vmatprep.mubr.msk.bf16.mxu0 %vm5484_vm0, %v5483_v1 }
0x26cc   :  { %4851 = vmatprep.subr.bf16.mxu0 %v5483_v1 }
0x26cf   :  { %4852 = vmatpush3.bf16.msra.mxu0 %v5929_v29 }
0x26d0   :  { %4865 = vmatprep.subr.bf16.mxu0 %v5483_v1 }
0x2795   :  { %v1365_v63 = vpop.f32.mrb[32].mxu0 }
0x2796   :  { %v1372_v0 = vrot.slane %v1365_v63, 4  ;;  %v4823_v3 = vpop.f32.mrb[33].mxu0 }
0x2797   :  { %v1368_v4 = vpop.f32.mrb[34].mxu0 }
0x2798   :  { %v1374_v5 = vadd.f32 %v1372_v0, %v5810_v32  ;;  %v4824_v8 = vpop.f32.mrb[35].mxu0 }
0x279a   :  { %5283 = vtanh.f32 %v1374_v5  ;;  %v4452_v10 = vmul.f32 -1.442695, %v1374_v5 }
0x279c   :  { %5285 = vpow2.f32 %v4452_v10 }
0x279d   :  { %v1548_v39 = vpop.f32.mrb[36].mxu0 }
0x279e   :  { %v4839_v40 = vpop.f32.mrb[37].mxu0  ;;  %v5961_v48 = vadd.f32 %v4455_v11, %v1548_v39 }
0x279f   :  { %v1551_v41 = vpop.f32.mrb[38].mxu0 }
0x27a0   :  { %v4840_v42 = vpop.f32.mrb[39].mxu0  ;;  %v5957_v43 = vadd.f32 %v4455_v11, %v1551_v41 }
0x27a4   :  { %v5284_v9 = vpop.eup %5283 }
0x27a5   :  { %1387 = vrot.lane.b32.xlu0 %v5284_v9, %s5486_s30 }
0x27a6   :  { %v5286_v12 = vpop.eup %5285 }
0x27a7   :  { %v1378_v14 = vadd.f32 1.0, %v5286_v12 }
0x27a9   :  { %5287 = vrcp.f32 %v1378_v14 }
0x27b3   :  { %v5288_v15 = vpop.eup %5287 }
0x27b4   :  { %v1385_v19 = vmul.f32 %v5288_v15, %v1383_v18 }
0x2817   :  { %v1388_v13 = vpop.permute.xlu0 %1387 }
0x2818   :  { %v1390_v17 = vmul.f32 %v5288_v15, %v1388_v13 }
0x281a   :  { %1392 = vrot.lane.b32.xlu1 %v1390_v17, %s5487_s24 }
0x288c   :  { %v1393_v20 = vpop.permute.xlu1 %1392 }
0x288d   :  { %v5898_v6 = vadd.f32 %v1393_v20, %v1385_v19 }
0x288f   :  { %5289 = vtanh.f32 %v5898_v6 }
0x2899   :  { %v5290_v22 = vpop.eup %5289 }
0x289a   :  { %1398 = vrot.lane.b32.xlu0 %v5290_v22, %s5486_s30 }
0x290c   :  { %v1399_v27 = vpop.permute.xlu0 %1398 }
0x290d   :  { %v1401_v30 = vmul.f32 %v5288_v15, %v1399_v27 }
0x290f   :  { %v2902_v31 = vrot.slane %v1401_v30, 6  ;;  %v2920_v33 = vrot.slane %v1401_v30, 7  ;;  %v1402_v34 = vpack.c.bf16 %v1401_v30, %v1401_v30 }
0x2911   :  { %v1404_v35 = vrot.slane %v1402_v34, 2  ;;  %v5934_v36 = vsel %vm776_vm5, %v2929_v60, %v2902_v31  ;;  %v5937_v37 = vsel %vm776_vm5, %v2937_v62, %v2920_v33 }
0x2913   :  { %1405 = vrot.lane.b32.xlu1 %v1404_v35, %s5487_s24 }
0x2985   :  { %v1406_v38 = vpop.permute.xlu1 %1405 }
0x2986   :  { %4830 = vmatmul.mubr.msk.bf16.vlgmr.msra.gmra.mrb[32].mxu1 %vm155_vm2, %v1406_v38 }
0x2987   :  { %4842 = vmatpush3.bf16.msra.mxu1 %v5919_v45  ;;  %4845 = vmatprep.mubr.msk.bf16.mxu1 %vm5484_vm0, %v5483_v1 }
0x2988   :  { %4843 = vmatprep.subr.bf16.mxu1 %v5483_v1 }
0x298b   :  { %4844 = vmatpush3.bf16.msra.mxu1 %v5929_v29 }
0x298c   :  { %4857 = vmatprep.subr.bf16.mxu1 %v5483_v1 }
0x298e   :  { %4846 = vmatmul.mubr.bf16.vlgmr.msra.gmra.mrb[36].mxu1 %v5485_v7 }
0x298f   :  { %4858 = vmatpush3.bf16.msra.mxu1 %v5919_v45  ;;  %4861 = vmatprep.mubr.msk.bf16.mxu1 %vm5484_vm0, %v5483_v1 }
0x2990   :  { %4859 = vmatprep.subr.bf16.mxu1 %v5483_v1 }
0x2993   :  { %4860 = vmatpush3.bf16.msra.mxu1 %v5929_v29 }
0x2994   :  { %4873 = vmatprep.subr.bf16.mxu1 %v5483_v1 }
0x2a59   :  { %v5959_v44 = vpop.f32.mrb[32].mxu1 }
0x2a5a   :  { %v4831_v16 = vpop.f32.mrb[33].mxu1 }
0x2a5b   :  { %v1447_v46 = vpop.f32.mrb[34].mxu1 }
0x2a5c   :  { %v4832_v47 = vpop.f32.mrb[35].mxu1 }
0x2a61   :  { %v1601_v2 = vpop.f32.mrb[36].mxu1 }
0x2a62   :  { %v1607_v49 = vadd.f32 %v1601_v2, %v5961_v48  ;;  %v4847_v50 = vpop.f32.mrb[37].mxu1 }
0x2a63   :  { %v1604_v51 = vpop.f32.mrb[38].mxu1 }
0x2a64   :  { %5291 = vtanh.f32 %v1607_v49  ;;  %v4848_v52 = vpop.f32.mrb[39].mxu1  ;;  %v4461_v54 = vmul.f32 -1.442695, %v1607_v49 }
0x2a66   :  { %5293 = vpow2.f32 %v4461_v54 }
0x2a6e   :  { %v5292_v53 = vpop.eup %5291 }
0x2a6f   :  { %1617 = vrot.lane.b32.xlu0 %v5292_v53, %s5486_s30 }
0x2a70   :  { %v5294_v55 = vpop.eup %5293 }
0x2a71   :  { %v1611_v56 = vadd.f32 1.0, %v5294_v55 }
0x2a73   :  { %5295 = vrcp.f32 %v1611_v56 }
0x2a7d   :  { %v5296_v57 = vpop.eup %5295 }
0x2a7e   :  { %v1615_v60 = vmul.f32 0.0, %v5296_v57 }
0x2ae1   :  { %v1618_v58 = vpop.permute.xlu0 %1617 }
0x2ae2   :  { %v1620_v59 = vmul.f32 %v5296_v57, %v1618_v58 }
0x2ae4   :  { %1622 = vrot.lane.b32.xlu1 %v1620_v59, %s5487_s24 }
0x2b56   :  { %v1623_v61 = vpop.permute.xlu1 %1622 }
0x2b57   :  { %v1625_v62 = vadd.f32 %v1623_v61, %v1615_v60 }
0x2b59   :  { %5297 = vtanh.f32 %v1625_v62  ;;  %v1691_v22 = vrot.slane %v1625_v62, 6 }
0x2b63   :  { %v5298_v28 = vpop.eup %5297 }
0x2b64   :  { %1628 = vrot.lane.b32.xlu0 %v5298_v28, %s5486_s30 }
0x2bd6   :  { %v1629_v63 = vpop.permute.xlu0 %1628 }
0x2bd7   :  { %v5967_v0 = vmul.f32 %v5296_v57, %v1629_v63 }
0x2bd9   :  { %v1632_v3 = vpack.c.bf16 %v5967_v0, %v5967_v0 }
0x2bdb   :  { %1634 = vrot.lane.b32.xlu1 %v1632_v3, %s5487_s24 }
0x2c4d   :  { %v1635_v4 = vpop.permute.xlu1 %1634 }
0x2c4e   :  { %4854 = vmatmul.mubr.msk.bf16.vlgmr.msra.gmra.mrb[40].mxu0 %vm155_vm2, %v1635_v4 }
0x2c4f   :  { %4866 = vmatpush3.bf16.msra.mxu0 %v5919_v45  ;;  %4869 = vmatprep.mubr.msk.bf16.mxu0 %vm5484_vm0, %v5483_v1 }
0x2c50   :  { %4867 = vmatprep.subr.bf16.mxu0 %v5483_v1 }
0x2c53   :  { %4868 = vmatpush3.bf16.msra.mxu0 %v5929_v29 }
0x2c54   :  { %4881 = vmatprep.subr.bf16.mxu0 %v5483_v1 }
0x2d21   :  { %v1673_v5 = vpop.f32.mrb[40].mxu0 }
0x2d22   :  { %v1680_v8 = vrot.slane %v1673_v5, 6  ;;  %v4855_v9 = vpop.f32.mrb[41].mxu0 }
0x2d23   :  { %v1676_v10 = vpop.f32.mrb[42].mxu0 }
0x2d24   :  { %v1682_v12 = vadd.f32 %v1680_v8, %v5961_v48  ;;  %v4856_v14 = vpop.f32.mrb[43].mxu0 }
0x2d26   :  { %5299 = vtanh.f32 %v1682_v12  ;;  %v4463_v13 = vmul.f32 -1.442695, %v1682_v12 }
0x2d28   :  { %5301 = vpow2.f32 %v4463_v13 }
0x2d30   :  { %v5300_v15 = vpop.eup %5299 }
0x2d31   :  { %1695 = vrot.lane.b32.xlu0 %v5300_v15, %s5486_s30 }
0x2d32   :  { %v5302_v17 = vpop.eup %5301 }
0x2d33   :  { %v1686_v18 = vadd.f32 1.0, %v5302_v17 }
0x2d35   :  { %5303 = vrcp.f32 %v1686_v18 }
0x2d3f   :  { %v5304_v19 = vpop.eup %5303 }
0x2d40   :  { %v1693_v23 = vmul.f32 %v5304_v19, %v1691_v22 }
0x2da3   :  { %v1696_v20 = vpop.permute.xlu0 %1695 }
0x2da4   :  { %v1698_v21 = vmul.f32 %v5304_v19, %v1696_v20 }
0x2da6   :  { %1700 = vrot.lane.b32.xlu1 %v1698_v21, %s5487_s24 }
0x2e18   :  { %v1701_v24 = vpop.permute.xlu1 %1700 }
0x2e19   :  { %v1703_v25 = vadd.f32 %v1701_v24, %v1693_v23 }
0x2e1b   :  { %5305 = vtanh.f32 %v1703_v25  ;;  %v1770_v51 = vrot.slane %v1703_v25, 6 }
0x2e25   :  { %v5306_v26 = vpop.eup %5305 }
0x2e26   :  { %1706 = vrot.lane.b32.xlu0 %v5306_v26, %s5486_s30 }
0x2e98   :  { %v1707_v27 = vpop.permute.xlu0 %1706 }
0x2e99   :  { %v1709_v30 = vmul.f32 %v5304_v19, %v1707_v27 }
0x2e9b   :  { %v1710_v31 = vpack.c.bf16 %v1709_v30, %v1709_v30  ;;  %v2180_v58 = vsel %vm772_vm3, %v5967_v0, %v1709_v30 }
0x2e9d   :  { %v1712_v33 = vrot.slane %v1710_v31, 1 }
0x2e9f   :  { %1713 = vrot.lane.b32.xlu1 %v1712_v33, %s5487_s24 }
0x2f11   :  { %v1714_v34 = vpop.permute.xlu1 %1713 }
0x2f12   :  { %4862 = vmatmul.mubr.msk.bf16.vlgmr.msra.gmra.mrb[40].mxu1 %vm155_vm2, %v1714_v34 }
0x2f13   :  { %4874 = vmatpush3.bf16.msra.mxu1 %v5919_v45  ;;  %4877 = vmatprep.mubr.msk.bf16.mxu1 %vm5484_vm0, %v5483_v1 }
0x2f14   :  { %4875 = vmatprep.subr.bf16.mxu1 %v5483_v1 }
0x2f17   :  { %4876 = vmatpush3.bf16.msra.mxu1 %v5929_v29 }
0x2f18   :  { %4889 = vmatprep.subr.bf16.mxu1 %v5483_v1 }
0x2fe5   :  { %v1752_v35 = vpop.f32.mrb[40].mxu1 }
0x2fe6   :  { %v1759_v38 = vrot.slane %v1752_v35, 4  ;;  %v4863_v39 = vpop.f32.mrb[41].mxu1 }
0x2fe7   :  { %v1755_v40 = vpop.f32.mrb[42].mxu1 }
0x2fe8   :  { %v1761_v41 = vadd.f32 %v1759_v38, %v5961_v48  ;;  %v4864_v11 = vpop.f32.mrb[43].mxu1 }
0x2fea   :  { %5307 = vtanh.f32 %v1761_v41  ;;  %v4465_v16 = vmul.f32 -1.442695, %v1761_v41 }
0x2fec   :  { %5309 = vpow2.f32 %v4465_v16 }
0x2ff4   :  { %v5308_v42 = vpop.eup %5307 }
0x2ff5   :  { %1774 = vrot.lane.b32.xlu0 %v5308_v42, %s5486_s30 }
0x2ff6   :  { %v5310_v46 = vpop.eup %5309 }
0x2ff7   :  { %v1765_v47 = vadd.f32 1.0, %v5310_v46 }
0x2ff9   :  { %5311 = vrcp.f32 %v1765_v47 }
0x3003   :  { %v5312_v2 = vpop.eup %5311 }
0x3004   :  { %v1772_v52 = vmul.f32 %v5312_v2, %v1770_v51 }
0x3067   :  { %v1775_v49 = vpop.permute.xlu0 %1774 }
0x3068   :  { %v1777_v50 = vmul.f32 %v5312_v2, %v1775_v49 }
0x306a   :  { %1779 = vrot.lane.b32.xlu1 %v1777_v50, %s5487_s24 }
0x30dc   :  { %v1780_v53 = vpop.permute.xlu1 %1779 }
0x30dd   :  { %v1782_v54 = vadd.f32 %v1780_v53, %v1772_v52 }
0x30df   :  { %5313 = vtanh.f32 %v1782_v54  ;;  %v1849_v17 = vrot.slane %v1782_v54, 6 }
0x30e9   :  { %v5314_v55 = vpop.eup %5313 }
0x30ea   :  { %1785 = vrot.lane.b32.xlu0 %v5314_v55, %s5486_s30 }
0x315c   :  { %v1786_v56 = vpop.permute.xlu0 %1785 }
0x315d   :  { %v1788_v57 = vmul.f32 %v5312_v2, %v1786_v56 }
0x315f   :  { %v1789_v59 = vpack.c.bf16 %v1788_v57, %v1788_v57  ;;  %v2181_v60 = vsel %vm774_vm4, %v2180_v58, %v1788_v57 }
0x3161   :  { %v1791_v61 = vrot.slane %v1789_v59, 2 }
0x3163   :  { %1792 = vrot.lane.b32.xlu1 %v1791_v61, %s5487_s24 }
0x31d5   :  { %v1793_v62 = vpop.permute.xlu1 %1792 }
0x31d6   :  { %4870 = vmatmul.mubr.msk.bf16.vlgmr.msra.gmra.mrb[44].mxu0 %vm155_vm2, %v1793_v62 }
0x31d7   :  { %4882 = vmatpush3.bf16.msra.mxu0 %v5919_v45  ;;  %4885 = vmatprep.mubr.msk.bf16.mxu0 %vm5484_vm0, %v5483_v1 }
0x31d8   :  { %4883 = vmatprep.subr.bf16.mxu0 %v5483_v1 }
0x31db   :  { %4884 = vmatpush3.bf16.msra.mxu0 %v5929_v29 }
0x31dc   :  { %4897 = vmatprep.subr.bf16.mxu0 %v5483_v1 }
0x32a9   :  { %v1831_v28 = vpop.f32.mrb[44].mxu0 }
0x32aa   :  { %v1838_v63 = vrot.slane %v1831_v28, 2  ;;  %v4871_v0 = vpop.f32.mrb[45].mxu0 }
0x32ab   :  { %v1834_v3 = vpop.f32.mrb[46].mxu0 }
0x32ac   :  { %v1840_v4 = vadd.f32 %v1838_v63, %v5961_v48  ;;  %v4872_v5 = vpop.f32.mrb[47].mxu0 }
0x32ae   :  { %5315 = vtanh.f32 %v1840_v4  ;;  %v4467_v9 = vmul.f32 -1.442695, %v1840_v4 }
0x32b0   :  { %5317 = vpow2.f32 %v4467_v9 }
0x32b8   :  { %v5316_v8 = vpop.eup %5315 }
0x32b9   :  { %1853 = vrot.lane.b32.xlu0 %v5316_v8, %s5486_s30 }
0x32ba   :  { %v5318_v10 = vpop.eup %5317 }
0x32bb   :  { %v1844_v12 = vadd.f32 1.0, %v5318_v10 }
0x32bd   :  { %5319 = vrcp.f32 %v1844_v12 }
0x32c7   :  { %v5320_v14 = vpop.eup %5319 }
0x32c8   :  { %v1851_v18 = vmul.f32 %v5320_v14, %v1849_v17 }
0x332b   :  { %v1854_v15 = vpop.permute.xlu0 %1853 }
0x332c   :  { %v1856_v13 = vmul.f32 %v5320_v14, %v1854_v15 }
0x332e   :  { %1858 = vrot.lane.b32.xlu1 %v1856_v13, %s5487_s24 }
0x33a0   :  { %v1859_v19 = vpop.permute.xlu1 %1858 }
0x33a1   :  { %v1861_v20 = vadd.f32 %v1859_v19, %v1851_v18 }
0x33a3   :  { %5321 = vtanh.f32 %v1861_v20  ;;  %v1925_v16 = vrot.slane %v1861_v20, 6 }
0x33ad   :  { %v5322_v48 = vpop.eup %5321 }
0x33ae   :  { %1864 = vrot.lane.b32.xlu0 %v5322_v48, %s5486_s30 }
0x3420   :  { %v1865_v21 = vpop.permute.xlu0 %1864 }
0x3421   :  { %v1867_v22 = vmul.f32 %v5320_v14, %v1865_v21 }
0x3423   :  { %v1868_v23 = vpack.c.bf16 %v1867_v22, %v1867_v22  ;;  %v6011_v24 = vsel %vm776_vm5, %v2181_v60, %v1867_v22 }
0x3425   :  { %v1870_v25 = vrot.slane %v1868_v23, 3 }
0x3427   :  { %1871 = vrot.lane.b32.xlu1 %v1870_v25, %s5487_s24 }
0x3499   :  { %v1872_v26 = vpop.permute.xlu1 %1871 }
0x349a   :  { %4878 = vmatmul.mubr.msk.bf16.vlgmr.msra.gmra.mrb[44].mxu1 %vm155_vm2, %v1872_v26 }
0x349b   :  { %4890 = vmatpush3.bf16.msra.mxu1 %v5919_v45  ;;  %4893 = vmatprep.mubr.msk.bf16.mxu1 %vm5484_vm0, %v5483_v1 }
0x349c   :  { %4891 = vmatprep.subr.bf16.mxu1 %v5483_v1 }
0x349f   :  { %4892 = vmatpush3.bf16.msra.mxu1 %v5929_v29 }
0x34a0   :  { %4905 = vmatprep.subr.bf16.mxu1 %v5483_v1 }
0x356d   :  { %v1910_v27 = vpop.f32.mrb[44].mxu1 }
0x356e   :  { %v1916_v30 = vadd.f32 %v1910_v27, %v5957_v43  ;;  %v4879_v31 = vpop.f32.mrb[45].mxu1 }
0x356f   :  { %v1913_v33 = vpop.f32.mrb[46].mxu1 }
0x3570   :  { %5323 = vtanh.f32 %v1916_v30  ;;  %v4880_v34 = vpop.f32.mrb[47].mxu1  ;;  %v4469_v38 = vmul.f32 -1.442695, %v1916_v30 }
0x3572   :  { %5325 = vpow2.f32 %v4469_v38 }
0x357a   :  { %v5324_v35 = vpop.eup %5323 }
0x357b   :  { %1929 = vrot.lane.b32.xlu0 %v5324_v35, %s5486_s30 }
0x357c   :  { %v5326_v39 = vpop.eup %5325 }
0x357d   :  { %v1920_v40 = vadd.f32 1.0, %v5326_v39 }
0x357f   :  { %5327 = vrcp.f32 %v1920_v40 }
0x3589   :  { %v5328_v41 = vpop.eup %5327 }
0x358a   :  { %v1927_v46 = vmul.f32 %v5328_v41, %v1925_v16 }
0x35ed   :  { %v1930_v11 = vpop.permute.xlu0 %1929 }
0x35ee   :  { %v1932_v42 = vmul.f32 %v5328_v41, %v1930_v11 }
0x35f0   :  { %1934 = vrot.lane.b32.xlu1 %v1932_v42, %s5487_s24 }
0x3662   :  { %v1935_v47 = vpop.permute.xlu1 %1934 }
0x3663   :  { %v1937_v2 = vadd.f32 %v1935_v47, %v1927_v46 }
0x3665   :  { %5329 = vtanh.f32 %v1937_v2  ;;  %v2003_v0 = vrot.slane %v1937_v2, 6 }
0x366f   :  { %v5330_v49 = vpop.eup %5329 }
0x3670   :  { %1940 = vrot.lane.b32.xlu0 %v5330_v49, %s5486_s30 }
0x36e2   :  { %v1941_v50 = vpop.permute.xlu0 %1940 }
0x36e3   :  { %v6025_v51 = vmul.f32 %v5328_v41, %v1941_v50 }
0x36e5   :  { %v1944_v52 = vpack.c.bf16 %v6025_v51, %v6025_v51 }
0x36e7   :  { %1946 = vrot.lane.b32.xlu1 %v1944_v52, %s5487_s24 }
0x3759   :  { %v1947_v53 = vpop.permute.xlu1 %1946 }
0x375a   :  { %4886 = vmatmul.mubr.msk.bf16.vlgmr.msra.gmra.mrb[48].mxu0 %vm155_vm2, %v1947_v53 }
0x375b   :  { %4898 = vmatpush3.bf16.msra.mxu0 %v5919_v45  ;;  %4901 = vmatprep.mubr.msk.bf16.mxu0 %vm5484_vm0, %v5483_v1 }
0x375c   :  { %4899 = vmatprep.subr.bf16.mxu0 %v5483_v1 }
0x375f   :  { %4900 = vmatpush3.bf16.msra.mxu0 %v5929_v29 }
0x3760   :  { %4913 = vmatprep.subr.bf16.mxu0 %v5483_v1 }
0x382d   :  { %v1985_v54 = vpop.f32.mrb[48].mxu0 }
0x382e   :  { %v1992_v55 = vrot.slane %v1985_v54, 6  ;;  %v4887_v56 = vpop.f32.mrb[49].mxu0 }
0x382f   :  { %v1988_v57 = vpop.f32.mrb[50].mxu0 }
0x3830   :  { %v1994_v58 = vadd.f32 %v1992_v55, %v5957_v43  ;;  %v4888_v59 = vpop.f32.mrb[51].mxu0 }
0x3832   :  { %5331 = vtanh.f32 %v1994_v58  ;;  %v4471_v45 = vmul.f32 -1.442695, %v1994_v58 }
0x3834   :  { %5333 = vpow2.f32 %v4471_v45 }
0x383c   :  { %v5332_v60 = vpop.eup %5331 }
0x383d   :  { %2007 = vrot.lane.b32.xlu0 %v5332_v60, %s5486_s30 }
0x383e   :  { %v5334_v61 = vpop.eup %5333 }
0x383f   :  { %v1998_v62 = vadd.f32 1.0, %v5334_v61 }
0x3841   :  { %5335 = vrcp.f32 %v1998_v62 }
0x384b   :  { %v5336_v28 = vpop.eup %5335 }
0x384c   :  { %v2005_v3 = vmul.f32 %v5336_v28, %v2003_v0 }
0x38af   :  { %v2008_v29 = vpop.permute.xlu0 %2007 }
0x38b0   :  { %v2010_v63 = vmul.f32 %v5336_v28, %v2008_v29  ;;  %v5165_v29 = vld [vmem:[%s6507_s11 + $0x8] sm:$0xff]  }
0x38b2   :  { %2012 = vrot.lane.b32.xlu1 %v2010_v63, %s5487_s24  ;;  %v6074_v63 = vld [vmem:[%s6508_s12 + $0x8] sm:$0xff]  }
0x3924   :  { %v2013_v4 = vpop.permute.xlu1 %2012 }
0x3925   :  { %v2015_v5 = vadd.f32 %v2013_v4, %v2005_v3 }
0x3927   :  { %5337 = vtanh.f32 %v2015_v5  ;;  %v2082_v31 = vrot.slane %v2015_v5, 6 }
0x3931   :  { %v5338_v8 = vpop.eup %5337 }
0x3932   :  { %2018 = vrot.lane.b32.xlu0 %v5338_v8, %s5486_s30 }
0x39a4   :  { %v2019_v9 = vpop.permute.xlu0 %2018 }
0x39a5   :  { %v2021_v10 = vmul.f32 %v5336_v28, %v2019_v9  ;;  %v6065_v28 = vld [vmem:[%s6508_s12] sm:$0xff]  }
0x39a7   :  { %v2022_v12 = vpack.c.bf16 %v2021_v10, %v2021_v10  ;;  %v2183_v41 = vsel %vm772_vm3, %v6025_v51, %v2021_v10 }
0x39a9   :  { %v2024_v14 = vrot.slane %v2022_v12, 1 }
0x39ab   :  { %2025 = vrot.lane.b32.xlu1 %v2024_v14, %s5487_s24 }
0x3a1d   :  { %v2026_v15 = vpop.permute.xlu1 %2025 }
0x3a1e   :  { %4894 = vmatmul.mubr.msk.bf16.vlgmr.msra.gmra.mrb[48].mxu1 %vm155_vm2, %v2026_v15 }
0x3a1f   :  { %4909 = vmatprep.mubr.msk.bf16.mxu1 %vm5484_vm0, %v5483_v1 }
0x3af1   :  { %v2064_v13 = vpop.f32.mrb[48].mxu1 }
0x3af2   :  { %v2071_v17 = vrot.slane %v2064_v13, 4  ;;  %v4895_v18 = vpop.f32.mrb[49].mxu1 }
0x3af3   :  { %v2067_v19 = vpop.f32.mrb[50].mxu1 }
0x3af4   :  { %v2073_v20 = vadd.f32 %v2071_v17, %v5957_v43  ;;  %v4896_v48 = vpop.f32.mrb[51].mxu1 }
0x3af6   :  { %5339 = vtanh.f32 %v2073_v20  ;;  %v4473_v22 = vmul.f32 -1.442695, %v2073_v20 }
0x3af8   :  { %5341 = vpow2.f32 %v4473_v22 }
0x3b00   :  { %v5340_v21 = vpop.eup %5339 }
0x3b01   :  { %2086 = vrot.lane.b32.xlu0 %v5340_v21, %s5486_s30 }
0x3b02   :  { %v5342_v23 = vpop.eup %5341 }
0x3b03   :  { %v2077_v25 = vadd.f32 1.0, %v5342_v23 }
0x3b05   :  { %5343 = vrcp.f32 %v2077_v25 }
0x3b0f   :  { %v5344_v26 = vpop.eup %5343 }
0x3b10   :  { %v2084_v33 = vmul.f32 %v5344_v26, %v2082_v31 }
0x3b73   :  { %v2087_v27 = vpop.permute.xlu0 %2086 }
0x3b74   :  { %v2089_v30 = vmul.f32 %v5344_v26, %v2087_v27 }
0x3b76   :  { %2091 = vrot.lane.b32.xlu1 %v2089_v30, %s5487_s24 }
0x3be8   :  { %v2092_v34 = vpop.permute.xlu1 %2091 }
0x3be9   :  { %v2094_v35 = vadd.f32 %v2092_v34, %v2084_v33 }
0x3beb   :  { %5345 = vtanh.f32 %v2094_v35  ;;  %v2161_v60 = vrot.slane %v2094_v35, 6 }
0x3bf5   :  { %v5346_v38 = vpop.eup %5345 }
0x3bf6   :  { %2097 = vrot.lane.b32.xlu0 %v5346_v38, %s5486_s30 }
0x3c68   :  { %v2098_v39 = vpop.permute.xlu0 %2097 }
0x3c69   :  { %v2100_v40 = vmul.f32 %v5344_v26, %v2098_v39 }
0x3c6b   :  { %v2101_v11 = vpack.c.bf16 %v2100_v40, %v2100_v40  ;;  %v2184_v42 = vsel %vm774_vm4, %v2183_v41, %v2100_v40 }
0x3c6d   :  { %v2103_v16 = vrot.slane %v2101_v11, 2 }
0x3c6f   :  { %2104 = vrot.lane.b32.xlu1 %v2103_v16, %s5487_s24 }
0x3ce1   :  { %v2105_v46 = vpop.permute.xlu1 %2104 }
0x3ce2   :  { %4902 = vmatmul.mubr.msk.bf16.vlgmr.msra.gmra.mrb[52].mxu0 %vm155_vm2, %v2105_v46 }
0x3ce3   :  { %4917 = vmatprep.mubr.msk.bf16.mxu0 %vm5484_vm0, %v5483_v1  ;;  %4914 = vmatpush3.bf16.msra.mxu0 %v6065_v28 }
0x3ce4   :  { %4915 = vmatprep.subr.bf16.mxu0 %v5483_v1 }
0x3ce7   :  { %4916 = vmatpush3.bf16.msra.mxu0 %v6074_v63 }
0x3ce8   :  { %4929 = vmatprep.subr.bf16.mxu0 %v5483_v1 }
0x3cea   :  { %4918 = vmatmul.mubr.bf16.vlgmr.msra.gmra.mrb[56].mxu0 %v5485_v7 }
0x3ceb   :  { %4930 = vmatpush3.bf16.msra.mxu0 %v6065_v28  ;;  %4933 = vmatprep.mubr.msk.bf16.mxu0 %vm5484_vm0, %v5483_v1 }
0x3cec   :  { %4931 = vmatprep.subr.bf16.mxu0 %v5483_v1 }
0x3cef   :  { %4932 = vmatpush3.bf16.msra.mxu0 %v6074_v63 }
0x3cf0   :  { %4945 = vmatprep.subr.bf16.mxu0 %v5483_v1 }
0x3db5   :  { %v2143_v47 = vpop.f32.mrb[52].mxu0 }
0x3db6   :  { %v2150_v2 = vrot.slane %v2143_v47, 2  ;;  %v4903_v49 = vpop.f32.mrb[53].mxu0 }
0x3db7   :  { %v2146_v50 = vpop.f32.mrb[54].mxu0 }
0x3db8   :  { %v2152_v52 = vadd.f32 %v2150_v2, %v5957_v43  ;;  %v4904_v53 = vpop.f32.mrb[55].mxu0  ;;  %v5163_v43 = vld [vmem:[%s6507_s11] sm:$0xff]  }
0x3db9   :  { %4906 = vmatpush3.bf16.msra.mxu1 %v5163_v43 }
0x3dba   :  { %5347 = vtanh.f32 %v2152_v52  ;;  %v4475_v54 = vmul.f32 -1.442695, %v2152_v52  ;;  %4907 = vmatprep.subr.bf16.mxu1 %v5483_v1 }
0x3dbc   :  { %5349 = vpow2.f32 %v4475_v54 }
0x3dbd   :  { %4908 = vmatpush3.bf16.msra.mxu1 %v5165_v29  ;;  %v2307_v7 = vpop.f32.mrb[56].mxu0 }
0x3dbe   :  { %4921 = vmatprep.subr.bf16.mxu1 %v5483_v1  ;;  %v4919_v9 = vpop.f32.mrb[57].mxu0 }
0x3dbf   :  { %v2310_v10 = vpop.f32.mrb[58].mxu0 }
0x3dc0   :  { %v4920_v12 = vpop.f32.mrb[59].mxu0 }
0x3dc4   :  { %v5348_v51 = vpop.eup %5347 }
0x3dc5   :  { %2165 = vrot.lane.b32.xlu0 %v5348_v51, %s5486_s30 }
0x3dc6   :  { %v5350_v55 = vpop.eup %5349 }
0x3dc7   :  { %v2156_v56 = vadd.f32 1.0, %v5350_v55 }
0x3dc9   :  { %5351 = vrcp.f32 %v2156_v56 }
0x3dd3   :  { %v5352_v57 = vpop.eup %5351 }
0x3dd4   :  { %v2163_v45 = vmul.f32 %v5352_v57, %v2161_v60 }
0x3e37   :  { %v2166_v58 = vpop.permute.xlu0 %2165 }
0x3e38   :  { %v2168_v59 = vmul.f32 %v5352_v57, %v2166_v58 }
0x3e3a   :  { %2170 = vrot.lane.b32.xlu1 %v2168_v59, %s5487_s24 }
0x3eac   :  { %v2171_v61 = vpop.permute.xlu1 %2170 }
0x3ead   :  { %v2173_v62 = vadd.f32 %v2171_v61, %v2163_v45 }
0x3eaf   :  { %5353 = vtanh.f32 %v2173_v62 }
0x3eb9   :  { %v5354_v0 = vpop.eup %5353 }
0x3eba   :  { %2176 = vrot.lane.b32.xlu0 %v5354_v0, %s5486_s30 }
0x3f2c   :  { %v2177_v3 = vpop.permute.xlu0 %2176 }
0x3f2d   :  { %v2179_v4 = vmul.f32 %v5352_v57, %v2177_v3 }
0x3f2f   :  { %v2185_v5 = vsel %vm776_vm5, %v2184_v42, %v2179_v4 }
0x3f30   :  { %v2195_v8 = vpack.c.bf16 %v2185_v5, %v6011_v24  ;;  %v4476_v24 = vld [vmem:[%s6509_s13] ss:$0 sm:$0xff] }
0x3f32   :  { %2203 = vrot.lane.b32.xlu1 %v2195_v8, %s5487_s24 }
0x3fa4   :  { %v2204_v14 = vpop.permute.xlu1 %2203 }
0x3fa5   :  { %4910 = vmatmul.mubr.msk.bf16.vlgmr.msra.gmra.mrb[52].mxu1 %vm155_vm2, %v2204_v14 }
0x3fa6   :  { %4922 = vmatpush3.bf16.msra.mxu1 %v6065_v28  ;;  %4925 = vmatprep.mubr.msk.bf16.mxu1 %vm5484_vm0, %v5483_v1 }
0x3fa7   :  { %4923 = vmatprep.subr.bf16.mxu1 %v5483_v1 }
0x3faa   :  { %4924 = vmatpush3.bf16.msra.mxu1 %v6074_v63 }
0x3fab   :  { %4937 = vmatprep.subr.bf16.mxu1 %v5483_v1 }
0x4078   :  { %v2254_v15 = vpop.f32.mrb[52].mxu1 }
0x4079   :  { %v6102_v13 = vadd.f32 %v4476_v24, %v2254_v15  ;;  %v4911_v17 = vpop.f32.mrb[53].mxu1 }
0x407a   :  { %v2257_v18 = vpop.f32.mrb[54].mxu1 }
0x407b   :  { %v2313_v19 = vadd.f32 %v2307_v7, %v6102_v13  ;;  %v6105_v20 = vadd.f32 %v4476_v24, %v2257_v18  ;;  %v4912_v48 = vpop.f32.mrb[55].mxu1 }
0x407d   :  { %5355 = vtanh.f32 %v2313_v19  ;;  %v4482_v22 = vmul.f32 -1.442695, %v2313_v19 }
0x407f   :  { %5357 = vpow2.f32 %v4482_v22 }
0x4087   :  { %v5356_v21 = vpop.eup %5355 }
0x4088   :  { %2323 = vrot.lane.b32.xlu0 %v5356_v21, %s5486_s30 }
0x4089   :  { %v5358_v23 = vpop.eup %5357 }
0x408a   :  { %v2317_v25 = vadd.f32 1.0, %v5358_v23 }
0x408c   :  { %5359 = vrcp.f32 %v2317_v25 }
0x4096   :  { %v5360_v26 = vpop.eup %5359 }
0x4097   :  { %v2321_v31 = vmul.f32 0.0, %v5360_v26 }
0x40fa   :  { %v2324_v27 = vpop.permute.xlu0 %2323 }
0x40fb   :  { %v2326_v30 = vmul.f32 %v5360_v26, %v2324_v27 }
0x40fd   :  { %2328 = vrot.lane.b32.xlu1 %v2326_v30, %s5487_s24 }
0x416f   :  { %v2329_v33 = vpop.permute.xlu1 %2328 }
0x4170   :  { %v2331_v34 = vadd.f32 %v2329_v33, %v2321_v31 }
0x4172   :  { %5361 = vtanh.f32 %v2331_v34  ;;  %v2397_v56 = vrot.slane %v2331_v34, 6 }
0x417c   :  { %v5362_v35 = vpop.eup %5361 }
0x417d   :  { %2334 = vrot.lane.b32.xlu0 %v5362_v35, %s5486_s30 }
0x41ef   :  { %v2335_v38 = vpop.permute.xlu0 %2334 }
0x41f0   :  { %v6110_v39 = vmul.f32 %v5360_v26, %v2335_v38 }
0x41f2   :  { %v2338_v40 = vpack.c.bf16 %v6110_v39, %v6110_v39  ;;  %v2962_v30 = vrot.slane %v6110_v39, 1 }
0x41f4   :  { %2340 = vrot.lane.b32.xlu1 %v2338_v40, %s5487_s24 }
0x4266   :  { %v2341_v41 = vpop.permute.xlu1 %2340 }
0x4267   :  { %4926 = vmatmul.mubr.msk.bf16.vlgmr.msra.gmra.mrb[56].mxu1 %vm155_vm2, %v2341_v41 }
0x4268   :  { %4938 = vmatpush3.bf16.msra.mxu1 %v6065_v28  ;;  %4941 = vmatprep.mubr.msk.bf16.mxu1 %vm5484_vm0, %v5483_v1 }
0x4269   :  { %4939 = vmatprep.subr.bf16.mxu1 %v5483_v1 }
0x426c   :  { %4940 = vmatpush3.bf16.msra.mxu1 %v6074_v63 }
0x426d   :  { %4953 = vmatprep.subr.bf16.mxu1 %v5483_v1 }
0x433a   :  { %v2379_v11 = vpop.f32.mrb[56].mxu1 }
0x433b   :  { %v2386_v42 = vrot.slane %v2379_v11, 6  ;;  %v4927_v16 = vpop.f32.mrb[57].mxu1 }
0x433c   :  { %v2382_v46 = vpop.f32.mrb[58].mxu1 }
0x433d   :  { %v2388_v47 = vadd.f32 %v2386_v42, %v6102_v13  ;;  %v4928_v2 = vpop.f32.mrb[59].mxu1 }
0x433f   :  { %5363 = vtanh.f32 %v2388_v47  ;;  %v4484_v50 = vmul.f32 -1.442695, %v2388_v47 }
0x4341   :  { %5365 = vpow2.f32 %v4484_v50 }
0x4349   :  { %v5364_v49 = vpop.eup %5363 }
0x434a   :  { %2401 = vrot.lane.b32.xlu0 %v5364_v49, %s5486_s30 }
0x434b   :  { %v5366_v52 = vpop.eup %5365 }
0x434c   :  { %v2392_v53 = vadd.f32 1.0, %v5366_v52 }
0x434e   :  { %5367 = vrcp.f32 %v2392_v53 }
0x4358   :  { %v5368_v51 = vpop.eup %5367 }
0x4359   :  { %v2399_v57 = vmul.f32 %v5368_v51, %v2397_v56 }
0x43bc   :  { %v2402_v54 = vpop.permute.xlu0 %2401 }
0x43bd   :  { %v2404_v55 = vmul.f32 %v5368_v51, %v2402_v54 }
0x43bf   :  { %2406 = vrot.lane.b32.xlu1 %v2404_v55, %s5487_s24 }
0x4431   :  { %v2407_v58 = vpop.permute.xlu1 %2406 }
0x4432   :  { %v2409_v59 = vadd.f32 %v2407_v58, %v2399_v57 }
0x4434   :  { %5369 = vtanh.f32 %v2409_v59  ;;  %v2476_v18 = vrot.slane %v2409_v59, 6 }
0x443e   :  { %v5370_v60 = vpop.eup %5369 }
0x443f   :  { %2412 = vrot.lane.b32.xlu0 %v5370_v60, %s5486_s30 }
0x44b1   :  { %v2413_v45 = vpop.permute.xlu0 %2412 }
0x44b2   :  { %v2415_v61 = vmul.f32 %v5368_v51, %v2413_v45 }
0x44b4   :  { %v2416_v62 = vpack.c.bf16 %v2415_v61, %v2415_v61  ;;  %v2941_v23 = vrot.slane %v2415_v61, 1  ;;  %v2964_v25 = vrot.slane %v2415_v61, 2 }
0x44b6   :  { %v2418_v43 = vrot.slane %v2416_v62, 1  ;;  %v2976_v35 = vsel %vm2922_vm6, %v6110_v39, %v2941_v23  ;;  %v2983_v38 = vsel %vm2922_vm6, %v2962_v30, %v2964_v25 }
0x44b8   :  { %2419 = vrot.lane.b32.xlu1 %v2418_v43, %s5487_s24 }
0x452a   :  { %v2420_v29 = vpop.permute.xlu1 %2419 }
0x452b   :  { %4934 = vmatmul.mubr.msk.bf16.vlgmr.msra.gmra.mrb[60].mxu0 %vm155_vm2, %v2420_v29 }
0x452c   :  { %4946 = vmatpush3.bf16.msra.mxu0 %v6065_v28  ;;  %4949 = vmatprep.mubr.msk.bf16.mxu0 %vm5484_vm0, %v5483_v1 }
0x452d   :  { %4947 = vmatprep.subr.bf16.mxu0 %v5483_v1 }
0x4530   :  { %4948 = vmatpush3.bf16.msra.mxu0 %v6074_v63 }
0x4531   :  { %4961 = vmatprep.subr.bf16.mxu0 %v5483_v1 }
0x45fe   :  { %v2458_v0 = vpop.f32.mrb[60].mxu0 }
0x45ff   :  { %v2465_v3 = vrot.slane %v2458_v0, 4  ;;  %v4935_v4 = vpop.f32.mrb[61].mxu0 }
0x4600   :  { %v2461_v5 = vpop.f32.mrb[62].mxu0 }
0x4601   :  { %v2467_v8 = vadd.f32 %v2465_v3, %v6102_v13  ;;  %v4936_v7 = vpop.f32.mrb[63].mxu0 }
0x4603   :  { %5371 = vtanh.f32 %v2467_v8  ;;  %v4486_v10 = vmul.f32 -1.442695, %v2467_v8 }
0x4605   :  { %5373 = vpow2.f32 %v4486_v10 }
0x460d   :  { %v5372_v9 = vpop.eup %5371 }
0x460e   :  { %2480 = vrot.lane.b32.xlu0 %v5372_v9, %s5486_s30 }
0x460f   :  { %v5374_v12 = vpop.eup %5373 }
0x4610   :  { %v2471_v14 = vadd.f32 1.0, %v5374_v12 }
0x4612   :  { %5375 = vrcp.f32 %v2471_v14 }
0x461c   :  { %v5376_v24 = vpop.eup %5375 }
0x461d   :  { %v2478_v19 = vmul.f32 %v5376_v24, %v2476_v18 }
0x4680   :  { %v2481_v15 = vpop.permute.xlu0 %2480 }
0x4681   :  { %v2483_v17 = vmul.f32 %v5376_v24, %v2481_v15 }
0x4683   :  { %2485 = vrot.lane.b32.xlu1 %v2483_v17, %s5487_s24 }
0x46f5   :  { %v2486_v48 = vpop.permute.xlu1 %2485 }
0x46f6   :  { %v2488_v21 = vadd.f32 %v2486_v48, %v2478_v19 }
0x46f8   :  { %5377 = vtanh.f32 %v2488_v21  ;;  %v2555_v57 = vrot.slane %v2488_v21, 6 }
0x4702   :  { %v5378_v22 = vpop.eup %5377 }
0x4703   :  { %2491 = vrot.lane.b32.xlu0 %v5378_v22, %s5486_s30 }
0x4775   :  { %v2492_v26 = vpop.permute.xlu0 %2491 }
0x4776   :  { %v2494_v27 = vmul.f32 %v5376_v24, %v2492_v26 }
0x4778   :  { %v2495_v31 = vpack.c.bf16 %v2494_v27, %v2494_v27  ;;  %v2944_v33 = vrot.slane %v2494_v27, 2  ;;  %v2966_v34 = vrot.slane %v2494_v27, 3 }
0x477a   :  { %v2497_v40 = vrot.slane %v2495_v31, 2  ;;  %v2977_v41 = vsel %vm772_vm3, %v2976_v35, %v2944_v33  ;;  %v2984_v11 = vsel %vm772_vm3, %v2983_v38, %v2966_v34 }
0x477c   :  { %2498 = vrot.lane.b32.xlu1 %v2497_v40, %s5487_s24 }
0x47ee   :  { %v2499_v42 = vpop.permute.xlu1 %2498 }
0x47ef   :  { %4942 = vmatmul.mubr.msk.bf16.vlgmr.msra.gmra.mrb[60].mxu1 %vm155_vm2, %v2499_v42 }
0x47f0   :  { %4954 = vmatpush3.bf16.msra.mxu1 %v6065_v28  ;;  %4957 = vmatprep.mubr.msk.bf16.mxu1 %vm5484_vm0, %v5483_v1 }
0x47f1   :  { %4955 = vmatprep.subr.bf16.mxu1 %v5483_v1 }
0x47f4   :  { %4956 = vmatpush3.bf16.msra.mxu1 %v6074_v63 }
0x47f5   :  { %4969 = vmatprep.subr.bf16.mxu1 %v5483_v1 }
0x48c2   :  { %v2537_v39 = vpop.f32.mrb[60].mxu1 }
0x48c3   :  { %v2544_v16 = vrot.slane %v2537_v39, 2  ;;  %v4943_v46 = vpop.f32.mrb[61].mxu1 }
0x48c4   :  { %v2540_v47 = vpop.f32.mrb[62].mxu1 }
0x48c5   :  { %v2546_v2 = vadd.f32 %v2544_v16, %v6102_v13  ;;  %v4944_v49 = vpop.f32.mrb[63].mxu1 }
0x48c7   :  { %5379 = vtanh.f32 %v2546_v2  ;;  %v4488_v52 = vmul.f32 -1.442695, %v2546_v2 }
0x48c9   :  { %5381 = vpow2.f32 %v4488_v52 }
0x48d1   :  { %v5380_v50 = vpop.eup %5379 }
0x48d2   :  { %2559 = vrot.lane.b32.xlu0 %v5380_v50, %s5486_s30 }
0x48d3   :  { %v5382_v53 = vpop.eup %5381 }
0x48d4   :  { %v2550_v51 = vadd.f32 1.0, %v5382_v53 }
0x48d6   :  { %5383 = vrcp.f32 %v2550_v51 }
0x48e0   :  { %v5384_v54 = vpop.eup %5383 }
0x48e1   :  { %v2557_v58 = vmul.f32 %v5384_v54, %v2555_v57 }
0x4944   :  { %v2560_v55 = vpop.permute.xlu0 %2559 }
0x4945   :  { %v2562_v56 = vmul.f32 %v5384_v54, %v2560_v55 }
0x4947   :  { %2564 = vrot.lane.b32.xlu1 %v2562_v56, %s5487_s24 }
0x49b9   :  { %v2565_v59 = vpop.permute.xlu1 %2564 }
0x49ba   :  { %v2567_v60 = vadd.f32 %v2565_v59, %v2557_v58 }
0x49bc   :  { %5385 = vtanh.f32 %v2567_v60  ;;  %v2631_v21 = vrot.slane %v2567_v60, 6 }
0x49c6   :  { %v5386_v13 = vpop.eup %5385 }
0x49c7   :  { %2570 = vrot.lane.b32.xlu0 %v5386_v13, %s5486_s30 }
0x4a39   :  { %v2571_v45 = vpop.permute.xlu0 %2570 }
0x4a3a   :  { %v2573_v61 = vmul.f32 %v5384_v54, %v2571_v45 }
0x4a3c   :  { %v2574_v62 = vpack.c.bf16 %v2573_v61, %v2573_v61  ;;  %v2947_v43 = vrot.slane %v2573_v61, 3  ;;  %v2968_v29 = vrot.slane %v2573_v61, 4 }
0x4a3e   :  { %v2576_v0 = vrot.slane %v2574_v62, 3  ;;  %v2978_v3 = vsel %vm2925_vm7, %v2977_v41, %v2947_v43  ;;  %v2985_v4 = vsel %vm2925_vm7, %v2984_v11, %v2968_v29 }
0x4a40   :  { %2577 = vrot.lane.b32.xlu1 %v2576_v0, %s5487_s24 }
0x4ab2   :  { %v2578_v5 = vpop.permute.xlu1 %2577 }
0x4ab3   :  { %4950 = vmatmul.mubr.msk.bf16.vlgmr.msra.gmra.mrb[64].mxu0 %vm155_vm2, %v2578_v5 }
0x4ab4   :  { %4962 = vmatpush3.bf16.msra.mxu0 %v6065_v28  ;;  %4965 = vmatprep.mubr.msk.bf16.mxu0 %vm5484_vm0, %v5483_v1 }
0x4ab5   :  { %4963 = vmatprep.subr.bf16.mxu0 %v5483_v1 }
0x4ab8   :  { %4964 = vmatpush3.bf16.msra.mxu0 %v6074_v63 }
0x4ab9   :  { %4977 = vmatprep.subr.bf16.mxu0 %v5483_v1 }
0x4b86   :  { %v2616_v8 = vpop.f32.mrb[64].mxu0 }
0x4b87   :  { %v2622_v7 = vadd.f32 %v2616_v8, %v6105_v20  ;;  %v4951_v9 = vpop.f32.mrb[65].mxu0 }
0x4b88   :  { %v2619_v10 = vpop.f32.mrb[66].mxu0 }
0x4b89   :  { %5387 = vtanh.f32 %v2622_v7  ;;  %v4952_v12 = vpop.f32.mrb[67].mxu0  ;;  %v4490_v24 = vmul.f32 -1.442695, %v2622_v7 }
0x4b8b   :  { %5389 = vpow2.f32 %v4490_v24 }
0x4b93   :  { %v5388_v14 = vpop.eup %5387 }
0x4b94   :  { %2635 = vrot.lane.b32.xlu0 %v5388_v14, %s5486_s30 }
0x4b95   :  { %v5390_v15 = vpop.eup %5389 }
0x4b96   :  { %v2626_v17 = vadd.f32 1.0, %v5390_v15 }
0x4b98   :  { %5391 = vrcp.f32 %v2626_v17 }
0x4ba2   :  { %v5392_v18 = vpop.eup %5391 }
0x4ba3   :  { %v2633_v22 = vmul.f32 %v5392_v18, %v2631_v21 }
0x4c06   :  { %v2636_v19 = vpop.permute.xlu0 %2635 }
0x4c07   :  { %v2638_v48 = vmul.f32 %v5392_v18, %v2636_v19 }
0x4c09   :  { %2640 = vrot.lane.b32.xlu1 %v2638_v48, %s5487_s24 }
0x4c7b   :  { %v2641_v23 = vpop.permute.xlu1 %2640 }
0x4c7c   :  { %v2643_v25 = vadd.f32 %v2641_v23, %v2633_v22 }
0x4c7e   :  { %5393 = vtanh.f32 %v2643_v25  ;;  %v2709_v53 = vrot.slane %v2643_v25, 6 }
0x4c88   :  { %v5394_v26 = vpop.eup %5393 }
0x4c89   :  { %2646 = vrot.lane.b32.xlu0 %v5394_v26, %s5486_s30 }
0x4cfb   :  { %v2647_v27 = vpop.permute.xlu0 %2646 }
0x4cfc   :  { %v2649_v30 = vmul.f32 %v5392_v18, %v2647_v27  ;;  %v1451_v18 = vrot.slane %v5959_v44, 2 }
0x4cfe   :  { %v2650_v31 = vpack.c.bf16 %v2649_v30, %v2649_v30  ;;  %v2950_v33 = vrot.slane %v2649_v30, 4  ;;  %v2970_v34 = vrot.slane %v2649_v30, 5  ;;  %v1453_v22 = vadd.f32 %v1451_v18, %v5810_v32 }
0x4d00   :  { %v2979_v35 = vsel %vm774_vm4, %v2978_v3, %v2950_v33  ;;  %v2986_v38 = vsel %vm774_vm4, %v2985_v4, %v2970_v34  ;;  %2652 = vrot.lane.b32.xlu1 %v2650_v31, %s5487_s24  ;;  %v4454_v26 = vmul.f32 -1.442695, %v1453_v22 }
0x4d72   :  { %v2653_v40 = vpop.permute.xlu1 %2652 }
0x4d73   :  { %4958 = vmatmul.mubr.msk.bf16.vlgmr.msra.gmra.mrb[64].mxu1 %vm155_vm2, %v2653_v40 }
0x4d74   :  { %4970 = vmatpush3.bf16.msra.mxu1 %v6065_v28  ;;  %4973 = vmatprep.mubr.msk.bf16.mxu1 %vm5484_vm0, %v5483_v1 }
0x4d75   :  { %4971 = vmatprep.subr.bf16.mxu1 %v5483_v1 }
0x4d78   :  { %4972 = vmatpush3.bf16.msra.mxu1 %v6074_v63 }
0x4d79   :  { %4985 = vmatprep.subr.bf16.mxu1 %v5483_v1 }
0x4e46   :  { %v2691_v41 = vpop.f32.mrb[64].mxu1 }
0x4e47   :  { %v2698_v11 = vrot.slane %v2691_v41, 6  ;;  %v4959_v42 = vpop.f32.mrb[65].mxu1 }
0x4e48   :  { %v2694_v39 = vpop.f32.mrb[66].mxu1 }
0x4e49   :  { %v2700_v16 = vadd.f32 %v2698_v11, %v6105_v20  ;;  %v4960_v46 = vpop.f32.mrb[67].mxu1  ;;  %v1462_v39 = vrot.slane %v5898_v6, 6  ;;  %v5168_v6 = vld [vmem:[%s6511_s15 + $0x8] sm:$0xff]  }
0x4e4b   :  { %5395 = vtanh.f32 %v2700_v16  ;;  %v4492_v28 = vmul.f32 -1.442695, %v2700_v16 }
0x4e4d   :  { %5397 = vpow2.f32 %v4492_v28 }
0x4e55   :  { %v5396_v47 = vpop.eup %5395 }
0x4e56   :  { %2713 = vrot.lane.b32.xlu0 %v5396_v47, %s5486_s30 }
0x4e57   :  { %v5398_v2 = vpop.eup %5397 }
0x4e58   :  { %v2704_v49 = vadd.f32 1.0, %v5398_v2 }
0x4e5a   :  { %5399 = vrcp.f32 %v2704_v49  ;;  %v5167_v49 = vld [vmem:[%s6511_s15] sm:$0xff]  }
0x4e64   :  { %v5400_v50 = vpop.eup %5399 }
0x4e65   :  { %v2711_v51 = vmul.f32 %v5400_v50, %v2709_v53 }
0x4ec8   :  { %v2714_v63 = vpop.permute.xlu0 %2713 }
0x4ec9   :  { %v2716_v52 = vmul.f32 %v5400_v50, %v2714_v63 }
0x4ecb   :  { %2718 = vrot.lane.b32.xlu1 %v2716_v52, %s5487_s24 }
0x4f3d   :  { %v2719_v54 = vpop.permute.xlu1 %2718 }
0x4f3e   :  { %v2721_v55 = vadd.f32 %v2719_v54, %v2711_v51 }
0x4f40   :  { %5401 = vtanh.f32 %v2721_v55  ;;  %v2788_v17 = vrot.slane %v2721_v55, 6 }
0x4f4a   :  { %v5402_v56 = vpop.eup %5401 }
0x4f4b   :  { %2724 = vrot.lane.b32.xlu0 %v5402_v56, %s5486_s30 }
0x4fbd   :  { %v2725_v57 = vpop.permute.xlu0 %2724 }
0x4fbe   :  { %v2727_v58 = vmul.f32 %v5400_v50, %v2725_v57 }
0x4fc0   :  { %v2728_v59 = vpack.c.bf16 %v2727_v58, %v2727_v58  ;;  %v2953_v60 = vrot.slane %v2727_v58, 5  ;;  %v2972_v13 = vrot.slane %v2727_v58, 6 }
0x4fc2   :  { %v2730_v45 = vrot.slane %v2728_v59, 1  ;;  %v2980_v61 = vsel %vm2928_vm8, %v2979_v35, %v2953_v60  ;;  %v2987_v62 = vsel %vm2928_vm8, %v2986_v38, %v2972_v13 }
0x4fc4   :  { %2731 = vrot.lane.b32.xlu1 %v2730_v45, %s5487_s24 }
0x5036   :  { %v2732_v43 = vpop.permute.xlu1 %2731 }
0x5037   :  { %4966 = vmatmul.mubr.msk.bf16.vlgmr.msra.gmra.mrb[68].mxu0 %vm155_vm2, %v2732_v43 }
0x5038   :  { %4981 = vmatprep.mubr.msk.bf16.mxu0 %vm5484_vm0, %v5483_v1 }
0x510a   :  { %v2770_v29 = vpop.f32.mrb[68].mxu0 }
0x510b   :  { %v2777_v0 = vrot.slane %v2770_v29, 4  ;;  %v4967_v3 = vpop.f32.mrb[69].mxu0 }
0x510c   :  { %v2773_v4 = vpop.f32.mrb[70].mxu0 }
0x510d   :  { %v2779_v5 = vadd.f32 %v2777_v0, %v6105_v20  ;;  %v4968_v8 = vpop.f32.mrb[71].mxu0 }
0x510f   :  { %5403 = vtanh.f32 %v2779_v5  ;;  %v4494_v9 = vmul.f32 -1.442695, %v2779_v5  ;;  %v4501_v5 = vld [vmem:[%s6513_s17] ss:$0 sm:$0xff] }
0x5111   :  { %5405 = vpow2.f32 %v4494_v9 }
0x5119   :  { %v5404_v7 = vpop.eup %5403 }
0x511a   :  { %2792 = vrot.lane.b32.xlu0 %v5404_v7, %s5486_s30 }
0x511b   :  { %v5406_v10 = vpop.eup %5405 }
0x511c   :  { %v2783_v12 = vadd.f32 1.0, %v5406_v10 }
0x511e   :  { %5407 = vrcp.f32 %v2783_v12 }
0x5128   :  { %v5408_v14 = vpop.eup %5407 }
0x5129   :  { %v2790_v19 = vmul.f32 %v5408_v14, %v2788_v17  ;;  %v5170_v17 = vld [vmem:[%s6510_s14 + $0x8] sm:$0xff]  }
0x518c   :  { %v2793_v24 = vpop.permute.xlu0 %2792 }
0x518d   :  { %v2795_v15 = vmul.f32 %v5408_v14, %v2793_v24 }
0x518f   :  { %2797 = vrot.lane.b32.xlu1 %v2795_v15, %s5487_s24  ;;  %v5169_v15 = vld [vmem:[%s6510_s14] sm:$0xff]  }
0x5190   :  { %4978 = vmatpush3.bf16.msra.mxu0 %v5169_v15 }
0x5191   :  { %4979 = vmatprep.subr.bf16.mxu0 %v5483_v1 }
0x5194   :  { %4980 = vmatpush3.bf16.msra.mxu0 %v5170_v17 }
0x5195   :  { %4993 = vmatprep.subr.bf16.mxu0 %v5483_v1 }
0x5201   :  { %v2798_v48 = vpop.permute.xlu1 %2797 }
0x5202   :  { %v6194_v21 = vadd.f32 %v2798_v48, %v2790_v19 }
0x5204   :  { %5409 = vtanh.f32 %v6194_v21 }
0x5205   :  { %5411 = vtanh.f32 %v1453_v22 }
0x5206   :  { %5413 = vpow2.f32 %v4454_v26 }
0x520e   :  { %v5410_v23 = vpop.eup %5409 }
0x520f   :  { %2803 = vrot.lane.b32.xlu0 %v5410_v23, %s5486_s30  ;;  %v5412_v25 = vpop.eup %5411 }
0x5210   :  { %v5414_v27 = vpop.eup %5413 }
0x5211   :  { %v1457_v30 = vadd.f32 1.0, %v5414_v27 }
0x5213   :  { %1466 = vrot.lane.b32.xlu0 %v5412_v25, %s5486_s30  ;;  %5415 = vrcp.f32 %v1457_v30  ;;  %v4497_v30 = vld [vmem:[%s6512_s16] ss:$0 sm:$0xff]  ;;  %s5489_s16 = smov 96  }
0x521d   :  { %v5416_v32 = vpop.eup %5415 }
0x521e   :  { %v1464_v16 = vmul.f32 %v5416_v32, %v1462_v39 }
0x5281   :  { %v2804_v44 = vpop.permute.xlu0 %2803 }
0x5282   :  { %v2806_v31 = vmul.f32 %v5408_v14, %v2804_v44 }
0x5284   :  { %v2807_v33 = vpack.c.bf16 %v2806_v31, %v2806_v31  ;;  %v2956_v34 = vrot.slane %v2806_v31, 6  ;;  %v2974_v35 = vrot.slane %v2806_v31, 7 }
0x5285   :  { %v1467_v38 = vpop.permute.xlu0 %1466 }
0x5286   :  { %v2809_v40 = vrot.slane %v2807_v33, 2  ;;  %v1469_v41 = vmul.f32 %v5416_v32, %v1467_v38  ;;  %v6201_v11 = vsel %vm776_vm5, %v2980_v61, %v2956_v34  ;;  %v6204_v42 = vsel %vm776_vm5, %v2987_v62, %v2974_v35 }
0x5288   :  { %2810 = vrot.lane.b32.xlu1 %v2809_v40, %s5487_s24  ;;  %1471 = vrot.lane.b32.xlu0 %v1469_v41, %s5487_s24 }
0x52fa   :  { %v2811_v46 = vpop.permute.xlu1 %2810  ;;  %v1472_v47 = vpop.permute.xlu0 %1471 }
0x52fb   :  { %v1474_v28 = vadd.f32 %v1472_v47, %v1464_v16  ;;  %4974 = vmatmul.mubr.msk.bf16.vlgmr.msra.gmra.mrb[68].mxu1 %vm155_vm2, %v2811_v46 }
0x52fc   :  { %4989 = vmatprep.mubr.msk.bf16.mxu1 %vm5484_vm0, %v5483_v1  ;;  %4986 = vmatpush3.bf16.msra.mxu1 %v5167_v49 }
0x52fd   :  { %5417 = vtanh.f32 %v1474_v28  ;;  %4987 = vmatprep.subr.bf16.mxu1 %v5483_v1 }
0x5300   :  { %4988 = vmatpush3.bf16.msra.mxu1 %v5168_v6 }
0x5301   :  { %4999 = vmatprep.subr.bf16.mxu1 %v5483_v1 }
0x5307   :  { %v5418_v2 = vpop.eup %5417 }
0x5308   :  { %1477 = vrot.lane.b32.xlu0 %v5418_v2, %s5486_s30 }
0x537a   :  { %v1478_v50 = vpop.permute.xlu0 %1477 }
0x537b   :  { %v1480_v63 = vmul.f32 %v5416_v32, %v1478_v50 }
0x537d   :  { %v2905_v52 = vrot.slane %v1480_v63, 7  ;;  %v2939_v51 = vsel %vm2931_vm9, %v5937_v37, %v1480_v63 }
0x537f   :  { %v2932_v53 = vsel %vm2931_vm9, %v5934_v36, %v2905_v52 }
0x5380   :  { %v3071_v54 = vpack.c.bf16 %v2939_v51, %v2932_v53 }
0x5382   :  { %3079 = vrot.lane.b32.xlu0 %v3071_v54, %s5487_s24 }
0x53ce   :  { %v2849_v55 = vpop.f32.mrb[68].mxu1 }
0x53cf   :  { %v2856_v56 = vrot.slane %v2849_v55, 2  ;;  %v4975_v57 = vpop.f32.mrb[69].mxu1 }
0x53d0   :  { %v2852_v58 = vpop.f32.mrb[70].mxu1 }
0x53d1   :  { %v2858_v59 = vadd.f32 %v2856_v56, %v6105_v20  ;;  %v4976_v60 = vpop.f32.mrb[71].mxu1  ;;  %v2867_v20 = vrot.slane %v6194_v21, 6 }
0x53d3   :  { %5419 = vtanh.f32 %v2858_v59  ;;  %v4496_v36 = vmul.f32 -1.442695, %v2858_v59 }
0x53d5   :  { %5421 = vpow2.f32 %v4496_v36 }
0x53dd   :  { %v5420_v13 = vpop.eup %5419 }
0x53de   :  { %2871 = vrot.lane.b32.xlu1 %v5420_v13, %s5486_s30 }
0x53df   :  { %v5422_v37 = vpop.eup %5421 }
0x53e0   :  { %v2862_v61 = vadd.f32 1.0, %v5422_v37 }
0x53e2   :  { %5423 = vrcp.f32 %v2862_v61 }
0x53ec   :  { %v5424_v62 = vpop.eup %5423 }
0x53ed   :  { %v2869_v0 = vmul.f32 %v5424_v62, %v2867_v20 }
0x53f4   :  { %v3080_v45 = vpop.permute.xlu0 %3079 }
0x53f5   :  { %4990 = vmatmul.mubr.msk.bf16.vlgmr.msra.gmra.mrb[72].mxu1 %vm155_vm2, %v3080_v45 }
0x53f6   :  { %5001 = vmatprep.mubr.msk.bf16.mxu1 %vm5484_vm0, %v5483_v1 }
0x5450   :  { %v2872_v43 = vpop.permute.xlu1 %2871 }
0x5451   :  { %v2874_v29 = vmul.f32 %v5424_v62, %v2872_v43  ;;  %v2991_v43 = vld [vmem:[%s6516_s20] sm:$0xf]  ;;  %s5493_s20 = smov 104  }
0x5453   :  { %2876 = vrot.lane.b32.xlu1 %v2874_v29, %s5487_s24  ;;  %v6301_v29 = vsel %vm774_vm4, %v2991_v43, 0 }
0x54c5   :  { %v2877_v3 = vpop.permute.xlu1 %2876 }
0x54c6   :  { %v2879_v4 = vadd.f32 %v2877_v3, %v2869_v0 }
0x54c8   :  { %5425 = vtanh.f32 %v2879_v4  ;;  %v3130_v8 = vpop.f32.mrb[72].mxu1 }
0x54c9   :  { %v3131_v7 = vadd.f32 %v4501_v5, %v3130_v8  ;;  %v4991_v9 = vpop.f32.mrb[73].mxu1 }
0x54ca   :  { %v3133_v10 = vpop.f32.mrb[74].mxu1 }
0x54cb   :  { %v6236_v12 = vpack.c.bf16 %v3131_v7, %v3131_v7  ;;  %v6238_v14 = vadd.f32 %v4501_v5, %v3133_v10  ;;  %v4992_v24 = vpop.f32.mrb[75].mxu1  ;;  %v2990_v5 = vld [vmem:[%s6515_s19] sm:$0xf]  ;;  %s5492_s19 = smov 80  }
0x54cc   :  { %v6311_v9 = vsel %vm774_vm4, %v2990_v5, 0 }
0x54cd   :  { %3252 = vrot.lane.b32.xlu0 %v6236_v12, %s5488_s8  ;;  %v3145_v27 = vsel %vm3140_vm10, %v6236_v12, 0 }
0x54d2   :  { %v5426_v18 = vpop.eup %5425 }
0x54d3   :  { %2882 = vrot.lane.b32.xlu1 %v5426_v18, %s5486_s30 }
0x553f   :  { %v3253_v40 = vpop.permute.xlu0 %3252 }
0x5545   :  { %v2883_v19 = vpop.permute.xlu1 %2882 }
0x5546   :  { %v2885_v48 = vmul.f32 %v5424_v62, %v2883_v19 }
0x5548   :  { %v2959_v21 = vrot.slane %v2885_v48, 7  ;;  %v2989_v23 = vsel %vm2931_vm9, %v6204_v42, %v2885_v48 }
0x554a   :  { %v2982_v22 = vsel %vm2931_vm9, %v6201_v11, %v2959_v21  ;;  %v3258_v11 = vsel %vm3140_vm10, %v3253_v40, 0 }
0x554b   :  { %v3005_v25 = vpack.c.bf16 %v2989_v23, %v2982_v22 }
0x554d   :  { %3013 = vrot.lane.b32.xlu1 %v3005_v25, %s5487_s24  ;;  %s5490_s24 = smov 112  }
0x55bf   :  { %v3014_v26 = vpop.permute.xlu1 %3013 }
0x55c0   :  { %4982 = vmatmul.mubr.msk.bf16.vlgmr.msra.gmra.mrb[72].mxu0 %vm155_vm2, %v3014_v26 }
0x55c1   :  { %4994 = vmatpush3.bf16.xpose.msra.mxu0 %v3145_v27  ;;  %4995 = vmatprep.mubr.msk.bf16.mxu0 %vm5484_vm0, %v5483_v1 }
0x55c2   :  { %5005 = vmatprep.subr.bf16.mxu0 %v5483_v1 }
0x5693   :  { %v3064_v44 = vpop.f32.mrb[72].mxu0 }
0x5694   :  { %v3065_v31 = vadd.f32 %v4497_v30, %v3064_v44  ;;  %v4983_v33 = vpop.f32.mrb[73].mxu0 }
0x5695   :  { %v3067_v34 = vpop.f32.mrb[74].mxu0 }
0x5696   :  { %v3137_v35 = vmul.f32 0.35355338, %v3065_v31  ;;  %v6265_v32 = vadd.f32 %v4497_v30, %v3067_v34  ;;  %v4984_v38 = vpop.f32.mrb[75].mxu0 }
0x5698   :  { %v6267_v41 = vpack.c.bf16 %v3137_v35, %v3137_v35 }
0x569a   :  { %3250 = vrot.lane.b32.xlu1 %v6267_v41, %s5488_s8  ;;  %4996 = vmatmul.mubr.msk.bf16.vlgmr.msra.gmra.mrb[76].mxu0 %vm3140_vm10, %v6267_v41 }
0x569b   :  { %5006 = vmatpush3.bf16.xpose.msra.mxu0 %v3258_v11  ;;  %5007 = vmatprep.mubr.msk.bf16.mxu0 %vm5484_vm0, %v5483_v1 }
0x569c   :  { %5017 = vmatprep.subr.bf16.mxu0 %v5483_v1 }
0x570c   :  { %v3251_v42 = vpop.permute.xlu1 %3250 }
0x570d   :  { %5008 = vmatmul.mubr.msk.bf16.vlgmr.msra.gmra.mrb[80].mxu0 %vm3140_vm10, %v3251_v42 }
0x570e   :  { %5019 = vmatprep.mubr.msk.bf16.mxu0 %vm5484_vm0, %v5483_v1  ;;  %5018 = vmatpush3.bf16.msra.mxu0 %v6301_v29 }
0x570f   :  { %5029 = vmatprep.subr.bf16.mxu0 %v5483_v1 }
0x576d   :  { %v3181_v39 = vpop.f32.mrb[76].mxu0 }
0x576e   :  { %v4997_v16 = vpop.f32.mrb[77].mxu0  ;;  %v3187_v46 = vsel %vm3140_vm10, %v3181_v39, -inf }
0x576f   :  { %3188 = vmax.xlane.f32.xlu0 %v3187_v46  ;;  %v3184_v47 = vpop.f32.mrb[78].mxu0 }
0x5770   :  { %v4998_v28 = vpop.f32.mrb[79].mxu0 }
0x57e0   :  { %v3294_v2 = vpop.f32.mrb[80].mxu0 }
0x57e1   :  { %v5009_v49 = vpop.f32.mrb[81].mxu0  ;;  %v3300_v6 = vsel %vm3140_vm10, %v3294_v2, -inf }
0x57e2   :  { %3301 = vmax.xlane.f32.xlu1 %v3300_v6  ;;  %v3297_v50 = vpop.f32.mrb[82].mxu0 }
0x57e3   :  { %v5010_v63 = vpop.f32.mrb[83].mxu0 }
0x57f3   :  { %3200 = vrot.lane.b32.xlu1 %v6236_v12, %s5489_s16 }
0x57f7   :  { %3455 = vrot.lane.b32.xlu1 %v6236_v12, %s5490_s24 }
0x57fb   :  { %3453 = vrot.lane.b32.xlu1 %v6267_v41, %s5490_s24 }
0x57fc   :  { %v3189_v52 = vpop.xlane.xlu0 %3188 }
0x57fd   :  { %v3190_v53 = vsub.f32 %v3181_v39, %v3189_v52 }
0x57ff   :  { %v3191_v51 = vmul.f32 1.442695, %v3190_v53 }
0x5801   :  { %5427 = vpow2.f32 %v3191_v51 }
0x580b   :  { %v5428_v54 = vpop.eup %5427 }
0x580c   :  { %v3193_v55 = vsel %vm3140_vm10, %v5428_v54, 0.0 }
0x580d   :  { %3194 = vadd.xlane.f32.xlu0 %v3193_v55 }
0x586f   :  { %v3302_v56 = vpop.xlane.xlu1 %3301 }
0x5870   :  { %v3303_v57 = vsub.f32 %v3294_v2, %v3302_v56 }
0x5872   :  { %v3304_v58 = vmul.f32 1.442695, %v3303_v57 }
0x5873   :  { %v3201_v59 = vpop.permute.xlu1 %3200 }
0x5874   :  { %5429 = vpow2.f32 %v3304_v58  ;;  %v3206_v60 = vsel %vm774_vm4, %v3201_v59, 0  ;;  %v2992_v58 = vld [vmem:[%s6517_s21] sm:$0xf]  ;;  %s5494_s21 = smov 72  }
0x5875   :  { %5000 = vmatpush3.bf16.msra.mxu1 %v3206_v60  ;;  %v6353_v59 = vsel %vm774_vm4, %v2992_v58, 0 }
0x5876   :  { %5011 = vmatprep.subr.bf16.mxu1 %v5483_v1 }
0x5877   :  { %v3456_v19 = vpop.permute.xlu1 %3455 }
0x5878   :  { %v3461_v25 = vsel %vm3140_vm10, %v3456_v19, 0 }
0x587b   :  { %v3454_v27 = vpop.permute.xlu1 %3453 }
0x587e   :  { %v5430_v13 = vpop.eup %5429 }
0x587f   :  { %v3306_v45 = vsel %vm3140_vm10, %v5430_v13, 0.0 }
0x5880   :  { %3307 = vadd.xlane.f32.xlu0 %v3306_v45 }
0x5896   :  { %3312 = vrot.lane.b32.xlu0 %v6236_v12, %s5491_s10 }
0x589a   :  { %v3195_v36 = vpop.xlane.xlu0 %3194 }
0x589b   :  { %5431 = vrcp.f32 %v3195_v36 }
0x58a5   :  { %v5432_v37 = vpop.eup %5431 }
0x58a6   :  { %v3197_v61 = vmul.f32 %v5432_v37, %v5428_v54 }
0x58a8   :  { %v3198_v62 = vpack.c.bf16 %v3197_v61, %v3197_v61 }
0x58aa   :  { %5002 = vmatmul.mubr.msk.bf16.vlgmr.msra.gmra.mrb[76].mxu1 %vm3140_vm10, %v3198_v62 }
0x58ab   :  { %5013 = vmatprep.mubr.msk.bf16.mxu1 %vm5484_vm0, %v5483_v1 }
0x590d   :  { %v3308_v20 = vpop.xlane.xlu0 %3307 }
0x590e   :  { %5433 = vrcp.f32 %v3308_v20 }
0x5911   :  { %v3313_v0 = vpop.permute.xlu0 %3312 }
0x5912   :  { %v3318_v3 = vsel %vm774_vm4, %v3313_v0, 0 }
0x5913   :  { %5012 = vmatpush3.bf16.msra.mxu1 %v3318_v3  ;;  %v6363_v3 = vpack.c.bf16 %v6238_v14, %v6238_v14 }
0x5914   :  { %5023 = vmatprep.subr.bf16.mxu1 %v5483_v1 }
0x5918   :  { %v5434_v4 = vpop.eup %5433 }
0x5919   :  { %v3310_v8 = vmul.f32 %v5434_v4, %v5430_v13  ;;  %v3776_v4 = vmul.f32 0.35355338, %v6265_v32 }
0x591b   :  { %v3311_v7 = vpack.c.bf16 %v3310_v8, %v3310_v8  ;;  %v6368_v5 = vpack.c.bf16 %v3776_v4, %v3776_v4 }
0x591d   :  { %5014 = vmatmul.mubr.msk.bf16.vlgmr.msra.gmra.mrb[80].mxu1 %vm3140_vm10, %v3311_v7 }
0x591e   :  { %5024 = vmatpush3.bf16.msra.mxu1 %v6311_v9  ;;  %5025 = vmatprep.mubr.msk.bf16.mxu1 %vm5484_vm0, %v5483_v1 }
0x591f   :  { %5035 = vmatprep.subr.bf16.mxu1 %v5483_v1 }
0x597d   :  { %v3242_v10 = vpop.f32.mrb[76].mxu1 }
0x597e   :  { %v3248_v24 = vpack.c.bf16 %v3242_v10, %v3242_v10  ;;  %v5003_v15 = vpop.f32.mrb[77].mxu1 }
0x597f   :  { %v3245_v17 = vpop.f32.mrb[78].mxu1 }
0x5980   :  { %v5004_v18 = vpop.f32.mrb[79].mxu1  ;;  %5026 = vmatmul.mubr.msk.bf16.vlgmr.msra.gmra.mrb[84].mxu1 %vm3140_vm10, %v3248_v24 }
0x5981   :  { %5037 = vmatprep.mubr.msk.bf16.mxu1 %vm5484_vm0, %v5483_v1 }
0x59f0   :  { %v3354_v48 = vpop.f32.mrb[80].mxu1 }
0x59f1   :  { %v3360_v21 = vpack.c.bf16 %v3354_v48, %v3354_v48  ;;  %v5015_v22 = vpop.f32.mrb[81].mxu1 }
0x59f2   :  { %v3357_v23 = vpop.f32.mrb[82].mxu1 }
0x59f3   :  { %v5016_v26 = vpop.f32.mrb[83].mxu1  ;;  %5020 = vmatmul.mubr.msk.bf16.vlgmr.msra.gmra.mrb[84].mxu0 %vm3140_vm10, %v3360_v21 }
0x59f4   :  { %5030 = vmatpush3.bf16.xpose.msra.mxu0 %v3461_v25  ;;  %5031 = vmatprep.mubr.msk.bf16.mxu0 %vm5484_vm0, %v5483_v1 }
0x59f5   :  { %5041 = vmatprep.subr.bf16.mxu0 %v5483_v1 }
0x59fb   :  { %5032 = vmatmul.mubr.msk.bf16.vlgmr.msra.gmra.mrb[88].mxu0 %vm3140_vm10, %v3454_v27 }
0x59fc   :  { %5043 = vmatprep.mubr.msk.bf16.mxu0 %vm5484_vm0, %v5483_v1  ;;  %5042 = vmatpush3.bf16.msra.mxu0 %v6353_v59 }
0x59fd   :  { %5053 = vmatprep.subr.bf16.mxu0 %v5483_v1 }
0x5a53   :  { %v3447_v30 = vpop.f32.mrb[84].mxu1 }
0x5a54   :  { %v5027_v44 = vpop.f32.mrb[85].mxu1 }
0x5a55   :  { %v3450_v31 = vpop.f32.mrb[86].mxu1 }
0x5a56   :  { %v5028_v33 = vpop.f32.mrb[87].mxu1  ;;  %v2993_v31 = vld [vmem:[%s6518_s22] sm:$0xf] }
0x5a57   :  { %v6401_v33 = vsel %vm774_vm4, %v2993_v31, 0 }
0x5ac6   :  { %v3401_v34 = vpop.f32.mrb[84].mxu0 }
0x5ac7   :  { %v6329_v35 = vadd.f32 %v3447_v30, %v3401_v34  ;;  %v5021_v38 = vpop.f32.mrb[85].mxu0 }
0x5ac8   :  { %v3404_v40 = vpop.f32.mrb[86].mxu0 }
0x5ac9   :  { %v5022_v11 = vpop.f32.mrb[87].mxu0 }
0x5ace   :  { %v3497_v42 = vpop.f32.mrb[88].mxu0 }
0x5acf   :  { %v5033_v39 = vpop.f32.mrb[89].mxu0  ;;  %v3503_v16 = vsel %vm3140_vm10, %v3497_v42, -inf }
0x5ad0   :  { %3504 = vmax.xlane.f32.xlu0 %v3503_v16  ;;  %v3500_v46 = vpop.f32.mrb[90].mxu0 }
0x5ad1   :  { %v5034_v47 = vpop.f32.mrb[91].mxu0 }
0x5ae6   :  { %3515 = vrot.lane.b32.xlu0 %v6236_v12, %s5492_s19 }
0x5aea   :  { %3611 = vrot.lane.b32.xlu0 %v6267_v41, %s5493_s20 }
0x5b5d   :  { %v3505_v28 = vpop.xlane.xlu0 %3504 }
0x5b5e   :  { %v3506_v2 = vsub.f32 %v3497_v42, %v3505_v28 }
0x5b60   :  { %v3507_v49 = vmul.f32 1.442695, %v3506_v2 }
0x5b61   :  { %v3516_v6 = vpop.permute.xlu0 %3515 }
0x5b62   :  { %5435 = vpow2.f32 %v3507_v49  ;;  %v3521_v50 = vsel %vm774_vm4, %v3516_v6, 0 }
0x5b63   :  { %5036 = vmatpush3.bf16.msra.mxu1 %v3521_v50 }
0x5b64   :  { %5047 = vmatprep.subr.bf16.mxu1 %v5483_v1 }
0x5b65   :  { %v3612_v57 = vpop.permute.xlu0 %3611 }
0x5b6c   :  { %v5436_v63 = vpop.eup %5435 }
0x5b6d   :  { %v3509_v52 = vsel %vm3140_vm10, %v5436_v63, 0.0 }
0x5b6e   :  { %3510 = vadd.xlane.f32.xlu1 %v3509_v52 }
0x5b7f   :  { %3613 = vrot.lane.b32.xlu1 %v6236_v12, %s5493_s20 }
0x5bfb   :  { %v3511_v53 = vpop.xlane.xlu1 %3510 }
0x5bfc   :  { %5437 = vrcp.f32 %v3511_v53 }
0x5bff   :  { %v3614_v54 = vpop.permute.xlu1 %3613 }
0x5c00   :  { %v3619_v56 = vsel %vm3140_vm10, %v3614_v54, 0 }
0x5c06   :  { %v5438_v41 = vpop.eup %5437 }
0x5c07   :  { %v3513_v51 = vmul.f32 %v5438_v41, %v5436_v63 }
0x5c09   :  { %v3514_v55 = vpack.c.bf16 %v3513_v51, %v3513_v51 }
0x5c0b   :  { %5038 = vmatmul.mubr.msk.bf16.vlgmr.msra.gmra.mrb[88].mxu1 %vm3140_vm10, %v3514_v55 }
0x5c0c   :  { %5048 = vmatpush3.bf16.xpose.msra.mxu1 %v3619_v56  ;;  %5049 = vmatprep.mubr.msk.bf16.mxu1 %vm5484_vm0, %v5483_v1 }
0x5c0d   :  { %5059 = vmatprep.subr.bf16.mxu1 %v5483_v1 }
0x5c13   :  { %5050 = vmatmul.mubr.msk.bf16.vlgmr.msra.gmra.mrb[92].mxu1 %vm3140_vm10, %v3612_v57 }
0x5c14   :  { %5061 = vmatprep.mubr.msk.bf16.mxu1 %vm5484_vm0, %v5483_v1  ;;  %5060 = vmatpush3.bf16.msra.mxu1 %v6401_v33 }
0x5c15   :  { %5071 = vmatprep.subr.bf16.mxu1 %v5483_v1 }
0x5cde   :  { %v3557_v60 = vpop.f32.mrb[88].mxu1 }
0x5cdf   :  { %v3563_v13 = vpack.c.bf16 %v3557_v60, %v3557_v60  ;;  %v5039_v45 = vpop.f32.mrb[89].mxu1 }
0x5ce0   :  { %v3560_v36 = vpop.f32.mrb[90].mxu1 }
0x5ce1   :  { %v5040_v37 = vpop.f32.mrb[91].mxu1  ;;  %5044 = vmatmul.mubr.msk.bf16.vlgmr.msra.gmra.mrb[92].mxu0 %vm3140_vm10, %v3563_v13  ;;  %v6425_v13 = vld [vmem:[%s6514_s18] ss:$0 sm:$0xff]  ;;  %s5495_s18 = smov [#allocation2]  }
0x5ce2   :  { %5055 = vmatprep.mubr.msk.bf16.mxu0 %vm5484_vm0, %v5483_v1  ;;  %s4403_s13 = sshll.u32 %s5495_s18, 4  ;;  %s4404_s13 = int_to_ptr.vmem [resolvable:$true] %s4403_s13 }
0x5ce3   :  { %s5459_s7 = scalar_lea.vmem %s4404_s13, 256  ;;  %p5464_p1 = scmp.lt.s32.totalorder %s4404_s13, %s4404_s13 }
0x5ce4   :  { %p5460_p0 = scmp.ne.s32.totalorder %s4404_s13, %s5459_s7  ;;  %p5465_p2 = scmp.lt.s32.totalorder %s5459_s7, %s5459_s7 }
0x5ce6   :  { %v3655_v61 = vpop.f32.mrb[92].mxu1  ;;  %p5466_p3 = por %p5465_p2, %p5464_p1 }
0x5ce7   :  { %v5051_v62 = vpop.f32.mrb[93].mxu1  ;;  %v3661_v43 = vsel %vm3140_vm10, %v3655_v61, -inf }
0x5ce8   :  { %3662 = vmax.xlane.f32.xlu1 %v3661_v43  ;;  %v3658_v20 = vpop.f32.mrb[94].mxu1  ;;  %p5467_p4 = pnand %p5466_p3, %p5460_p0 }
0x5ce9   :  { %v5052_v0 = vpop.f32.mrb[95].mxu1 }
0x5cf9   :  { %3890 = vrot.lane.b32.xlu1 %v6363_v3, %s5488_s8 }
0x5cfd   :  { %3888 = vrot.lane.b32.xlu1 %v6368_v5, %s5488_s8 }
0x5d75   :  { %v3663_v8 = vpop.xlane.xlu1 %3662 }
0x5d76   :  { %v3664_v7 = vsub.f32 %v3655_v61, %v3663_v8 }
0x5d78   :  { %v3665_v10 = vmul.f32 1.442695, %v3664_v7 }
0x5d79   :  { %v3891_v27 = vpop.permute.xlu1 %3890 }
0x5d7a   :  { %5439 = vpow2.f32 %v3665_v10  ;;  %v3896_v30 = vsel %vm3140_vm10, %v3891_v27, 0 }
0x5d7d   :  { %v3889_v44 = vpop.permute.xlu1 %3888 }
0x5d84   :  { %v5440_v24 = vpop.eup %5439 }
0x5d85   :  { %v3667_v15 = vsel %vm3140_vm10, %v5440_v24, 0.0 }
0x5d86   :  { %3668 = vadd.xlane.f32.xlu0 %v3667_v15 }
0x5d9c   :  { %3673 = vrot.lane.b32.xlu0 %v6236_v12, %s5494_s21  ;;  %v3783_v12 = vsel %vm3140_vm10, %v6363_v3, 0 }
0x5db4   :  { %v3604_v14 = vpop.f32.mrb[92].mxu0 }
0x5db5   :  { %v6376_v32 = vadd.f32 %v3604_v14, %v6329_v35  ;;  %v5045_v17 = vpop.f32.mrb[93].mxu0 }
0x5db6   :  { %v3607_v18 = vpop.f32.mrb[94].mxu0 }
0x5db7   :  { %v5046_v19 = vpop.f32.mrb[95].mxu0 }
0x5e13   :  { %v3669_v48 = vpop.xlane.xlu0 %3668 }
0x5e14   :  { %5441 = vrcp.f32 %v3669_v48 }
0x5e17   :  { %v3674_v21 = vpop.permute.xlu0 %3673 }
0x5e18   :  { %v3679_v22 = vsel %vm774_vm4, %v3674_v21, 0 }
0x5e19   :  { %5054 = vmatpush3.bf16.msra.mxu0 %v3679_v22 }
0x5e1a   :  { %5065 = vmatprep.subr.bf16.mxu0 %v5483_v1 }
0x5e1e   :  { %v5442_v23 = vpop.eup %5441 }
0x5e1f   :  { %v3671_v25 = vmul.f32 %v5442_v23, %v5440_v24 }
0x5e21   :  { %v3672_v26 = vpack.c.bf16 %v3671_v25, %v3671_v25 }
0x5e23   :  { %5056 = vmatmul.mubr.msk.bf16.vlgmr.msra.gmra.mrb[96].mxu0 %vm3140_vm10, %v3672_v26 }
0x5e24   :  { %5066 = vmatpush3.bf16.xpose.msra.mxu0 %v3783_v12  ;;  %5067 = vmatprep.mubr.msk.bf16.mxu0 %vm5484_vm0, %v5483_v1 }
0x5e25   :  { %5077 = vmatprep.subr.bf16.mxu0 %v5483_v1 }
0x5e2b   :  { %5068 = vmatmul.mubr.msk.bf16.vlgmr.msra.gmra.mrb[100].mxu0 %vm3140_vm10, %v6368_v5 }
0x5e2c   :  { %5078 = vmatpush3.bf16.xpose.msra.mxu0 %v3896_v30  ;;  %5079 = vmatprep.mubr.msk.bf16.mxu0 %vm5484_vm0, %v5483_v1 }
0x5e2d   :  { %5089 = vmatprep.subr.bf16.mxu0 %v5483_v1 }
0x5e33   :  { %5080 = vmatmul.mubr.msk.bf16.vlgmr.msra.gmra.mrb[104].mxu0 %vm3140_vm10, %v3889_v44 }
0x5e34   :  { %5090 = vmatpush3.bf16.msra.mxu0 %v6301_v29  ;;  %5091 = vmatprep.mubr.msk.bf16.mxu0 %vm5484_vm0, %v5483_v1 }
0x5e35   :  { %5101 = vmatprep.subr.bf16.mxu0 %v5483_v1 }
0x5ef6   :  { %v3715_v34 = vpop.f32.mrb[96].mxu0 }
0x5ef7   :  { %v3721_v35 = vpack.c.bf16 %v3715_v34, %v3715_v34  ;;  %v5057_v38 = vpop.f32.mrb[97].mxu0 }
0x5ef8   :  { %v3718_v29 = vpop.f32.mrb[98].mxu0 }
0x5ef9   :  { %v5058_v40 = vpop.f32.mrb[99].mxu0  ;;  %5062 = vmatmul.mubr.msk.bf16.vlgmr.msra.gmra.mrb[96].mxu1 %vm3140_vm10, %v3721_v35 }
0x5efa   :  { %5073 = vmatprep.mubr.msk.bf16.mxu1 %vm5484_vm0, %v5483_v1 }
0x5efe   :  { %v3819_v11 = vpop.f32.mrb[100].mxu0 }
0x5eff   :  { %v5069_v42 = vpop.f32.mrb[101].mxu0  ;;  %v3825_v39 = vsel %vm3140_vm10, %v3819_v11, -inf }
0x5f00   :  { %3826 = vmax.xlane.f32.xlu0 %v3825_v39  ;;  %v3822_v16 = vpop.f32.mrb[102].mxu0 }
0x5f01   :  { %v5070_v46 = vpop.f32.mrb[103].mxu0 }
0x5f06   :  { %v3932_v47 = vpop.f32.mrb[104].mxu0 }
0x5f07   :  { %v5081_v28 = vpop.f32.mrb[105].mxu0  ;;  %v3938_v2 = vsel %vm3140_vm10, %v3932_v47, -inf }
0x5f08   :  { %3939 = vmax.xlane.f32.xlu1 %v3938_v2  ;;  %v3935_v49 = vpop.f32.mrb[106].mxu0 }
0x5f09   :  { %v5082_v6 = vpop.f32.mrb[107].mxu0 }
0x5f19   :  { %3838 = vrot.lane.b32.xlu1 %v6363_v3, %s5489_s16 }
0x5f1d   :  { %4087 = vrot.lane.b32.xlu1 %v6363_v3, %s5490_s24 }
0x5f21   :  { %4085 = vrot.lane.b32.xlu1 %v6368_v5, %s5490_s24 }
0x5f8d   :  { %v3827_v50 = vpop.xlane.xlu0 %3826 }
0x5f8e   :  { %v3828_v63 = vsub.f32 %v3819_v11, %v3827_v50 }
0x5f90   :  { %v3829_v52 = vmul.f32 1.442695, %v3828_v63 }
0x5f92   :  { %5443 = vpow2.f32 %v3829_v52 }
0x5f95   :  { %v3940_v53 = vpop.xlane.xlu1 %3939 }
0x5f96   :  { %v3941_v41 = vsub.f32 %v3932_v47, %v3940_v53 }
0x5f98   :  { %v3942_v51 = vmul.f32 1.442695, %v3941_v41 }
0x5f99   :  { %v3839_v54 = vpop.permute.xlu1 %3838 }
0x5f9a   :  { %5445 = vpow2.f32 %v3942_v51  ;;  %v3844_v55 = vsel %vm774_vm4, %v3839_v54, 0 }
0x5f9b   :  { %5072 = vmatpush3.bf16.msra.mxu1 %v3844_v55 }
0x5f9c   :  { %v5444_v56 = vpop.eup %5443  ;;  %5083 = vmatprep.subr.bf16.mxu1 %v5483_v1 }
0x5f9d   :  { %v3831_v57 = vsel %vm3140_vm10, %v5444_v56, 0.0  ;;  %v4088_v22 = vpop.permute.xlu1 %4087 }
0x5f9e   :  { %3832 = vadd.xlane.f32.xlu0 %v3831_v57  ;;  %v4093_v12 = vsel %vm3140_vm10, %v4088_v22, 0 }
0x5fa1   :  { %v4086_v30 = vpop.permute.xlu1 %4085 }
0x5fa4   :  { %v5446_v58 = vpop.eup %5445 }
0x5fa5   :  { %v3944_v60 = vsel %vm3140_vm10, %v5446_v58, 0.0 }
0x5fa6   :  { %3945 = vadd.xlane.f32.xlu0 %v3944_v60 }
0x5fbc   :  { %3950 = vrot.lane.b32.xlu0 %v6363_v3, %s5491_s10 }
0x5fcc   :  { %v3762_v45 = vpop.f32.mrb[96].mxu1 }
0x5fcd   :  { %v3768_v36 = vadd.f32 %v3762_v45, %v6376_v32  ;;  %v5063_v37 = vpop.f32.mrb[97].mxu1 }
0x5fce   :  { %v3765_v61 = vpop.f32.mrb[98].mxu1 }
0x5fcf   :  { %v3775_v62 = vadd.f32 %v6425_v13, %v3768_v36  ;;  %v5064_v43 = vpop.f32.mrb[99].mxu1 }
0x5fd1   :  { %4396 = vst.msk [vmem:[#allocation2] sm:$0xff] %vm155_vm2, %v3775_v62 }
0x602b   :  { %v3833_v20 = vpop.xlane.xlu0 %3832 }
0x602c   :  { %5447 = vrcp.f32 %v3833_v20 }
0x6033   :  { %v3946_v0 = vpop.xlane.xlu0 %3945 }
0x6034   :  { %5449 = vrcp.f32 %v3946_v0 }
0x6036   :  { %v5448_v4 = vpop.eup %5447 }
0x6037   :  { %v3835_v8 = vmul.f32 %v5448_v4, %v5444_v56  ;;  %v3951_v7 = vpop.permute.xlu0 %3950 }
0x6038   :  { %v3956_v24 = vsel %vm774_vm4, %v3951_v7, 0 }
0x6039   :  { %v3836_v10 = vpack.c.bf16 %v3835_v8, %v3835_v8 }
0x603b   :  { %5074 = vmatmul.mubr.msk.bf16.vlgmr.msra.gmra.mrb[100].mxu1 %vm3140_vm10, %v3836_v10 }
0x603c   :  { %5084 = vmatpush3.bf16.msra.mxu1 %v3956_v24  ;;  %5085 = vmatprep.mubr.msk.bf16.mxu1 %vm5484_vm0, %v5483_v1 }
0x603d   :  { %5095 = vmatprep.subr.bf16.mxu1 %v5483_v1 }
0x603e   :  { %v5450_v15 = vpop.eup %5449 }
0x603f   :  { %v3948_v14 = vmul.f32 %v5450_v15, %v5446_v58 }
0x6041   :  { %v3949_v32 = vpack.c.bf16 %v3948_v14, %v3948_v14 }
0x6043   :  { %5086 = vmatmul.mubr.msk.bf16.vlgmr.msra.gmra.mrb[104].mxu1 %vm3140_vm10, %v3949_v32 }
0x6044   :  { %5096 = vmatpush3.bf16.msra.mxu1 %v6311_v9  ;;  %5097 = vmatprep.mubr.msk.bf16.mxu1 %vm5484_vm0, %v5483_v1 }
0x6045   :  { %5107 = vmatprep.subr.bf16.mxu1 %v5483_v1 }
0x610e   :  { %v3880_v17 = vpop.f32.mrb[100].mxu1 }
0x610f   :  { %v3886_v18 = vpack.c.bf16 %v3880_v17, %v3880_v17  ;;  %v5075_v19 = vpop.f32.mrb[101].mxu1 }
0x6110   :  { %v3883_v48 = vpop.f32.mrb[102].mxu1 }
0x6111   :  { %v5076_v21 = vpop.f32.mrb[103].mxu1  ;;  %5098 = vmatmul.mubr.msk.bf16.vlgmr.msra.gmra.mrb[108].mxu1 %vm3140_vm10, %v3886_v18 }
0x6112   :  { %5109 = vmatprep.mubr.msk.bf16.mxu1 %vm5484_vm0, %v5483_v1 }
0x6116   :  { %v3992_v23 = vpop.f32.mrb[104].mxu1 }
0x6117   :  { %v3998_v25 = vpack.c.bf16 %v3992_v23, %v3992_v23  ;;  %v5087_v26 = vpop.f32.mrb[105].mxu1 }
0x6118   :  { %v3995_v9 = vpop.f32.mrb[106].mxu1 }
0x6119   :  { %v5088_v27 = vpop.f32.mrb[107].mxu1  ;;  %5092 = vmatmul.mubr.msk.bf16.vlgmr.msra.gmra.mrb[108].mxu0 %vm3140_vm10, %v3998_v25 }
0x611a   :  { %5102 = vmatpush3.bf16.xpose.msra.mxu0 %v4093_v12  ;;  %5103 = vmatprep.mubr.msk.bf16.mxu0 %vm5484_vm0, %v5483_v1 }
0x611b   :  { %5113 = vmatprep.subr.bf16.mxu0 %v5483_v1 }
0x6121   :  { %5104 = vmatmul.mubr.msk.bf16.vlgmr.msra.gmra.mrb[112].mxu0 %vm3140_vm10, %v4086_v30 }
0x6122   :  { %5114 = vmatpush3.bf16.msra.mxu0 %v6353_v59  ;;  %5115 = vmatprep.mubr.msk.bf16.mxu0 %vm5484_vm0, %v5483_v1 }
0x6123   :  { %5125 = vmatprep.subr.bf16.mxu0 %v5483_v1 }
0x61e4   :  { %v4079_v44 = vpop.f32.mrb[108].mxu1 }
0x61e5   :  { %v5099_v31 = vpop.f32.mrb[109].mxu1 }
0x61e6   :  { %v4082_v34 = vpop.f32.mrb[110].mxu1 }
0x61e7   :  { %v5100_v35 = vpop.f32.mrb[111].mxu1 }
0x61ec   :  { %v4036_v38 = vpop.f32.mrb[108].mxu0 }
0x61ed   :  { %v4080_v29 = vadd.f32 %v4079_v44, %v4036_v38  ;;  %v5093_v40 = vpop.f32.mrb[109].mxu0 }
0x61ee   :  { %v4039_v11 = vpop.f32.mrb[110].mxu0 }
0x61ef   :  { %v5094_v42 = vpop.f32.mrb[111].mxu0 }
0x61f4   :  { %v4129_v39 = vpop.f32.mrb[112].mxu0 }
0x61f5   :  { %v5105_v16 = vpop.f32.mrb[113].mxu0  ;;  %v4135_v46 = vsel %vm3140_vm10, %v4129_v39, -inf }
0x61f6   :  { %4136 = vmax.xlane.f32.xlu0 %v4135_v46  ;;  %v4132_v59 = vpop.f32.mrb[114].mxu0 }
0x61f7   :  { %v5106_v47 = vpop.f32.mrb[115].mxu0 }
0x620c   :  { %4147 = vrot.lane.b32.xlu0 %v6363_v3, %s5492_s19 }
0x6210   :  { %4240 = vrot.lane.b32.xlu0 %v6368_v5, %s5493_s20 }
0x6283   :  { %v4137_v28 = vpop.xlane.xlu0 %4136 }
0x6284   :  { %v4138_v2 = vsub.f32 %v4129_v39, %v4137_v28 }
0x6286   :  { %v4139_v49 = vmul.f32 1.442695, %v4138_v2 }
0x6287   :  { %v4148_v6 = vpop.permute.xlu0 %4147 }
0x6288   :  { %5451 = vpow2.f32 %v4139_v49  ;;  %v4153_v50 = vsel %vm774_vm4, %v4148_v6, 0 }
0x6289   :  { %5108 = vmatpush3.bf16.msra.mxu1 %v4153_v50 }
0x628a   :  { %5119 = vmatprep.subr.bf16.mxu1 %v5483_v1 }
0x628b   :  { %v4241_v56 = vpop.permute.xlu0 %4240 }
0x6292   :  { %v5452_v63 = vpop.eup %5451 }
0x6293   :  { %v4141_v52 = vsel %vm3140_vm10, %v5452_v63, 0.0 }
0x6294   :  { %4142 = vadd.xlane.f32.xlu1 %v4141_v52 }
0x62a5   :  { %4242 = vrot.lane.b32.xlu1 %v6363_v3, %s5493_s20 }
0x6321   :  { %v4143_v53 = vpop.xlane.xlu1 %4142 }
0x6322   :  { %5453 = vrcp.f32 %v4143_v53 }
0x6325   :  { %v4243_v51 = vpop.permute.xlu1 %4242 }
0x6326   :  { %v4248_v55 = vsel %vm3140_vm10, %v4243_v51, 0 }
0x632c   :  { %v5454_v5 = vpop.eup %5453 }
0x632d   :  { %v4145_v41 = vmul.f32 %v5454_v5, %v5452_v63 }
0x632f   :  { %v4146_v54 = vpack.c.bf16 %v4145_v41, %v4145_v41 }
0x6331   :  { %5110 = vmatmul.mubr.msk.bf16.vlgmr.msra.gmra.mrb[112].mxu1 %vm3140_vm10, %v4146_v54 }
0x6332   :  { %5120 = vmatpush3.bf16.xpose.msra.mxu1 %v4248_v55  ;;  %5121 = vmatprep.mubr.msk.bf16.mxu1 %vm5484_vm0, %v5483_v1 }
0x6333   :  { %5131 = vmatprep.subr.bf16.mxu1 %v5483_v1 }
0x6339   :  { %5122 = vmatmul.mubr.msk.bf16.vlgmr.msra.gmra.mrb[116].mxu1 %vm3140_vm10, %v4241_v56 }
0x633a   :  { %5132 = vmatpush3.bf16.msra.mxu1 %v6401_v33  ;;  %5133 = vmatprep.mubr.msk.bf16.mxu1 %vm5484_vm0, %v5483_v1 }
0x6404   :  { %v4189_v57 = vpop.f32.mrb[112].mxu1 }
0x6405   :  { %v4195_v58 = vpack.c.bf16 %v4189_v57, %v4189_v57  ;;  %v5111_v60 = vpop.f32.mrb[113].mxu1 }
0x6406   :  { %v4192_v45 = vpop.f32.mrb[114].mxu1 }
0x6407   :  { %v5112_v36 = vpop.f32.mrb[115].mxu1  ;;  %5116 = vmatmul.mubr.msk.bf16.vlgmr.msra.gmra.mrb[116].mxu0 %vm3140_vm10, %v4195_v58 }
0x6408   :  { %5127 = vmatprep.mubr.msk.bf16.mxu0 %vm5484_vm0, %v5483_v1 }
0x640c   :  { %v4284_v37 = vpop.f32.mrb[116].mxu1 }
0x640d   :  { %v5123_v61 = vpop.f32.mrb[117].mxu1  ;;  %v4290_v62 = vsel %vm3140_vm10, %v4284_v37, -inf }
0x640e   :  { %4291 = vmax.xlane.f32.xlu1 %v4290_v62  ;;  %v4287_v43 = vpop.f32.mrb[118].mxu1 }
0x640f   :  { %v5124_v33 = vpop.f32.mrb[119].mxu1 }
0x649b   :  { %v4292_v20 = vpop.xlane.xlu1 %4291 }
0x649c   :  { %v4293_v0 = vsub.f32 %v4284_v37, %v4292_v20 }
0x649e   :  { %v4294_v4 = vmul.f32 1.442695, %v4293_v0 }
0x64a0   :  { %5455 = vpow2.f32 %v4294_v4 }
0x64aa   :  { %v5456_v8 = vpop.eup %5455 }
0x64ab   :  { %v4296_v7 = vsel %vm3140_vm10, %v5456_v8, 0.0 }
0x64ac   :  { %4297 = vadd.xlane.f32.xlu0 %v4296_v7 }
0x64c2   :  { %4302 = vrot.lane.b32.xlu0 %v6363_v3, %s5494_s21 }
0x64da   :  { %v4233_v10 = vpop.f32.mrb[116].mxu0 }
0x64db   :  { %v4239_v1 = vadd.f32 %v4233_v10, %v4080_v29  ;;  %v5117_v24 = vpop.f32.mrb[117].mxu0 }
0x64dc   :  { %v4236_v15 = vpop.f32.mrb[118].mxu0 }
0x64dd   :  { %v5118_v14 = vpop.f32.mrb[119].mxu0 }
0x6539   :  { %v4298_v32 = vpop.xlane.xlu0 %4297 }
0x653a   :  { %5457 = vrcp.f32 %v4298_v32 }
0x653d   :  { %v4303_v17 = vpop.permute.xlu0 %4302 }
0x653e   :  { %v4308_v18 = vsel %vm774_vm4, %v4303_v17, 0 }
0x653f   :  { %5126 = vmatpush3.bf16.msra.mxu0 %v4308_v18 }
0x6544   :  { %v5458_v19 = vpop.eup %5457 }
0x6545   :  { %v4300_v48 = vmul.f32 %v5458_v19, %v5456_v8 }
0x6547   :  { %v4301_v21 = vpack.c.bf16 %v4300_v48, %v4300_v48 }
0x6549   :  { %5128 = vmatmul.mubr.msk.bf16.vlgmr.msra.gmra.mrb[120].mxu0 %vm3140_vm10, %v4301_v21 }
0x661c   :  { %v4344_v22 = vpop.f32.mrb[120].mxu0 }
0x661d   :  { %v4350_v23 = vpack.c.bf16 %v4344_v22, %v4344_v22  ;;  %v5129_v25 = vpop.f32.mrb[121].mxu0 }
0x661e   :  { %v4347_v3 = vpop.f32.mrb[122].mxu0 }
0x661f   :  { %v5130_v26 = vpop.f32.mrb[123].mxu0  ;;  %5134 = vmatmul.mubr.msk.bf16.vlgmr.msra.gmra.mrb[120].mxu1 %vm3140_vm10, %v4350_v23 }
0x66f2   :  { %v4388_v9 = vpop.f32.mrb[120].mxu1 }
0x66f3   :  { %v4394_v12 = vadd.f32 %v4388_v9, %v4239_v1  ;;  %v5135_v27 = vpop.f32.mrb[121].mxu1 }
0x66f4   :  { %v4391_v30 = vpop.f32.mrb[122].mxu1 }
0x66f5   :  { %v4395_v44 = vadd.f32 %v6425_v13, %v4394_v12  ;;  %v5136_v31 = vpop.f32.mrb[123].mxu1 }
0x66f7   :  { %4397 = vst.msk [vmem:[#allocation2 + $0x8] sm:$0xff] %vm155_vm2, %v4395_v44 }
0x66f8   :  { %5470 = shalt.err (!%p5467_p4)
}
0x66f9   :  { %s5471_s15 = scalar_lea.hbm %s6519_s23, 256 }
0x66fa   :  { %p5472_p5 = scmp.ne.s32.totalorder %s6519_s23, %s5471_s15  ;;  %p5475_p6 = scmp.lt.u32.totalorder %s5471_s15, %s6519_s23 }
0x66fc   :  { %p5477_p7 = pnand %p5475_p6, %p5472_p5 }
0x66fe   :  { %5480 = shalt.err (!%p5477_p7)
}
0x66ff   :  { %s5496_s17 = smov 128   ;;  %s5497_s4 = smov 8  }
0x6700   :  { %4409 = dma.vmem_to_hbm [thread:$0]  %s4404_s13, 256, %s6519_s23, [#allocation3], %s5496_s17, %s5496_s17, %s5497_s4  }
0x6701   :  { %5481 = dma.done.wait [#allocation3], 256  }
0x6702   :  { %5482 = vsyncadd [#allocation3], 4294967040 }
0x6703   :  { %4413 = vsyncpa [#allocation3], 1 }

</bundles_post_ra>
